<compile_context>
chip_gen: v5e
topology: v5e:2x2
jax: 0.10.0
libtpu: 0.0.40
codegen_flags: <defaults>
</compile_context>

<pallas_src>
import functools

import jax
import jax.numpy as jnp
from jax import lax
from jax.experimental import pallas as pl
from jax.experimental.pallas import tpu as pltpu


def _sepconv_bn_kernel(x_ref, w_ref, gamma_ref, beta_ref, o_ref, xpad_ref, *,
                       kernel_size, stride, mult, groups_per_step,
                       h_out, w_out, pad, eps):
    # x_ref:     (N, G, H, W)            unpadded input channels for this step (VMEM)
    # w_ref:     (C_out, K*K)            full depthwise filter bank (SMEM)
    # gamma_ref: (C_out,)                BN scale (SMEM)
    # beta_ref:  (C_out,)                BN shift (SMEM)
    # o_ref:     (N, G*mult, H_out, W_out) this step's output channels (VMEM)
    # xpad_ref:  (N, G, Hp, Wp)          zero-bordered halo scratch (VMEM)
    s = pl.program_id(0)
    k = kernel_size
    n, _, h, w = x_ref.shape

    # ---- in-kernel halo: zero the scratch, copy the interior ----
    xpad_ref[...] = jnp.zeros_like(xpad_ref)
    xpad_ref[:, :, pad:pad + h, pad:pad + w] = x_ref[...].astype(jnp.float32)

    h_span = stride * (h_out - 1) + 1
    w_span = stride * (w_out - 1) + 1
    inv_cnt = 1.0 / float(n * h_out * w_out)

    for gl in range(groups_per_step):                       # static unroll
        # ---- depthwise conv: shared window taps, per-channel scalar FMA ----
        accs = [jnp.zeros((n, 1, h_out, w_out), jnp.float32) for _ in range(mult)]
        for ky in range(k):
            for kx in range(k):
                if stride == 1:
                    win = xpad_ref[:, gl:gl + 1, ky:ky + h_out, kx:kx + w_out]
                else:
                    # TODO(synk): stride > 1 strided slice is an untested path.
                    win = xpad_ref[:, gl:gl + 1,
                                   ky:ky + h_span,
                                   kx:kx + w_span][:, :, ::stride, ::stride]
                for m in range(mult):
                    c = (s * groups_per_step + gl) * mult + m   # global out channel
                    accs[m] = accs[m] + win * w_ref[c, ky * k + kx]

        # ---- fused BatchNorm2d: single-pass batch moments, direct store ----
        for m in range(mult):
            c = (s * groups_per_step + gl) * mult + m
            y = accs[m]                                      # (N, 1, H_out, W_out) f32
            mean = jnp.sum(y) * inv_cnt
            var = jnp.sum(y * y) * inv_cnt - mean * mean     # biased, like PyTorch
            scale = lax.rsqrt(var + eps) * gamma_ref[c]
            shift = beta_ref[c] - mean * scale
            cl = gl * mult + m                               # channel within block
            o_ref[:, cl:cl + 1, :, :] = (y * scale + shift).astype(o_ref.dtype)


def _default_num_steps(c_in):
    """2 grid steps on v7x (2 TensorCores/chip), 1 step on single-TC chips."""
    try:
        kind = jax.devices()[0].device_kind.lower()
        two_core = ("v7" in kind) or ("7x" in kind)
    except Exception:
        two_core = True          # 2 steps still run correctly on 1-TC chips
    steps = 2 if two_core else 1
    steps = max(1, min(steps, c_in))
    return steps if c_in % steps == 0 else 1


def sep_conv_forward(x, conv_w, gamma, beta, *, stride=1, eps=1e-5, num_steps=None):
    """x: (N, C_in, H, W) f32 NCHW.  conv_w: (C_out, 1, K, K) (groups=C_in, no bias)."""
    n, c_in, h, w = x.shape
    c_out, _, k, _ = conv_w.shape
    assert c_out % c_in == 0, "groups=in_planes requires out_planes % in_planes == 0"
    mult = c_out // c_in
    pad = (k - 1) // 2
    h_out = (h + 2 * pad - k) // stride + 1
    w_out = (w + 2 * pad - k) // stride + 1
    hp, wp = h + 2 * pad, w + 2 * pad

    if num_steps is None:
        num_steps = _default_num_steps(c_in)
    if c_in % num_steps != 0:
        num_steps = 1
    gps = c_in // num_steps                      # groups handled per grid step

    kernel = functools.partial(
        _sepconv_bn_kernel, kernel_size=k, stride=stride, mult=mult,
        groups_per_step=gps, h_out=h_out, w_out=w_out, pad=pad, eps=eps)

    out = pl.pallas_call(
        kernel,
        out_shape=jax.ShapeDtypeStruct((n, c_out, h_out, w_out), jnp.float32),
        grid_spec=pltpu.PrefetchScalarGridSpec(
            num_scalar_prefetch=0,
            grid=(num_steps,),
            in_specs=[
                # all batches, this step's `gps` input channels, full spatial extent
                pl.BlockSpec((n, gps, h, w), lambda s: (0, s, 0, 0)),
                # small parameter tensors live whole in SMEM (scalar reads)
                pl.BlockSpec(memory_space=pltpu.MemorySpace.SMEM),  # weights
                pl.BlockSpec(memory_space=pltpu.MemorySpace.SMEM),  # gamma
                pl.BlockSpec(memory_space=pltpu.MemorySpace.SMEM),  # beta
            ],
            # all batches, this step's gps*mult output channels, full spatial extent
            out_specs=pl.BlockSpec((n, gps * mult, h_out, w_out),
                                   lambda s: (0, s, 0, 0)),
            scratch_shapes=[pltpu.VMEM((n, gps, hp, wp), jnp.float32)],
        ),
        compiler_params=pltpu.CompilerParams(
            dimension_semantics=("parallel",)),
    )(x.astype(jnp.float32),
      conv_w.reshape(c_out, k * k).astype(jnp.float32),
      gamma.astype(jnp.float32),
      beta.astype(jnp.float32))
    return out


def _reference(x, conv_w, gamma, beta, *, stride, eps=1e-5):
    c_in = x.shape[1]
    pad = (conv_w.shape[-1] - 1) // 2
    y = lax.conv_general_dilated(
        x, conv_w, window_strides=(stride, stride),
        padding=((pad, pad), (pad, pad)),
        dimension_numbers=("NCHW", "OIHW", "NCHW"),
        feature_group_count=c_in)
    mean = y.mean(axis=(0, 2, 3), keepdims=True)
    var = ((y - mean) ** 2).mean(axis=(0, 2, 3), keepdims=True)
    return (y - mean) * lax.rsqrt(var + eps) * gamma.reshape(1, -1, 1, 1) \
        + beta.reshape(1, -1, 1, 1)


if __name__ == "__main__":
    # SepConv_6(in_planes=4, out_planes=8, kernel_size=3, stride=1)
    in_planes, out_planes, kernel_size, stride = 4, 8, 3, 1
    N, H, W = 2, 16, 16

    key = jax.random.PRNGKey(0)
    k_x, k_w, k_g, k_b = jax.random.split(key, 4)
    x = jax.random.normal(k_x, (N, in_planes, H, W), dtype=jnp.float32)
    # conv1.weight: (out_planes, in_planes // groups = 1, K, K), bias=False
    conv_w = 0.1 * jax.random.normal(
        k_w, (out_planes, 1, kernel_size, kernel_size), dtype=jnp.float32)
    # BN affine params (non-trivial values to exercise scale/shift paths)
    gamma = 1.0 + 0.1 * jax.random.normal(k_g, (out_planes,), dtype=jnp.float32)
    beta = 0.1 * jax.random.normal(k_b, (out_planes,), dtype=jnp.float32)

    out = sep_conv_forward(x, conv_w, gamma, beta, stride=stride)
    out = jax.block_until_ready(out)

    ref = _reference(x, conv_w, gamma, beta, stride=stride)
    assert out.shape == (N, out_planes, H, W)
    assert jnp.allclose(out, ref, rtol=1e-4, atol=1e-4), \
        float(jnp.max(jnp.abs(out - ref)))

    print("KERNEL_OK")
</pallas_src>

<mosaic_0001>
module attributes {stable_mosaic.version = 11 : i64} {
  func.func @_sepconv_bn_kernel(%arg0: i32, %arg1: memref<2x4x16x16xf32, #tpu.memory_space<vmem>>, %arg2: memref<8x9xf32, #tpu.memory_space<smem>>, %arg3: memref<8xf32, #tpu.memory_space<smem>>, %arg4: memref<8xf32, #tpu.memory_space<smem>>, %arg5: memref<2x8x16x16xf32, #tpu.memory_space<vmem>>, %arg6: memref<2x4x18x18xf32, #tpu.memory_space<vmem>>) attributes {dimension_semantics = [#tpu.dimension_semantics<parallel>], iteration_bounds = array<i64: 1>, scalar_prefetch = 0 : i64, scratch_operands = 1 : i64, tpu.core_type = #tpu.core_type<tc>, window_params = [{transform_indices = @transform_0, window_bounds = array<i64: 2, 4, 16, 16>}, {transform_indices = @transform_1, window_bounds = array<i64: 8, 9>}, {transform_indices = @transform_2, window_bounds = array<i64: 8>}, {transform_indices = @transform_3, window_bounds = array<i64: 8>}, {transform_indices = @transform_4, window_bounds = array<i64: 2, 8, 16, 16>}]} {
    %cst = arith.constant 0.000000e+00 : f32
    %0 = vector.broadcast %cst : f32 to vector<2x4x18x18xf32>
    %c0 = arith.constant 0 : index
    %c0_0 = arith.constant 0 : index
    %c0_1 = arith.constant 0 : index
    %c0_2 = arith.constant 0 : index
    %1 = vector.load %arg6[%c0, %c0_0, %c0_1, %c0_2] : memref<2x4x18x18xf32, #tpu.memory_space<vmem>>, vector<2x4x18x18xf32>
    tpu.vector_store %arg6[%c0, %c0_0, %c0_1, %c0_2], %0 {strides = array<i32>} : memref<2x4x18x18xf32, #tpu.memory_space<vmem>>, vector<2x4x18x18xf32>,
    %c0_3 = arith.constant 0 : index
    %c0_4 = arith.constant 0 : index
    %c0_5 = arith.constant 0 : index
    %c0_6 = arith.constant 0 : index
    %2 = vector.load %arg1[%c0_3, %c0_4, %c0_5, %c0_6] : memref<2x4x16x16xf32, #tpu.memory_space<vmem>>, vector<2x4x16x16xf32>
    %c0_7 = arith.constant 0 : index
    %c0_8 = arith.constant 0 : index
    %c1 = arith.constant 1 : index
    %c1_9 = arith.constant 1 : index
    %3 = vector.load %arg6[%c0_7, %c0_8, %c1, %c1_9] : memref<2x4x18x18xf32, #tpu.memory_space<vmem>>, vector<2x4x16x16xf32>
    tpu.vector_store %arg6[%c0_7, %c0_8, %c1, %c1_9], %2 {strides = array<i32>} : memref<2x4x18x18xf32, #tpu.memory_space<vmem>>, vector<2x4x16x16xf32>,
    %cst_10 = arith.constant 0.000000e+00 : f32
    %4 = vector.broadcast %cst_10 : f32 to vector<2x1x16x16xf32>
    %cst_11 = arith.constant 0.000000e+00 : f32
    %5 = vector.broadcast %cst_11 : f32 to vector<2x1x16x16xf32>
    %c0_12 = arith.constant 0 : index
    %c0_13 = arith.constant 0 : index
    %c0_14 = arith.constant 0 : index
    %c0_15 = arith.constant 0 : index
    %6 = vector.load %arg6[%c0_12, %c0_13, %c0_14, %c0_15] : memref<2x4x18x18xf32, #tpu.memory_space<vmem>>, vector<2x1x16x16xf32>
    %c4_i32 = arith.constant 4 : i32
    %7 = arith.muli %arg0, %c4_i32 : i32
    %c0_i32 = arith.constant 0 : i32
    %8 = arith.addi %7, %c0_i32 : i32
    %c2_i32 = arith.constant 2 : i32
    %9 = arith.muli %8, %c2_i32 : i32
    %c0_i32_16 = arith.constant 0 : i32
    %10 = arith.addi %9, %c0_i32_16 : i32
    %11 = arith.index_cast %10 : i32 to index
    %c0_17 = arith.constant 0 : index
    %12 = memref.load %arg2[%11, %c0_17] : memref<8x9xf32, #tpu.memory_space<smem>>
    %13 = vector.broadcast %12 : f32 to vector<2x1x16x16xf32>
    %14 = arith.mulf %6, %13 : vector<2x1x16x16xf32>
    %15 = arith.addf %4, %14 : vector<2x1x16x16xf32>
    %c4_i32_18 = arith.constant 4 : i32
    %16 = arith.muli %arg0, %c4_i32_18 : i32
    %c0_i32_19 = arith.constant 0 : i32
    %17 = arith.addi %16, %c0_i32_19 : i32
    %c2_i32_20 = arith.constant 2 : i32
    %18 = arith.muli %17, %c2_i32_20 : i32
    %c1_i32 = arith.constant 1 : i32
    %19 = arith.addi %18, %c1_i32 : i32
    %20 = arith.index_cast %19 : i32 to index
    %c0_21 = arith.constant 0 : index
    %21 = memref.load %arg2[%20, %c0_21] : memref<8x9xf32, #tpu.memory_space<smem>>
    %22 = vector.broadcast %21 : f32 to vector<2x1x16x16xf32>
    %23 = arith.mulf %6, %22 : vector<2x1x16x16xf32>
    %24 = arith.addf %5, %23 : vector<2x1x16x16xf32>
    %c0_22 = arith.constant 0 : index
    %c0_23 = arith.constant 0 : index
    %c0_24 = arith.constant 0 : index
    %c1_25 = arith.constant 1 : index
    %25 = vector.load %arg6[%c0_22, %c0_23, %c0_24, %c1_25] : memref<2x4x18x18xf32, #tpu.memory_space<vmem>>, vector<2x1x16x16xf32>
    %c4_i32_26 = arith.constant 4 : i32
    %26 = arith.muli %arg0, %c4_i32_26 : i32
    %c0_i32_27 = arith.constant 0 : i32
    %27 = arith.addi %26, %c0_i32_27 : i32
    %c2_i32_28 = arith.constant 2 : i32
    %28 = arith.muli %27, %c2_i32_28 : i32
    %c0_i32_29 = arith.constant 0 : i32
    %29 = arith.addi %28, %c0_i32_29 : i32
    %30 = arith.index_cast %29 : i32 to index
    %c1_30 = arith.constant 1 : index
    %31 = memref.load %arg2[%30, %c1_30] : memref<8x9xf32, #tpu.memory_space<smem>>
    %32 = vector.broadcast %31 : f32 to vector<2x1x16x16xf32>
    %33 = arith.mulf %25, %32 : vector<2x1x16x16xf32>
    %34 = arith.addf %15, %33 : vector<2x1x16x16xf32>
    %c4_i32_31 = arith.constant 4 : i32
    %35 = arith.muli %arg0, %c4_i32_31 : i32
    %c0_i32_32 = arith.constant 0 : i32
    %36 = arith.addi %35, %c0_i32_32 : i32
    %c2_i32_33 = arith.constant 2 : i32
    %37 = arith.muli %36, %c2_i32_33 : i32
    %c1_i32_34 = arith.constant 1 : i32
    %38 = arith.addi %37, %c1_i32_34 : i32
    %39 = arith.index_cast %38 : i32 to index
    %c1_35 = arith.constant 1 : index
    %40 = memref.load %arg2[%39, %c1_35] : memref<8x9xf32, #tpu.memory_space<smem>>
    %41 = vector.broadcast %40 : f32 to vector<2x1x16x16xf32>
    %42 = arith.mulf %25, %41 : vector<2x1x16x16xf32>
    %43 = arith.addf %24, %42 : vector<2x1x16x16xf32>
    %c0_36 = arith.constant 0 : index
    %c0_37 = arith.constant 0 : index
    %c0_38 = arith.constant 0 : index
    %c2 = arith.constant 2 : index
    %44 = vector.load %arg6[%c0_36, %c0_37, %c0_38, %c2] : memref<2x4x18x18xf32, #tpu.memory_space<vmem>>, vector<2x1x16x16xf32>
    %c4_i32_39 = arith.constant 4 : i32
    %45 = arith.muli %arg0, %c4_i32_39 : i32
    %c0_i32_40 = arith.constant 0 : i32
    %46 = arith.addi %45, %c0_i32_40 : i32
    %c2_i32_41 = arith.constant 2 : i32
    %47 = arith.muli %46, %c2_i32_41 : i32
    %c0_i32_42 = arith.constant 0 : i32
    %48 = arith.addi %47, %c0_i32_42 : i32
    %49 = arith.index_cast %48 : i32 to index
    %c2_43 = arith.constant 2 : index
    %50 = memref.load %arg2[%49, %c2_43] : memref<8x9xf32, #tpu.memory_space<smem>>
    %51 = vector.broadcast %50 : f32 to vector<2x1x16x16xf32>
    %52 = arith.mulf %44, %51 : vector<2x1x16x16xf32>
    %53 = arith.addf %34, %52 : vector<2x1x16x16xf32>
    %c4_i32_44 = arith.constant 4 : i32
    %54 = arith.muli %arg0, %c4_i32_44 : i32
    %c0_i32_45 = arith.constant 0 : i32
    %55 = arith.addi %54, %c0_i32_45 : i32
    %c2_i32_46 = arith.constant 2 : i32
    %56 = arith.muli %55, %c2_i32_46 : i32
    %c1_i32_47 = arith.constant 1 : i32
    %57 = arith.addi %56, %c1_i32_47 : i32
    %58 = arith.index_cast %57 : i32 to index
    %c2_48 = arith.constant 2 : index
    %59 = memref.load %arg2[%58, %c2_48] : memref<8x9xf32, #tpu.memory_space<smem>>
    %60 = vector.broadcast %59 : f32 to vector<2x1x16x16xf32>
    %61 = arith.mulf %44, %60 : vector<2x1x16x16xf32>
    %62 = arith.addf %43, %61 : vector<2x1x16x16xf32>
    %c0_49 = arith.constant 0 : index
    %c0_50 = arith.constant 0 : index
    %c1_51 = arith.constant 1 : index
    %c0_52 = arith.constant 0 : index
    %63 = vector.load %arg6[%c0_49, %c0_50, %c1_51, %c0_52] : memref<2x4x18x18xf32, #tpu.memory_space<vmem>>, vector<2x1x16x16xf32>
    %c4_i32_53 = arith.constant 4 : i32
    %64 = arith.muli %arg0, %c4_i32_53 : i32
    %c0_i32_54 = arith.constant 0 : i32
    %65 = arith.addi %64, %c0_i32_54 : i32
    %c2_i32_55 = arith.constant 2 : i32
    %66 = arith.muli %65, %c2_i32_55 : i32
    %c0_i32_56 = arith.constant 0 : i32
    %67 = arith.addi %66, %c0_i32_56 : i32
    %68 = arith.index_cast %67 : i32 to index
    %c3 = arith.constant 3 : index
    %69 = memref.load %arg2[%68, %c3] : memref<8x9xf32, #tpu.memory_space<smem>>
    %70 = vector.broadcast %69 : f32 to vector<2x1x16x16xf32>
    %71 = arith.mulf %63, %70 : vector<2x1x16x16xf32>
    %72 = arith.addf %53, %71 : vector<2x1x16x16xf32>
    %c4_i32_57 = arith.constant 4 : i32
    %73 = arith.muli %arg0, %c4_i32_57 : i32
    %c0_i32_58 = arith.constant 0 : i32
    %74 = arith.addi %73, %c0_i32_58 : i32
    %c2_i32_59 = arith.constant 2 : i32
    %75 = arith.muli %74, %c2_i32_59 : i32
    %c1_i32_60 = arith.constant 1 : i32
    %76 = arith.addi %75, %c1_i32_60 : i32
    %77 = arith.index_cast %76 : i32 to index
    %c3_61 = arith.constant 3 : index
    %78 = memref.load %arg2[%77, %c3_61] : memref<8x9xf32, #tpu.memory_space<smem>>
    %79 = vector.broadcast %78 : f32 to vector<2x1x16x16xf32>
    %80 = arith.mulf %63, %79 : vector<2x1x16x16xf32>
    %81 = arith.addf %62, %80 : vector<2x1x16x16xf32>
    %c0_62 = arith.constant 0 : index
    %c0_63 = arith.constant 0 : index
    %c1_64 = arith.constant 1 : index
    %c1_65 = arith.constant 1 : index
    %82 = vector.load %arg6[%c0_62, %c0_63, %c1_64, %c1_65] : memref<2x4x18x18xf32, #tpu.memory_space<vmem>>, vector<2x1x16x16xf32>
    %c4_i32_66 = arith.constant 4 : i32
    %83 = arith.muli %arg0, %c4_i32_66 : i32
    %c0_i32_67 = arith.constant 0 : i32
    %84 = arith.addi %83, %c0_i32_67 : i32
    %c2_i32_68 = arith.constant 2 : i32
    %85 = arith.muli %84, %c2_i32_68 : i32
    %c0_i32_69 = arith.constant 0 : i32
    %86 = arith.addi %85, %c0_i32_69 : i32
    %87 = arith.index_cast %86 : i32 to index
    %c4 = arith.constant 4 : index
    %88 = memref.load %arg2[%87, %c4] : memref<8x9xf32, #tpu.memory_space<smem>>
    %89 = vector.broadcast %88 : f32 to vector<2x1x16x16xf32>
    %90 = arith.mulf %82, %89 : vector<2x1x16x16xf32>
    %91 = arith.addf %72, %90 : vector<2x1x16x16xf32>
    %c4_i32_70 = arith.constant 4 : i32
    %92 = arith.muli %arg0, %c4_i32_70 : i32
    %c0_i32_71 = arith.constant 0 : i32
    %93 = arith.addi %92, %c0_i32_71 : i32
    %c2_i32_72 = arith.constant 2 : i32
    %94 = arith.muli %93, %c2_i32_72 : i32
    %c1_i32_73 = arith.constant 1 : i32
    %95 = arith.addi %94, %c1_i32_73 : i32
    %96 = arith.index_cast %95 : i32 to index
    %c4_74 = arith.constant 4 : index
    %97 = memref.load %arg2[%96, %c4_74] : memref<8x9xf32, #tpu.memory_space<smem>>
    %98 = vector.broadcast %97 : f32 to vector<2x1x16x16xf32>
    %99 = arith.mulf %82, %98 : vector<2x1x16x16xf32>
    %100 = arith.addf %81, %99 : vector<2x1x16x16xf32>
    %c0_75 = arith.constant 0 : index
    %c0_76 = arith.constant 0 : index
    %c1_77 = arith.constant 1 : index
    %c2_78 = arith.constant 2 : index
    %101 = vector.load %arg6[%c0_75, %c0_76, %c1_77, %c2_78] : memref<2x4x18x18xf32, #tpu.memory_space<vmem>>, vector<2x1x16x16xf32>
    %c4_i32_79 = arith.constant 4 : i32
    %102 = arith.muli %arg0, %c4_i32_79 : i32
    %c0_i32_80 = arith.constant 0 : i32
    %103 = arith.addi %102, %c0_i32_80 : i32
    %c2_i32_81 = arith.constant 2 : i32
    %104 = arith.muli %103, %c2_i32_81 : i32
    %c0_i32_82 = arith.constant 0 : i32
    %105 = arith.addi %104, %c0_i32_82 : i32
    %106 = arith.index_cast %105 : i32 to index
    %c5 = arith.constant 5 : index
    %107 = memref.load %arg2[%106, %c5] : memref<8x9xf32, #tpu.memory_space<smem>>
    %108 = vector.broadcast %107 : f32 to vector<2x1x16x16xf32>
    %109 = arith.mulf %101, %108 : vector<2x1x16x16xf32>
    %110 = arith.addf %91, %109 : vector<2x1x16x16xf32>
    %c4_i32_83 = arith.constant 4 : i32
    %111 = arith.muli %arg0, %c4_i32_83 : i32
    %c0_i32_84 = arith.constant 0 : i32
    %112 = arith.addi %111, %c0_i32_84 : i32
    %c2_i32_85 = arith.constant 2 : i32
    %113 = arith.muli %112, %c2_i32_85 : i32
    %c1_i32_86 = arith.constant 1 : i32
    %114 = arith.addi %113, %c1_i32_86 : i32
    %115 = arith.index_cast %114 : i32 to index
    %c5_87 = arith.constant 5 : index
    %116 = memref.load %arg2[%115, %c5_87] : memref<8x9xf32, #tpu.memory_space<smem>>
    %117 = vector.broadcast %116 : f32 to vector<2x1x16x16xf32>
    %118 = arith.mulf %101, %117 : vector<2x1x16x16xf32>
    %119 = arith.addf %100, %118 : vector<2x1x16x16xf32>
    %c0_88 = arith.constant 0 : index
    %c0_89 = arith.constant 0 : index
    %c2_90 = arith.constant 2 : index
    %c0_91 = arith.constant 0 : index
    %120 = vector.load %arg6[%c0_88, %c0_89, %c2_90, %c0_91] : memref<2x4x18x18xf32, #tpu.memory_space<vmem>>, vector<2x1x16x16xf32>
    %c4_i32_92 = arith.constant 4 : i32
    %121 = arith.muli %arg0, %c4_i32_92 : i32
    %c0_i32_93 = arith.constant 0 : i32
    %122 = arith.addi %121, %c0_i32_93 : i32
    %c2_i32_94 = arith.constant 2 : i32
    %123 = arith.muli %122, %c2_i32_94 : i32
    %c0_i32_95 = arith.constant 0 : i32
    %124 = arith.addi %123, %c0_i32_95 : i32
    %125 = arith.index_cast %124 : i32 to index
    %c6 = arith.constant 6 : index
    %126 = memref.load %arg2[%125, %c6] : memref<8x9xf32, #tpu.memory_space<smem>>
    %127 = vector.broadcast %126 : f32 to vector<2x1x16x16xf32>
    %128 = arith.mulf %120, %127 : vector<2x1x16x16xf32>
    %129 = arith.addf %110, %128 : vector<2x1x16x16xf32>
    %c4_i32_96 = arith.constant 4 : i32
    %130 = arith.muli %arg0, %c4_i32_96 : i32
    %c0_i32_97 = arith.constant 0 : i32
    %131 = arith.addi %130, %c0_i32_97 : i32
    %c2_i32_98 = arith.constant 2 : i32
    %132 = arith.muli %131, %c2_i32_98 : i32
    %c1_i32_99 = arith.constant 1 : i32
    %133 = arith.addi %132, %c1_i32_99 : i32
    %134 = arith.index_cast %133 : i32 to index
    %c6_100 = arith.constant 6 : index
    %135 = memref.load %arg2[%134, %c6_100] : memref<8x9xf32, #tpu.memory_space<smem>>
    %136 = vector.broadcast %135 : f32 to vector<2x1x16x16xf32>
    %137 = arith.mulf %120, %136 : vector<2x1x16x16xf32>
    %138 = arith.addf %119, %137 : vector<2x1x16x16xf32>
    %c0_101 = arith.constant 0 : index
    %c0_102 = arith.constant 0 : index
    %c2_103 = arith.constant 2 : index
    %c1_104 = arith.constant 1 : index
    %139 = vector.load %arg6[%c0_101, %c0_102, %c2_103, %c1_104] : memref<2x4x18x18xf32, #tpu.memory_space<vmem>>, vector<2x1x16x16xf32>
    %c4_i32_105 = arith.constant 4 : i32
    %140 = arith.muli %arg0, %c4_i32_105 : i32
    %c0_i32_106 = arith.constant 0 : i32
    %141 = arith.addi %140, %c0_i32_106 : i32
    %c2_i32_107 = arith.constant 2 : i32
    %142 = arith.muli %141, %c2_i32_107 : i32
    %c0_i32_108 = arith.constant 0 : i32
    %143 = arith.addi %142, %c0_i32_108 : i32
    %144 = arith.index_cast %143 : i32 to index
    %c7 = arith.constant 7 : index
    %145 = memref.load %arg2[%144, %c7] : memref<8x9xf32, #tpu.memory_space<smem>>
    %146 = vector.broadcast %145 : f32 to vector<2x1x16x16xf32>
    %147 = arith.mulf %139, %146 : vector<2x1x16x16xf32>
    %148 = arith.addf %129, %147 : vector<2x1x16x16xf32>
    %c4_i32_109 = arith.constant 4 : i32
    %149 = arith.muli %arg0, %c4_i32_109 : i32
    %c0_i32_110 = arith.constant 0 : i32
    %150 = arith.addi %149, %c0_i32_110 : i32
    %c2_i32_111 = arith.constant 2 : i32
    %151 = arith.muli %150, %c2_i32_111 : i32
    %c1_i32_112 = arith.constant 1 : i32
    %152 = arith.addi %151, %c1_i32_112 : i32
    %153 = arith.index_cast %152 : i32 to index
    %c7_113 = arith.constant 7 : index
    %154 = memref.load %arg2[%153, %c7_113] : memref<8x9xf32, #tpu.memory_space<smem>>
    %155 = vector.broadcast %154 : f32 to vector<2x1x16x16xf32>
    %156 = arith.mulf %139, %155 : vector<2x1x16x16xf32>
    %157 = arith.addf %138, %156 : vector<2x1x16x16xf32>
    %c0_114 = arith.constant 0 : index
    %c0_115 = arith.constant 0 : index
    %c2_116 = arith.constant 2 : index
    %c2_117 = arith.constant 2 : index
    %158 = vector.load %arg6[%c0_114, %c0_115, %c2_116, %c2_117] : memref<2x4x18x18xf32, #tpu.memory_space<vmem>>, vector<2x1x16x16xf32>
    %c4_i32_118 = arith.constant 4 : i32
    %159 = arith.muli %arg0, %c4_i32_118 : i32
    %c0_i32_119 = arith.constant 0 : i32
    %160 = arith.addi %159, %c0_i32_119 : i32
    %c2_i32_120 = arith.constant 2 : i32
    %161 = arith.muli %160, %c2_i32_120 : i32
    %c0_i32_121 = arith.constant 0 : i32
    %162 = arith.addi %161, %c0_i32_121 : i32
    %163 = arith.index_cast %162 : i32 to index
    %c8 = arith.constant 8 : index
    %164 = memref.load %arg2[%163, %c8] : memref<8x9xf32, #tpu.memory_space<smem>>
    %165 = vector.broadcast %164 : f32 to vector<2x1x16x16xf32>
    %166 = arith.mulf %158, %165 : vector<2x1x16x16xf32>
    %167 = arith.addf %148, %166 : vector<2x1x16x16xf32>
    %c4_i32_122 = arith.constant 4 : i32
    %168 = arith.muli %arg0, %c4_i32_122 : i32
    %c0_i32_123 = arith.constant 0 : i32
    %169 = arith.addi %168, %c0_i32_123 : i32
    %c2_i32_124 = arith.constant 2 : i32
    %170 = arith.muli %169, %c2_i32_124 : i32
    %c1_i32_125 = arith.constant 1 : i32
    %171 = arith.addi %170, %c1_i32_125 : i32
    %172 = arith.index_cast %171 : i32 to index
    %c8_126 = arith.constant 8 : index
    %173 = memref.load %arg2[%172, %c8_126] : memref<8x9xf32, #tpu.memory_space<smem>>
    %174 = vector.broadcast %173 : f32 to vector<2x1x16x16xf32>
    %175 = arith.mulf %158, %174 : vector<2x1x16x16xf32>
    %176 = arith.addf %157, %175 : vector<2x1x16x16xf32>
    %c4_i32_127 = arith.constant 4 : i32
    %177 = arith.muli %arg0, %c4_i32_127 : i32
    %c0_i32_128 = arith.constant 0 : i32
    %178 = arith.addi %177, %c0_i32_128 : i32
    %c2_i32_129 = arith.constant 2 : i32
    %179 = arith.muli %178, %c2_i32_129 : i32
    %c0_i32_130 = arith.constant 0 : i32
    %180 = arith.addi %179, %c0_i32_130 : i32
    %181 = vector.shape_cast %167 : vector<2x1x16x16xf32> to vector<1x2x1x16x16xf32>
    %cst_131 = arith.constant dense<0.000000e+00> : vector<1xf32>
    %182 = vector.multi_reduction <add>, %181, %cst_131 [1, 2, 3, 4] : vector<1x2x1x16x16xf32> to vector<1xf32>
    %183 = vector.shape_cast %182 : vector<1xf32> to vector<1x1x1x1x1xf32>
    %184 = vector.extract %183[0, 0, 0, 0, 0] : f32 from vector<1x1x1x1x1xf32>
    %cst_132 = arith.constant 0.001953125 : f32
    %185 = arith.mulf %184, %cst_132 : f32
    %186 = arith.mulf %167, %167 : vector<2x1x16x16xf32>
    %187 = vector.shape_cast %186 : vector<2x1x16x16xf32> to vector<1x2x1x16x16xf32>
    %cst_133 = arith.constant dense<0.000000e+00> : vector<1xf32>
    %188 = vector.multi_reduction <add>, %187, %cst_133 [1, 2, 3, 4] : vector<1x2x1x16x16xf32> to vector<1xf32>
    %189 = vector.shape_cast %188 : vector<1xf32> to vector<1x1x1x1x1xf32>
    %190 = vector.extract %189[0, 0, 0, 0, 0] : f32 from vector<1x1x1x1x1xf32>
    %cst_134 = arith.constant 0.001953125 : f32
    %191 = arith.mulf %190, %cst_134 : f32
    %192 = arith.mulf %185, %185 : f32
    %193 = arith.subf %191, %192 : f32
    %cst_135 = arith.constant 9.99999974E-6 : f32
    %194 = arith.addf %193, %cst_135 : f32
    %195 = math.rsqrt %194 : f32
    %196 = arith.index_cast %180 : i32 to index
    %197 = memref.load %arg3[%196] : memref<8xf32, #tpu.memory_space<smem>>
    %198 = arith.mulf %195, %197 : f32
    %199 = arith.index_cast %180 : i32 to index
    %200 = memref.load %arg4[%199] : memref<8xf32, #tpu.memory_space<smem>>
    %201 = arith.mulf %185, %198 : f32
    %202 = arith.subf %200, %201 : f32
    %203 = vector.broadcast %198 : f32 to vector<2x1x16x16xf32>
    %204 = arith.mulf %167, %203 : vector<2x1x16x16xf32>
    %205 = vector.broadcast %202 : f32 to vector<2x1x16x16xf32>
    %206 = arith.addf %204, %205 : vector<2x1x16x16xf32>
    %c0_136 = arith.constant 0 : index
    %c0_137 = arith.constant 0 : index
    %c0_138 = arith.constant 0 : index
    %c0_139 = arith.constant 0 : index
    %207 = vector.load %arg5[%c0_136, %c0_137, %c0_138, %c0_139] : memref<2x8x16x16xf32, #tpu.memory_space<vmem>>, vector<2x1x16x16xf32>
    tpu.vector_store %arg5[%c0_136, %c0_137, %c0_138, %c0_139], %206 {strides = array<i32>} : memref<2x8x16x16xf32, #tpu.memory_space<vmem>>, vector<2x1x16x16xf32>,
    %c4_i32_140 = arith.constant 4 : i32
    %208 = arith.muli %arg0, %c4_i32_140 : i32
    %c0_i32_141 = arith.constant 0 : i32
    %209 = arith.addi %208, %c0_i32_141 : i32
    %c2_i32_142 = arith.constant 2 : i32
    %210 = arith.muli %209, %c2_i32_142 : i32
    %c1_i32_143 = arith.constant 1 : i32
    %211 = arith.addi %210, %c1_i32_143 : i32
    %212 = vector.shape_cast %176 : vector<2x1x16x16xf32> to vector<1x2x1x16x16xf32>
    %cst_144 = arith.constant dense<0.000000e+00> : vector<1xf32>
    %213 = vector.multi_reduction <add>, %212, %cst_144 [1, 2, 3, 4] : vector<1x2x1x16x16xf32> to vector<1xf32>
    %214 = vector.shape_cast %213 : vector<1xf32> to vector<1x1x1x1x1xf32>
    %215 = vector.extract %214[0, 0, 0, 0, 0] : f32 from vector<1x1x1x1x1xf32>
    %cst_145 = arith.constant 0.001953125 : f32
    %216 = arith.mulf %215, %cst_145 : f32
    %217 = arith.mulf %176, %176 : vector<2x1x16x16xf32>
    %218 = vector.shape_cast %217 : vector<2x1x16x16xf32> to vector<1x2x1x16x16xf32>
    %cst_146 = arith.constant dense<0.000000e+00> : vector<1xf32>
    %219 = vector.multi_reduction <add>, %218, %cst_146 [1, 2, 3, 4] : vector<1x2x1x16x16xf32> to vector<1xf32>
    %220 = vector.shape_cast %219 : vector<1xf32> to vector<1x1x1x1x1xf32>
    %221 = vector.extract %220[0, 0, 0, 0, 0] : f32 from vector<1x1x1x1x1xf32>
    %cst_147 = arith.constant 0.001953125 : f32
    %222 = arith.mulf %221, %cst_147 : f32
    %223 = arith.mulf %216, %216 : f32
    %224 = arith.subf %222, %223 : f32
    %cst_148 = arith.constant 9.99999974E-6 : f32
    %225 = arith.addf %224, %cst_148 : f32
    %226 = math.rsqrt %225 : f32
    %227 = arith.index_cast %211 : i32 to index
    %228 = memref.load %arg3[%227] : memref<8xf32, #tpu.memory_space<smem>>
    %229 = arith.mulf %226, %228 : f32
    %230 = arith.index_cast %211 : i32 to index
    %231 = memref.load %arg4[%230] : memref<8xf32, #tpu.memory_space<smem>>
    %232 = arith.mulf %216, %229 : f32
    %233 = arith.subf %231, %232 : f32
    %234 = vector.broadcast %229 : f32 to vector<2x1x16x16xf32>
    %235 = arith.mulf %176, %234 : vector<2x1x16x16xf32>
    %236 = vector.broadcast %233 : f32 to vector<2x1x16x16xf32>
    %237 = arith.addf %235, %236 : vector<2x1x16x16xf32>
    %c0_149 = arith.constant 0 : index
    %c1_150 = arith.constant 1 : index
    %c0_151 = arith.constant 0 : index
    %c0_152 = arith.constant 0 : index
    %238 = vector.load %arg5[%c0_149, %c1_150, %c0_151, %c0_152] : memref<2x8x16x16xf32, #tpu.memory_space<vmem>>, vector<2x1x16x16xf32>
    tpu.vector_store %arg5[%c0_149, %c1_150, %c0_151, %c0_152], %237 {strides = array<i32>} : memref<2x8x16x16xf32, #tpu.memory_space<vmem>>, vector<2x1x16x16xf32>,
    %cst_153 = arith.constant 0.000000e+00 : f32
    %239 = vector.broadcast %cst_153 : f32 to vector<2x1x16x16xf32>
    %cst_154 = arith.constant 0.000000e+00 : f32
    %240 = vector.broadcast %cst_154 : f32 to vector<2x1x16x16xf32>
    %c0_155 = arith.constant 0 : index
    %c1_156 = arith.constant 1 : index
    %c0_157 = arith.constant 0 : index
    %c0_158 = arith.constant 0 : index
    %241 = vector.load %arg6[%c0_155, %c1_156, %c0_157, %c0_158] : memref<2x4x18x18xf32, #tpu.memory_space<vmem>>, vector<2x1x16x16xf32>
    %c4_i32_159 = arith.constant 4 : i32
    %242 = arith.muli %arg0, %c4_i32_159 : i32
    %c1_i32_160 = arith.constant 1 : i32
    %243 = arith.addi %242, %c1_i32_160 : i32
    %c2_i32_161 = arith.constant 2 : i32
    %244 = arith.muli %243, %c2_i32_161 : i32
    %c0_i32_162 = arith.constant 0 : i32
    %245 = arith.addi %244, %c0_i32_162 : i32
    %246 = arith.index_cast %245 : i32 to index
    %c0_163 = arith.constant 0 : index
    %247 = memref.load %arg2[%246, %c0_163] : memref<8x9xf32, #tpu.memory_space<smem>>
    %248 = vector.broadcast %247 : f32 to vector<2x1x16x16xf32>
    %249 = arith.mulf %241, %248 : vector<2x1x16x16xf32>
    %250 = arith.addf %239, %249 : vector<2x1x16x16xf32>
    %c4_i32_164 = arith.constant 4 : i32
    %251 = arith.muli %arg0, %c4_i32_164 : i32
    %c1_i32_165 = arith.constant 1 : i32
    %252 = arith.addi %251, %c1_i32_165 : i32
    %c2_i32_166 = arith.constant 2 : i32
    %253 = arith.muli %252, %c2_i32_166 : i32
    %c1_i32_167 = arith.constant 1 : i32
    %254 = arith.addi %253, %c1_i32_167 : i32
    %255 = arith.index_cast %254 : i32 to index
    %c0_168 = arith.constant 0 : index
    %256 = memref.load %arg2[%255, %c0_168] : memref<8x9xf32, #tpu.memory_space<smem>>
    %257 = vector.broadcast %256 : f32 to vector<2x1x16x16xf32>
    %258 = arith.mulf %241, %257 : vector<2x1x16x16xf32>
    %259 = arith.addf %240, %258 : vector<2x1x16x16xf32>
    %c0_169 = arith.constant 0 : index
    %c1_170 = arith.constant 1 : index
    %c0_171 = arith.constant 0 : index
    %c1_172 = arith.constant 1 : index
    %260 = vector.load %arg6[%c0_169, %c1_170, %c0_171, %c1_172] : memref<2x4x18x18xf32, #tpu.memory_space<vmem>>, vector<2x1x16x16xf32>
    %c4_i32_173 = arith.constant 4 : i32
    %261 = arith.muli %arg0, %c4_i32_173 : i32
    %c1_i32_174 = arith.constant 1 : i32
    %262 = arith.addi %261, %c1_i32_174 : i32
    %c2_i32_175 = arith.constant 2 : i32
    %263 = arith.muli %262, %c2_i32_175 : i32
    %c0_i32_176 = arith.constant 0 : i32
    %264 = arith.addi %263, %c0_i32_176 : i32
    %265 = arith.index_cast %264 : i32 to index
    %c1_177 = arith.constant 1 : index
    %266 = memref.load %arg2[%265, %c1_177] : memref<8x9xf32, #tpu.memory_space<smem>>
    %267 = vector.broadcast %266 : f32 to vector<2x1x16x16xf32>
    %268 = arith.mulf %260, %267 : vector<2x1x16x16xf32>
    %269 = arith.addf %250, %268 : vector<2x1x16x16xf32>
    %c4_i32_178 = arith.constant 4 : i32
    %270 = arith.muli %arg0, %c4_i32_178 : i32
    %c1_i32_179 = arith.constant 1 : i32
    %271 = arith.addi %270, %c1_i32_179 : i32
    %c2_i32_180 = arith.constant 2 : i32
    %272 = arith.muli %271, %c2_i32_180 : i32
    %c1_i32_181 = arith.constant 1 : i32
    %273 = arith.addi %272, %c1_i32_181 : i32
    %274 = arith.index_cast %273 : i32 to index
    %c1_182 = arith.constant 1 : index
    %275 = memref.load %arg2[%274, %c1_182] : memref<8x9xf32, #tpu.memory_space<smem>>
    %276 = vector.broadcast %275 : f32 to vector<2x1x16x16xf32>
    %277 = arith.mulf %260, %276 : vector<2x1x16x16xf32>
    %278 = arith.addf %259, %277 : vector<2x1x16x16xf32>
    %c0_183 = arith.constant 0 : index
    %c1_184 = arith.constant 1 : index
    %c0_185 = arith.constant 0 : index
    %c2_186 = arith.constant 2 : index
    %279 = vector.load %arg6[%c0_183, %c1_184, %c0_185, %c2_186] : memref<2x4x18x18xf32, #tpu.memory_space<vmem>>, vector<2x1x16x16xf32>
    %c4_i32_187 = arith.constant 4 : i32
    %280 = arith.muli %arg0, %c4_i32_187 : i32
    %c1_i32_188 = arith.constant 1 : i32
    %281 = arith.addi %280, %c1_i32_188 : i32
    %c2_i32_189 = arith.constant 2 : i32
    %282 = arith.muli %281, %c2_i32_189 : i32
    %c0_i32_190 = arith.constant 0 : i32
    %283 = arith.addi %282, %c0_i32_190 : i32
    %284 = arith.index_cast %283 : i32 to index
    %c2_191 = arith.constant 2 : index
    %285 = memref.load %arg2[%284, %c2_191] : memref<8x9xf32, #tpu.memory_space<smem>>
    %286 = vector.broadcast %285 : f32 to vector<2x1x16x16xf32>
    %287 = arith.mulf %279, %286 : vector<2x1x16x16xf32>
    %288 = arith.addf %269, %287 : vector<2x1x16x16xf32>
    %c4_i32_192 = arith.constant 4 : i32
    %289 = arith.muli %arg0, %c4_i32_192 : i32
    %c1_i32_193 = arith.constant 1 : i32
    %290 = arith.addi %289, %c1_i32_193 : i32
    %c2_i32_194 = arith.constant 2 : i32
    %291 = arith.muli %290, %c2_i32_194 : i32
    %c1_i32_195 = arith.constant 1 : i32
    %292 = arith.addi %291, %c1_i32_195 : i32
    %293 = arith.index_cast %292 : i32 to index
    %c2_196 = arith.constant 2 : index
    %294 = memref.load %arg2[%293, %c2_196] : memref<8x9xf32, #tpu.memory_space<smem>>
    %295 = vector.broadcast %294 : f32 to vector<2x1x16x16xf32>
    %296 = arith.mulf %279, %295 : vector<2x1x16x16xf32>
    %297 = arith.addf %278, %296 : vector<2x1x16x16xf32>
    %c0_197 = arith.constant 0 : index
    %c1_198 = arith.constant 1 : index
    %c1_199 = arith.constant 1 : index
    %c0_200 = arith.constant 0 : index
    %298 = vector.load %arg6[%c0_197, %c1_198, %c1_199, %c0_200] : memref<2x4x18x18xf32, #tpu.memory_space<vmem>>, vector<2x1x16x16xf32>
    %c4_i32_201 = arith.constant 4 : i32
    %299 = arith.muli %arg0, %c4_i32_201 : i32
    %c1_i32_202 = arith.constant 1 : i32
    %300 = arith.addi %299, %c1_i32_202 : i32
    %c2_i32_203 = arith.constant 2 : i32
    %301 = arith.muli %300, %c2_i32_203 : i32
    %c0_i32_204 = arith.constant 0 : i32
    %302 = arith.addi %301, %c0_i32_204 : i32
    %303 = arith.index_cast %302 : i32 to index
    %c3_205 = arith.constant 3 : index
    %304 = memref.load %arg2[%303, %c3_205] : memref<8x9xf32, #tpu.memory_space<smem>>
    %305 = vector.broadcast %304 : f32 to vector<2x1x16x16xf32>
    %306 = arith.mulf %298, %305 : vector<2x1x16x16xf32>
    %307 = arith.addf %288, %306 : vector<2x1x16x16xf32>
    %c4_i32_206 = arith.constant 4 : i32
    %308 = arith.muli %arg0, %c4_i32_206 : i32
    %c1_i32_207 = arith.constant 1 : i32
    %309 = arith.addi %308, %c1_i32_207 : i32
    %c2_i32_208 = arith.constant 2 : i32
    %310 = arith.muli %309, %c2_i32_208 : i32
    %c1_i32_209 = arith.constant 1 : i32
    %311 = arith.addi %310, %c1_i32_209 : i32
    %312 = arith.index_cast %311 : i32 to index
    %c3_210 = arith.constant 3 : index
    %313 = memref.load %arg2[%312, %c3_210] : memref<8x9xf32, #tpu.memory_space<smem>>
    %314 = vector.broadcast %313 : f32 to vector<2x1x16x16xf32>
    %315 = arith.mulf %298, %314 : vector<2x1x16x16xf32>
    %316 = arith.addf %297, %315 : vector<2x1x16x16xf32>
    %c0_211 = arith.constant 0 : index
    %c1_212 = arith.constant 1 : index
    %c1_213 = arith.constant 1 : index
    %c1_214 = arith.constant 1 : index
    %317 = vector.load %arg6[%c0_211, %c1_212, %c1_213, %c1_214] : memref<2x4x18x18xf32, #tpu.memory_space<vmem>>, vector<2x1x16x16xf32>
    %c4_i32_215 = arith.constant 4 : i32
    %318 = arith.muli %arg0, %c4_i32_215 : i32
    %c1_i32_216 = arith.constant 1 : i32
    %319 = arith.addi %318, %c1_i32_216 : i32
    %c2_i32_217 = arith.constant 2 : i32
    %320 = arith.muli %319, %c2_i32_217 : i32
    %c0_i32_218 = arith.constant 0 : i32
    %321 = arith.addi %320, %c0_i32_218 : i32
    %322 = arith.index_cast %321 : i32 to index
    %c4_219 = arith.constant 4 : index
    %323 = memref.load %arg2[%322, %c4_219] : memref<8x9xf32, #tpu.memory_space<smem>>
    %324 = vector.broadcast %323 : f32 to vector<2x1x16x16xf32>
    %325 = arith.mulf %317, %324 : vector<2x1x16x16xf32>
    %326 = arith.addf %307, %325 : vector<2x1x16x16xf32>
    %c4_i32_220 = arith.constant 4 : i32
    %327 = arith.muli %arg0, %c4_i32_220 : i32
    %c1_i32_221 = arith.constant 1 : i32
    %328 = arith.addi %327, %c1_i32_221 : i32
    %c2_i32_222 = arith.constant 2 : i32
    %329 = arith.muli %328, %c2_i32_222 : i32
    %c1_i32_223 = arith.constant 1 : i32
    %330 = arith.addi %329, %c1_i32_223 : i32
    %331 = arith.index_cast %330 : i32 to index
    %c4_224 = arith.constant 4 : index
    %332 = memref.load %arg2[%331, %c4_224] : memref<8x9xf32, #tpu.memory_space<smem>>
    %333 = vector.broadcast %332 : f32 to vector<2x1x16x16xf32>
    %334 = arith.mulf %317, %333 : vector<2x1x16x16xf32>
    %335 = arith.addf %316, %334 : vector<2x1x16x16xf32>
    %c0_225 = arith.constant 0 : index
    %c1_226 = arith.constant 1 : index
    %c1_227 = arith.constant 1 : index
    %c2_228 = arith.constant 2 : index
    %336 = vector.load %arg6[%c0_225, %c1_226, %c1_227, %c2_228] : memref<2x4x18x18xf32, #tpu.memory_space<vmem>>, vector<2x1x16x16xf32>
    %c4_i32_229 = arith.constant 4 : i32
    %337 = arith.muli %arg0, %c4_i32_229 : i32
    %c1_i32_230 = arith.constant 1 : i32
    %338 = arith.addi %337, %c1_i32_230 : i32
    %c2_i32_231 = arith.constant 2 : i32
    %339 = arith.muli %338, %c2_i32_231 : i32
    %c0_i32_232 = arith.constant 0 : i32
    %340 = arith.addi %339, %c0_i32_232 : i32
    %341 = arith.index_cast %340 : i32 to index
    %c5_233 = arith.constant 5 : index
    %342 = memref.load %arg2[%341, %c5_233] : memref<8x9xf32, #tpu.memory_space<smem>>
    %343 = vector.broadcast %342 : f32 to vector<2x1x16x16xf32>
    %344 = arith.mulf %336, %343 : vector<2x1x16x16xf32>
    %345 = arith.addf %326, %344 : vector<2x1x16x16xf32>
    %c4_i32_234 = arith.constant 4 : i32
    %346 = arith.muli %arg0, %c4_i32_234 : i32
    %c1_i32_235 = arith.constant 1 : i32
    %347 = arith.addi %346, %c1_i32_235 : i32
    %c2_i32_236 = arith.constant 2 : i32
    %348 = arith.muli %347, %c2_i32_236 : i32
    %c1_i32_237 = arith.constant 1 : i32
    %349 = arith.addi %348, %c1_i32_237 : i32
    %350 = arith.index_cast %349 : i32 to index
    %c5_238 = arith.constant 5 : index
    %351 = memref.load %arg2[%350, %c5_238] : memref<8x9xf32, #tpu.memory_space<smem>>
    %352 = vector.broadcast %351 : f32 to vector<2x1x16x16xf32>
    %353 = arith.mulf %336, %352 : vector<2x1x16x16xf32>
    %354 = arith.addf %335, %353 : vector<2x1x16x16xf32>
    %c0_239 = arith.constant 0 : index
    %c1_240 = arith.constant 1 : index
    %c2_241 = arith.constant 2 : index
    %c0_242 = arith.constant 0 : index
    %355 = vector.load %arg6[%c0_239, %c1_240, %c2_241, %c0_242] : memref<2x4x18x18xf32, #tpu.memory_space<vmem>>, vector<2x1x16x16xf32>
    %c4_i32_243 = arith.constant 4 : i32
    %356 = arith.muli %arg0, %c4_i32_243 : i32
    %c1_i32_244 = arith.constant 1 : i32
    %357 = arith.addi %356, %c1_i32_244 : i32
    %c2_i32_245 = arith.constant 2 : i32
    %358 = arith.muli %357, %c2_i32_245 : i32
    %c0_i32_246 = arith.constant 0 : i32
    %359 = arith.addi %358, %c0_i32_246 : i32
    %360 = arith.index_cast %359 : i32 to index
    %c6_247 = arith.constant 6 : index
    %361 = memref.load %arg2[%360, %c6_247] : memref<8x9xf32, #tpu.memory_space<smem>>
    %362 = vector.broadcast %361 : f32 to vector<2x1x16x16xf32>
    %363 = arith.mulf %355, %362 : vector<2x1x16x16xf32>
    %364 = arith.addf %345, %363 : vector<2x1x16x16xf32>
    %c4_i32_248 = arith.constant 4 : i32
    %365 = arith.muli %arg0, %c4_i32_248 : i32
    %c1_i32_249 = arith.constant 1 : i32
    %366 = arith.addi %365, %c1_i32_249 : i32
    %c2_i32_250 = arith.constant 2 : i32
    %367 = arith.muli %366, %c2_i32_250 : i32
    %c1_i32_251 = arith.constant 1 : i32
    %368 = arith.addi %367, %c1_i32_251 : i32
    %369 = arith.index_cast %368 : i32 to index
    %c6_252 = arith.constant 6 : index
    %370 = memref.load %arg2[%369, %c6_252] : memref<8x9xf32, #tpu.memory_space<smem>>
    %371 = vector.broadcast %370 : f32 to vector<2x1x16x16xf32>
    %372 = arith.mulf %355, %371 : vector<2x1x16x16xf32>
    %373 = arith.addf %354, %372 : vector<2x1x16x16xf32>
    %c0_253 = arith.constant 0 : index
    %c1_254 = arith.constant 1 : index
    %c2_255 = arith.constant 2 : index
    %c1_256 = arith.constant 1 : index
    %374 = vector.load %arg6[%c0_253, %c1_254, %c2_255, %c1_256] : memref<2x4x18x18xf32, #tpu.memory_space<vmem>>, vector<2x1x16x16xf32>
    %c4_i32_257 = arith.constant 4 : i32
    %375 = arith.muli %arg0, %c4_i32_257 : i32
    %c1_i32_258 = arith.constant 1 : i32
    %376 = arith.addi %375, %c1_i32_258 : i32
    %c2_i32_259 = arith.constant 2 : i32
    %377 = arith.muli %376, %c2_i32_259 : i32
    %c0_i32_260 = arith.constant 0 : i32
    %378 = arith.addi %377, %c0_i32_260 : i32
    %379 = arith.index_cast %378 : i32 to index
    %c7_261 = arith.constant 7 : index
    %380 = memref.load %arg2[%379, %c7_261] : memref<8x9xf32, #tpu.memory_space<smem>>
    %381 = vector.broadcast %380 : f32 to vector<2x1x16x16xf32>
    %382 = arith.mulf %374, %381 : vector<2x1x16x16xf32>
    %383 = arith.addf %364, %382 : vector<2x1x16x16xf32>
    %c4_i32_262 = arith.constant 4 : i32
    %384 = arith.muli %arg0, %c4_i32_262 : i32
    %c1_i32_263 = arith.constant 1 : i32
    %385 = arith.addi %384, %c1_i32_263 : i32
    %c2_i32_264 = arith.constant 2 : i32
    %386 = arith.muli %385, %c2_i32_264 : i32
    %c1_i32_265 = arith.constant 1 : i32
    %387 = arith.addi %386, %c1_i32_265 : i32
    %388 = arith.index_cast %387 : i32 to index
    %c7_266 = arith.constant 7 : index
    %389 = memref.load %arg2[%388, %c7_266] : memref<8x9xf32, #tpu.memory_space<smem>>
    %390 = vector.broadcast %389 : f32 to vector<2x1x16x16xf32>
    %391 = arith.mulf %374, %390 : vector<2x1x16x16xf32>
    %392 = arith.addf %373, %391 : vector<2x1x16x16xf32>
    %c0_267 = arith.constant 0 : index
    %c1_268 = arith.constant 1 : index
    %c2_269 = arith.constant 2 : index
    %c2_270 = arith.constant 2 : index
    %393 = vector.load %arg6[%c0_267, %c1_268, %c2_269, %c2_270] : memref<2x4x18x18xf32, #tpu.memory_space<vmem>>, vector<2x1x16x16xf32>
    %c4_i32_271 = arith.constant 4 : i32
    %394 = arith.muli %arg0, %c4_i32_271 : i32
    %c1_i32_272 = arith.constant 1 : i32
    %395 = arith.addi %394, %c1_i32_272 : i32
    %c2_i32_273 = arith.constant 2 : i32
    %396 = arith.muli %395, %c2_i32_273 : i32
    %c0_i32_274 = arith.constant 0 : i32
    %397 = arith.addi %396, %c0_i32_274 : i32
    %398 = arith.index_cast %397 : i32 to index
    %c8_275 = arith.constant 8 : index
    %399 = memref.load %arg2[%398, %c8_275] : memref<8x9xf32, #tpu.memory_space<smem>>
    %400 = vector.broadcast %399 : f32 to vector<2x1x16x16xf32>
    %401 = arith.mulf %393, %400 : vector<2x1x16x16xf32>
    %402 = arith.addf %383, %401 : vector<2x1x16x16xf32>
    %c4_i32_276 = arith.constant 4 : i32
    %403 = arith.muli %arg0, %c4_i32_276 : i32
    %c1_i32_277 = arith.constant 1 : i32
    %404 = arith.addi %403, %c1_i32_277 : i32
    %c2_i32_278 = arith.constant 2 : i32
    %405 = arith.muli %404, %c2_i32_278 : i32
    %c1_i32_279 = arith.constant 1 : i32
    %406 = arith.addi %405, %c1_i32_279 : i32
    %407 = arith.index_cast %406 : i32 to index
    %c8_280 = arith.constant 8 : index
    %408 = memref.load %arg2[%407, %c8_280] : memref<8x9xf32, #tpu.memory_space<smem>>
    %409 = vector.broadcast %408 : f32 to vector<2x1x16x16xf32>
    %410 = arith.mulf %393, %409 : vector<2x1x16x16xf32>
    %411 = arith.addf %392, %410 : vector<2x1x16x16xf32>
    %c4_i32_281 = arith.constant 4 : i32
    %412 = arith.muli %arg0, %c4_i32_281 : i32
    %c1_i32_282 = arith.constant 1 : i32
    %413 = arith.addi %412, %c1_i32_282 : i32
    %c2_i32_283 = arith.constant 2 : i32
    %414 = arith.muli %413, %c2_i32_283 : i32
    %c0_i32_284 = arith.constant 0 : i32
    %415 = arith.addi %414, %c0_i32_284 : i32
    %416 = vector.shape_cast %402 : vector<2x1x16x16xf32> to vector<1x2x1x16x16xf32>
    %cst_285 = arith.constant dense<0.000000e+00> : vector<1xf32>
    %417 = vector.multi_reduction <add>, %416, %cst_285 [1, 2, 3, 4] : vector<1x2x1x16x16xf32> to vector<1xf32>
    %418 = vector.shape_cast %417 : vector<1xf32> to vector<1x1x1x1x1xf32>
    %419 = vector.extract %418[0, 0, 0, 0, 0] : f32 from vector<1x1x1x1x1xf32>
    %cst_286 = arith.constant 0.001953125 : f32
    %420 = arith.mulf %419, %cst_286 : f32
    %421 = arith.mulf %402, %402 : vector<2x1x16x16xf32>
    %422 = vector.shape_cast %421 : vector<2x1x16x16xf32> to vector<1x2x1x16x16xf32>
    %cst_287 = arith.constant dense<0.000000e+00> : vector<1xf32>
    %423 = vector.multi_reduction <add>, %422, %cst_287 [1, 2, 3, 4] : vector<1x2x1x16x16xf32> to vector<1xf32>
    %424 = vector.shape_cast %423 : vector<1xf32> to vector<1x1x1x1x1xf32>
    %425 = vector.extract %424[0, 0, 0, 0, 0] : f32 from vector<1x1x1x1x1xf32>
    %cst_288 = arith.constant 0.001953125 : f32
    %426 = arith.mulf %425, %cst_288 : f32
    %427 = arith.mulf %420, %420 : f32
    %428 = arith.subf %426, %427 : f32
    %cst_289 = arith.constant 9.99999974E-6 : f32
    %429 = arith.addf %428, %cst_289 : f32
    %430 = math.rsqrt %429 : f32
    %431 = arith.index_cast %415 : i32 to index
    %432 = memref.load %arg3[%431] : memref<8xf32, #tpu.memory_space<smem>>
    %433 = arith.mulf %430, %432 : f32
    %434 = arith.index_cast %415 : i32 to index
    %435 = memref.load %arg4[%434] : memref<8xf32, #tpu.memory_space<smem>>
    %436 = arith.mulf %420, %433 : f32
    %437 = arith.subf %435, %436 : f32
    %438 = vector.broadcast %433 : f32 to vector<2x1x16x16xf32>
    %439 = arith.mulf %402, %438 : vector<2x1x16x16xf32>
    %440 = vector.broadcast %437 : f32 to vector<2x1x16x16xf32>
    %441 = arith.addf %439, %440 : vector<2x1x16x16xf32>
    %c0_290 = arith.constant 0 : index
    %c2_291 = arith.constant 2 : index
    %c0_292 = arith.constant 0 : index
    %c0_293 = arith.constant 0 : index
    %442 = vector.load %arg5[%c0_290, %c2_291, %c0_292, %c0_293] : memref<2x8x16x16xf32, #tpu.memory_space<vmem>>, vector<2x1x16x16xf32>
    tpu.vector_store %arg5[%c0_290, %c2_291, %c0_292, %c0_293], %441 {strides = array<i32>} : memref<2x8x16x16xf32, #tpu.memory_space<vmem>>, vector<2x1x16x16xf32>,
    %c4_i32_294 = arith.constant 4 : i32
    %443 = arith.muli %arg0, %c4_i32_294 : i32
    %c1_i32_295 = arith.constant 1 : i32
    %444 = arith.addi %443, %c1_i32_295 : i32
    %c2_i32_296 = arith.constant 2 : i32
    %445 = arith.muli %444, %c2_i32_296 : i32
    %c1_i32_297 = arith.constant 1 : i32
    %446 = arith.addi %445, %c1_i32_297 : i32
    %447 = vector.shape_cast %411 : vector<2x1x16x16xf32> to vector<1x2x1x16x16xf32>
    %cst_298 = arith.constant dense<0.000000e+00> : vector<1xf32>
    %448 = vector.multi_reduction <add>, %447, %cst_298 [1, 2, 3, 4] : vector<1x2x1x16x16xf32> to vector<1xf32>
    %449 = vector.shape_cast %448 : vector<1xf32> to vector<1x1x1x1x1xf32>
    %450 = vector.extract %449[0, 0, 0, 0, 0] : f32 from vector<1x1x1x1x1xf32>
    %cst_299 = arith.constant 0.001953125 : f32
    %451 = arith.mulf %450, %cst_299 : f32
    %452 = arith.mulf %411, %411 : vector<2x1x16x16xf32>
    %453 = vector.shape_cast %452 : vector<2x1x16x16xf32> to vector<1x2x1x16x16xf32>
    %cst_300 = arith.constant dense<0.000000e+00> : vector<1xf32>
    %454 = vector.multi_reduction <add>, %453, %cst_300 [1, 2, 3, 4] : vector<1x2x1x16x16xf32> to vector<1xf32>
    %455 = vector.shape_cast %454 : vector<1xf32> to vector<1x1x1x1x1xf32>
    %456 = vector.extract %455[0, 0, 0, 0, 0] : f32 from vector<1x1x1x1x1xf32>
    %cst_301 = arith.constant 0.001953125 : f32
    %457 = arith.mulf %456, %cst_301 : f32
    %458 = arith.mulf %451, %451 : f32
    %459 = arith.subf %457, %458 : f32
    %cst_302 = arith.constant 9.99999974E-6 : f32
    %460 = arith.addf %459, %cst_302 : f32
    %461 = math.rsqrt %460 : f32
    %462 = arith.index_cast %446 : i32 to index
    %463 = memref.load %arg3[%462] : memref<8xf32, #tpu.memory_space<smem>>
    %464 = arith.mulf %461, %463 : f32
    %465 = arith.index_cast %446 : i32 to index
    %466 = memref.load %arg4[%465] : memref<8xf32, #tpu.memory_space<smem>>
    %467 = arith.mulf %451, %464 : f32
    %468 = arith.subf %466, %467 : f32
    %469 = vector.broadcast %464 : f32 to vector<2x1x16x16xf32>
    %470 = arith.mulf %411, %469 : vector<2x1x16x16xf32>
    %471 = vector.broadcast %468 : f32 to vector<2x1x16x16xf32>
    %472 = arith.addf %470, %471 : vector<2x1x16x16xf32>
    %c0_303 = arith.constant 0 : index
    %c3_304 = arith.constant 3 : index
    %c0_305 = arith.constant 0 : index
    %c0_306 = arith.constant 0 : index
    %473 = vector.load %arg5[%c0_303, %c3_304, %c0_305, %c0_306] : memref<2x8x16x16xf32, #tpu.memory_space<vmem>>, vector<2x1x16x16xf32>
    tpu.vector_store %arg5[%c0_303, %c3_304, %c0_305, %c0_306], %472 {strides = array<i32>} : memref<2x8x16x16xf32, #tpu.memory_space<vmem>>, vector<2x1x16x16xf32>,
    %cst_307 = arith.constant 0.000000e+00 : f32
    %474 = vector.broadcast %cst_307 : f32 to vector<2x1x16x16xf32>
    %cst_308 = arith.constant 0.000000e+00 : f32
    %475 = vector.broadcast %cst_308 : f32 to vector<2x1x16x16xf32>
    %c0_309 = arith.constant 0 : index
    %c2_310 = arith.constant 2 : index
    %c0_311 = arith.constant 0 : index
    %c0_312 = arith.constant 0 : index
    %476 = vector.load %arg6[%c0_309, %c2_310, %c0_311, %c0_312] : memref<2x4x18x18xf32, #tpu.memory_space<vmem>>, vector<2x1x16x16xf32>
    %c4_i32_313 = arith.constant 4 : i32
    %477 = arith.muli %arg0, %c4_i32_313 : i32
    %c2_i32_314 = arith.constant 2 : i32
    %478 = arith.addi %477, %c2_i32_314 : i32
    %c2_i32_315 = arith.constant 2 : i32
    %479 = arith.muli %478, %c2_i32_315 : i32
    %c0_i32_316 = arith.constant 0 : i32
    %480 = arith.addi %479, %c0_i32_316 : i32
    %481 = arith.index_cast %480 : i32 to index
    %c0_317 = arith.constant 0 : index
    %482 = memref.load %arg2[%481, %c0_317] : memref<8x9xf32, #tpu.memory_space<smem>>
    %483 = vector.broadcast %482 : f32 to vector<2x1x16x16xf32>
    %484 = arith.mulf %476, %483 : vector<2x1x16x16xf32>
    %485 = arith.addf %474, %484 : vector<2x1x16x16xf32>
    %c4_i32_318 = arith.constant 4 : i32
    %486 = arith.muli %arg0, %c4_i32_318 : i32
    %c2_i32_319 = arith.constant 2 : i32
    %487 = arith.addi %486, %c2_i32_319 : i32
    %c2_i32_320 = arith.constant 2 : i32
    %488 = arith.muli %487, %c2_i32_320 : i32
    %c1_i32_321 = arith.constant 1 : i32
    %489 = arith.addi %488, %c1_i32_321 : i32
    %490 = arith.index_cast %489 : i32 to index
    %c0_322 = arith.constant 0 : index
    %491 = memref.load %arg2[%490, %c0_322] : memref<8x9xf32, #tpu.memory_space<smem>>
    %492 = vector.broadcast %491 : f32 to vector<2x1x16x16xf32>
    %493 = arith.mulf %476, %492 : vector<2x1x16x16xf32>
    %494 = arith.addf %475, %493 : vector<2x1x16x16xf32>
    %c0_323 = arith.constant 0 : index
    %c2_324 = arith.constant 2 : index
    %c0_325 = arith.constant 0 : index
    %c1_326 = arith.constant 1 : index
    %495 = vector.load %arg6[%c0_323, %c2_324, %c0_325, %c1_326] : memref<2x4x18x18xf32, #tpu.memory_space<vmem>>, vector<2x1x16x16xf32>
    %c4_i32_327 = arith.constant 4 : i32
    %496 = arith.muli %arg0, %c4_i32_327 : i32
    %c2_i32_328 = arith.constant 2 : i32
    %497 = arith.addi %496, %c2_i32_328 : i32
    %c2_i32_329 = arith.constant 2 : i32
    %498 = arith.muli %497, %c2_i32_329 : i32
    %c0_i32_330 = arith.constant 0 : i32
    %499 = arith.addi %498, %c0_i32_330 : i32
    %500 = arith.index_cast %499 : i32 to index
    %c1_331 = arith.constant 1 : index
    %501 = memref.load %arg2[%500, %c1_331] : memref<8x9xf32, #tpu.memory_space<smem>>
    %502 = vector.broadcast %501 : f32 to vector<2x1x16x16xf32>
    %503 = arith.mulf %495, %502 : vector<2x1x16x16xf32>
    %504 = arith.addf %485, %503 : vector<2x1x16x16xf32>
    %c4_i32_332 = arith.constant 4 : i32
    %505 = arith.muli %arg0, %c4_i32_332 : i32
    %c2_i32_333 = arith.constant 2 : i32
    %506 = arith.addi %505, %c2_i32_333 : i32
    %c2_i32_334 = arith.constant 2 : i32
    %507 = arith.muli %506, %c2_i32_334 : i32
    %c1_i32_335 = arith.constant 1 : i32
    %508 = arith.addi %507, %c1_i32_335 : i32
    %509 = arith.index_cast %508 : i32 to index
    %c1_336 = arith.constant 1 : index
    %510 = memref.load %arg2[%509, %c1_336] : memref<8x9xf32, #tpu.memory_space<smem>>
    %511 = vector.broadcast %510 : f32 to vector<2x1x16x16xf32>
    %512 = arith.mulf %495, %511 : vector<2x1x16x16xf32>
    %513 = arith.addf %494, %512 : vector<2x1x16x16xf32>
    %c0_337 = arith.constant 0 : index
    %c2_338 = arith.constant 2 : index
    %c0_339 = arith.constant 0 : index
    %c2_340 = arith.constant 2 : index
    %514 = vector.load %arg6[%c0_337, %c2_338, %c0_339, %c2_340] : memref<2x4x18x18xf32, #tpu.memory_space<vmem>>, vector<2x1x16x16xf32>
    %c4_i32_341 = arith.constant 4 : i32
    %515 = arith.muli %arg0, %c4_i32_341 : i32
    %c2_i32_342 = arith.constant 2 : i32
    %516 = arith.addi %515, %c2_i32_342 : i32
    %c2_i32_343 = arith.constant 2 : i32
    %517 = arith.muli %516, %c2_i32_343 : i32
    %c0_i32_344 = arith.constant 0 : i32
    %518 = arith.addi %517, %c0_i32_344 : i32
    %519 = arith.index_cast %518 : i32 to index
    %c2_345 = arith.constant 2 : index
    %520 = memref.load %arg2[%519, %c2_345] : memref<8x9xf32, #tpu.memory_space<smem>>
    %521 = vector.broadcast %520 : f32 to vector<2x1x16x16xf32>
    %522 = arith.mulf %514, %521 : vector<2x1x16x16xf32>
    %523 = arith.addf %504, %522 : vector<2x1x16x16xf32>
    %c4_i32_346 = arith.constant 4 : i32
    %524 = arith.muli %arg0, %c4_i32_346 : i32
    %c2_i32_347 = arith.constant 2 : i32
    %525 = arith.addi %524, %c2_i32_347 : i32
    %c2_i32_348 = arith.constant 2 : i32
    %526 = arith.muli %525, %c2_i32_348 : i32
    %c1_i32_349 = arith.constant 1 : i32
    %527 = arith.addi %526, %c1_i32_349 : i32
    %528 = arith.index_cast %527 : i32 to index
    %c2_350 = arith.constant 2 : index
    %529 = memref.load %arg2[%528, %c2_350] : memref<8x9xf32, #tpu.memory_space<smem>>
    %530 = vector.broadcast %529 : f32 to vector<2x1x16x16xf32>
    %531 = arith.mulf %514, %530 : vector<2x1x16x16xf32>
    %532 = arith.addf %513, %531 : vector<2x1x16x16xf32>
    %c0_351 = arith.constant 0 : index
    %c2_352 = arith.constant 2 : index
    %c1_353 = arith.constant 1 : index
    %c0_354 = arith.constant 0 : index
    %533 = vector.load %arg6[%c0_351, %c2_352, %c1_353, %c0_354] : memref<2x4x18x18xf32, #tpu.memory_space<vmem>>, vector<2x1x16x16xf32>
    %c4_i32_355 = arith.constant 4 : i32
    %534 = arith.muli %arg0, %c4_i32_355 : i32
    %c2_i32_356 = arith.constant 2 : i32
    %535 = arith.addi %534, %c2_i32_356 : i32
    %c2_i32_357 = arith.constant 2 : i32
    %536 = arith.muli %535, %c2_i32_357 : i32
    %c0_i32_358 = arith.constant 0 : i32
    %537 = arith.addi %536, %c0_i32_358 : i32
    %538 = arith.index_cast %537 : i32 to index
    %c3_359 = arith.constant 3 : index
    %539 = memref.load %arg2[%538, %c3_359] : memref<8x9xf32, #tpu.memory_space<smem>>
    %540 = vector.broadcast %539 : f32 to vector<2x1x16x16xf32>
    %541 = arith.mulf %533, %540 : vector<2x1x16x16xf32>
    %542 = arith.addf %523, %541 : vector<2x1x16x16xf32>
    %c4_i32_360 = arith.constant 4 : i32
    %543 = arith.muli %arg0, %c4_i32_360 : i32
    %c2_i32_361 = arith.constant 2 : i32
    %544 = arith.addi %543, %c2_i32_361 : i32
    %c2_i32_362 = arith.constant 2 : i32
    %545 = arith.muli %544, %c2_i32_362 : i32
    %c1_i32_363 = arith.constant 1 : i32
    %546 = arith.addi %545, %c1_i32_363 : i32
    %547 = arith.index_cast %546 : i32 to index
    %c3_364 = arith.constant 3 : index
    %548 = memref.load %arg2[%547, %c3_364] : memref<8x9xf32, #tpu.memory_space<smem>>
    %549 = vector.broadcast %548 : f32 to vector<2x1x16x16xf32>
    %550 = arith.mulf %533, %549 : vector<2x1x16x16xf32>
    %551 = arith.addf %532, %550 : vector<2x1x16x16xf32>
    %c0_365 = arith.constant 0 : index
    %c2_366 = arith.constant 2 : index
    %c1_367 = arith.constant 1 : index
    %c1_368 = arith.constant 1 : index
    %552 = vector.load %arg6[%c0_365, %c2_366, %c1_367, %c1_368] : memref<2x4x18x18xf32, #tpu.memory_space<vmem>>, vector<2x1x16x16xf32>
    %c4_i32_369 = arith.constant 4 : i32
    %553 = arith.muli %arg0, %c4_i32_369 : i32
    %c2_i32_370 = arith.constant 2 : i32
    %554 = arith.addi %553, %c2_i32_370 : i32
    %c2_i32_371 = arith.constant 2 : i32
    %555 = arith.muli %554, %c2_i32_371 : i32
    %c0_i32_372 = arith.constant 0 : i32
    %556 = arith.addi %555, %c0_i32_372 : i32
    %557 = arith.index_cast %556 : i32 to index
    %c4_373 = arith.constant 4 : index
    %558 = memref.load %arg2[%557, %c4_373] : memref<8x9xf32, #tpu.memory_space<smem>>
    %559 = vector.broadcast %558 : f32 to vector<2x1x16x16xf32>
    %560 = arith.mulf %552, %559 : vector<2x1x16x16xf32>
    %561 = arith.addf %542, %560 : vector<2x1x16x16xf32>
    %c4_i32_374 = arith.constant 4 : i32
    %562 = arith.muli %arg0, %c4_i32_374 : i32
    %c2_i32_375 = arith.constant 2 : i32
    %563 = arith.addi %562, %c2_i32_375 : i32
    %c2_i32_376 = arith.constant 2 : i32
    %564 = arith.muli %563, %c2_i32_376 : i32
    %c1_i32_377 = arith.constant 1 : i32
    %565 = arith.addi %564, %c1_i32_377 : i32
    %566 = arith.index_cast %565 : i32 to index
    %c4_378 = arith.constant 4 : index
    %567 = memref.load %arg2[%566, %c4_378] : memref<8x9xf32, #tpu.memory_space<smem>>
    %568 = vector.broadcast %567 : f32 to vector<2x1x16x16xf32>
    %569 = arith.mulf %552, %568 : vector<2x1x16x16xf32>
    %570 = arith.addf %551, %569 : vector<2x1x16x16xf32>
    %c0_379 = arith.constant 0 : index
    %c2_380 = arith.constant 2 : index
    %c1_381 = arith.constant 1 : index
    %c2_382 = arith.constant 2 : index
    %571 = vector.load %arg6[%c0_379, %c2_380, %c1_381, %c2_382] : memref<2x4x18x18xf32, #tpu.memory_space<vmem>>, vector<2x1x16x16xf32>
    %c4_i32_383 = arith.constant 4 : i32
    %572 = arith.muli %arg0, %c4_i32_383 : i32
    %c2_i32_384 = arith.constant 2 : i32
    %573 = arith.addi %572, %c2_i32_384 : i32
    %c2_i32_385 = arith.constant 2 : i32
    %574 = arith.muli %573, %c2_i32_385 : i32
    %c0_i32_386 = arith.constant 0 : i32
    %575 = arith.addi %574, %c0_i32_386 : i32
    %576 = arith.index_cast %575 : i32 to index
    %c5_387 = arith.constant 5 : index
    %577 = memref.load %arg2[%576, %c5_387] : memref<8x9xf32, #tpu.memory_space<smem>>
    %578 = vector.broadcast %577 : f32 to vector<2x1x16x16xf32>
    %579 = arith.mulf %571, %578 : vector<2x1x16x16xf32>
    %580 = arith.addf %561, %579 : vector<2x1x16x16xf32>
    %c4_i32_388 = arith.constant 4 : i32
    %581 = arith.muli %arg0, %c4_i32_388 : i32
    %c2_i32_389 = arith.constant 2 : i32
    %582 = arith.addi %581, %c2_i32_389 : i32
    %c2_i32_390 = arith.constant 2 : i32
    %583 = arith.muli %582, %c2_i32_390 : i32
    %c1_i32_391 = arith.constant 1 : i32
    %584 = arith.addi %583, %c1_i32_391 : i32
    %585 = arith.index_cast %584 : i32 to index
    %c5_392 = arith.constant 5 : index
    %586 = memref.load %arg2[%585, %c5_392] : memref<8x9xf32, #tpu.memory_space<smem>>
    %587 = vector.broadcast %586 : f32 to vector<2x1x16x16xf32>
    %588 = arith.mulf %571, %587 : vector<2x1x16x16xf32>
    %589 = arith.addf %570, %588 : vector<2x1x16x16xf32>
    %c0_393 = arith.constant 0 : index
    %c2_394 = arith.constant 2 : index
    %c2_395 = arith.constant 2 : index
    %c0_396 = arith.constant 0 : index
    %590 = vector.load %arg6[%c0_393, %c2_394, %c2_395, %c0_396] : memref<2x4x18x18xf32, #tpu.memory_space<vmem>>, vector<2x1x16x16xf32>
    %c4_i32_397 = arith.constant 4 : i32
    %591 = arith.muli %arg0, %c4_i32_397 : i32
    %c2_i32_398 = arith.constant 2 : i32
    %592 = arith.addi %591, %c2_i32_398 : i32
    %c2_i32_399 = arith.constant 2 : i32
    %593 = arith.muli %592, %c2_i32_399 : i32
    %c0_i32_400 = arith.constant 0 : i32
    %594 = arith.addi %593, %c0_i32_400 : i32
    %595 = arith.index_cast %594 : i32 to index
    %c6_401 = arith.constant 6 : index
    %596 = memref.load %arg2[%595, %c6_401] : memref<8x9xf32, #tpu.memory_space<smem>>
    %597 = vector.broadcast %596 : f32 to vector<2x1x16x16xf32>
    %598 = arith.mulf %590, %597 : vector<2x1x16x16xf32>
    %599 = arith.addf %580, %598 : vector<2x1x16x16xf32>
    %c4_i32_402 = arith.constant 4 : i32
    %600 = arith.muli %arg0, %c4_i32_402 : i32
    %c2_i32_403 = arith.constant 2 : i32
    %601 = arith.addi %600, %c2_i32_403 : i32
    %c2_i32_404 = arith.constant 2 : i32
    %602 = arith.muli %601, %c2_i32_404 : i32
    %c1_i32_405 = arith.constant 1 : i32
    %603 = arith.addi %602, %c1_i32_405 : i32
    %604 = arith.index_cast %603 : i32 to index
    %c6_406 = arith.constant 6 : index
    %605 = memref.load %arg2[%604, %c6_406] : memref<8x9xf32, #tpu.memory_space<smem>>
    %606 = vector.broadcast %605 : f32 to vector<2x1x16x16xf32>
    %607 = arith.mulf %590, %606 : vector<2x1x16x16xf32>
    %608 = arith.addf %589, %607 : vector<2x1x16x16xf32>
    %c0_407 = arith.constant 0 : index
    %c2_408 = arith.constant 2 : index
    %c2_409 = arith.constant 2 : index
    %c1_410 = arith.constant 1 : index
    %609 = vector.load %arg6[%c0_407, %c2_408, %c2_409, %c1_410] : memref<2x4x18x18xf32, #tpu.memory_space<vmem>>, vector<2x1x16x16xf32>
    %c4_i32_411 = arith.constant 4 : i32
    %610 = arith.muli %arg0, %c4_i32_411 : i32
    %c2_i32_412 = arith.constant 2 : i32
    %611 = arith.addi %610, %c2_i32_412 : i32
    %c2_i32_413 = arith.constant 2 : i32
    %612 = arith.muli %611, %c2_i32_413 : i32
    %c0_i32_414 = arith.constant 0 : i32
    %613 = arith.addi %612, %c0_i32_414 : i32
    %614 = arith.index_cast %613 : i32 to index
    %c7_415 = arith.constant 7 : index
    %615 = memref.load %arg2[%614, %c7_415] : memref<8x9xf32, #tpu.memory_space<smem>>
    %616 = vector.broadcast %615 : f32 to vector<2x1x16x16xf32>
    %617 = arith.mulf %609, %616 : vector<2x1x16x16xf32>
    %618 = arith.addf %599, %617 : vector<2x1x16x16xf32>
    %c4_i32_416 = arith.constant 4 : i32
    %619 = arith.muli %arg0, %c4_i32_416 : i32
    %c2_i32_417 = arith.constant 2 : i32
    %620 = arith.addi %619, %c2_i32_417 : i32
    %c2_i32_418 = arith.constant 2 : i32
    %621 = arith.muli %620, %c2_i32_418 : i32
    %c1_i32_419 = arith.constant 1 : i32
    %622 = arith.addi %621, %c1_i32_419 : i32
    %623 = arith.index_cast %622 : i32 to index
    %c7_420 = arith.constant 7 : index
    %624 = memref.load %arg2[%623, %c7_420] : memref<8x9xf32, #tpu.memory_space<smem>>
    %625 = vector.broadcast %624 : f32 to vector<2x1x16x16xf32>
    %626 = arith.mulf %609, %625 : vector<2x1x16x16xf32>
    %627 = arith.addf %608, %626 : vector<2x1x16x16xf32>
    %c0_421 = arith.constant 0 : index
    %c2_422 = arith.constant 2 : index
    %c2_423 = arith.constant 2 : index
    %c2_424 = arith.constant 2 : index
    %628 = vector.load %arg6[%c0_421, %c2_422, %c2_423, %c2_424] : memref<2x4x18x18xf32, #tpu.memory_space<vmem>>, vector<2x1x16x16xf32>
    %c4_i32_425 = arith.constant 4 : i32
    %629 = arith.muli %arg0, %c4_i32_425 : i32
    %c2_i32_426 = arith.constant 2 : i32
    %630 = arith.addi %629, %c2_i32_426 : i32
    %c2_i32_427 = arith.constant 2 : i32
    %631 = arith.muli %630, %c2_i32_427 : i32
    %c0_i32_428 = arith.constant 0 : i32
    %632 = arith.addi %631, %c0_i32_428 : i32
    %633 = arith.index_cast %632 : i32 to index
    %c8_429 = arith.constant 8 : index
    %634 = memref.load %arg2[%633, %c8_429] : memref<8x9xf32, #tpu.memory_space<smem>>
    %635 = vector.broadcast %634 : f32 to vector<2x1x16x16xf32>
    %636 = arith.mulf %628, %635 : vector<2x1x16x16xf32>
    %637 = arith.addf %618, %636 : vector<2x1x16x16xf32>
    %c4_i32_430 = arith.constant 4 : i32
    %638 = arith.muli %arg0, %c4_i32_430 : i32
    %c2_i32_431 = arith.constant 2 : i32
    %639 = arith.addi %638, %c2_i32_431 : i32
    %c2_i32_432 = arith.constant 2 : i32
    %640 = arith.muli %639, %c2_i32_432 : i32
    %c1_i32_433 = arith.constant 1 : i32
    %641 = arith.addi %640, %c1_i32_433 : i32
    %642 = arith.index_cast %641 : i32 to index
    %c8_434 = arith.constant 8 : index
    %643 = memref.load %arg2[%642, %c8_434] : memref<8x9xf32, #tpu.memory_space<smem>>
    %644 = vector.broadcast %643 : f32 to vector<2x1x16x16xf32>
    %645 = arith.mulf %628, %644 : vector<2x1x16x16xf32>
    %646 = arith.addf %627, %645 : vector<2x1x16x16xf32>
    %c4_i32_435 = arith.constant 4 : i32
    %647 = arith.muli %arg0, %c4_i32_435 : i32
    %c2_i32_436 = arith.constant 2 : i32
    %648 = arith.addi %647, %c2_i32_436 : i32
    %c2_i32_437 = arith.constant 2 : i32
    %649 = arith.muli %648, %c2_i32_437 : i32
    %c0_i32_438 = arith.constant 0 : i32
    %650 = arith.addi %649, %c0_i32_438 : i32
    %651 = vector.shape_cast %637 : vector<2x1x16x16xf32> to vector<1x2x1x16x16xf32>
    %cst_439 = arith.constant dense<0.000000e+00> : vector<1xf32>
    %652 = vector.multi_reduction <add>, %651, %cst_439 [1, 2, 3, 4] : vector<1x2x1x16x16xf32> to vector<1xf32>
    %653 = vector.shape_cast %652 : vector<1xf32> to vector<1x1x1x1x1xf32>
    %654 = vector.extract %653[0, 0, 0, 0, 0] : f32 from vector<1x1x1x1x1xf32>
    %cst_440 = arith.constant 0.001953125 : f32
    %655 = arith.mulf %654, %cst_440 : f32
    %656 = arith.mulf %637, %637 : vector<2x1x16x16xf32>
    %657 = vector.shape_cast %656 : vector<2x1x16x16xf32> to vector<1x2x1x16x16xf32>
    %cst_441 = arith.constant dense<0.000000e+00> : vector<1xf32>
    %658 = vector.multi_reduction <add>, %657, %cst_441 [1, 2, 3, 4] : vector<1x2x1x16x16xf32> to vector<1xf32>
    %659 = vector.shape_cast %658 : vector<1xf32> to vector<1x1x1x1x1xf32>
    %660 = vector.extract %659[0, 0, 0, 0, 0] : f32 from vector<1x1x1x1x1xf32>
    %cst_442 = arith.constant 0.001953125 : f32
    %661 = arith.mulf %660, %cst_442 : f32
    %662 = arith.mulf %655, %655 : f32
    %663 = arith.subf %661, %662 : f32
    %cst_443 = arith.constant 9.99999974E-6 : f32
    %664 = arith.addf %663, %cst_443 : f32
    %665 = math.rsqrt %664 : f32
    %666 = arith.index_cast %650 : i32 to index
    %667 = memref.load %arg3[%666] : memref<8xf32, #tpu.memory_space<smem>>
    %668 = arith.mulf %665, %667 : f32
    %669 = arith.index_cast %650 : i32 to index
    %670 = memref.load %arg4[%669] : memref<8xf32, #tpu.memory_space<smem>>
    %671 = arith.mulf %655, %668 : f32
    %672 = arith.subf %670, %671 : f32
    %673 = vector.broadcast %668 : f32 to vector<2x1x16x16xf32>
    %674 = arith.mulf %637, %673 : vector<2x1x16x16xf32>
    %675 = vector.broadcast %672 : f32 to vector<2x1x16x16xf32>
    %676 = arith.addf %674, %675 : vector<2x1x16x16xf32>
    %c0_444 = arith.constant 0 : index
    %c4_445 = arith.constant 4 : index
    %c0_446 = arith.constant 0 : index
    %c0_447 = arith.constant 0 : index
    %677 = vector.load %arg5[%c0_444, %c4_445, %c0_446, %c0_447] : memref<2x8x16x16xf32, #tpu.memory_space<vmem>>, vector<2x1x16x16xf32>
    tpu.vector_store %arg5[%c0_444, %c4_445, %c0_446, %c0_447], %676 {strides = array<i32>} : memref<2x8x16x16xf32, #tpu.memory_space<vmem>>, vector<2x1x16x16xf32>,
    %c4_i32_448 = arith.constant 4 : i32
    %678 = arith.muli %arg0, %c4_i32_448 : i32
    %c2_i32_449 = arith.constant 2 : i32
    %679 = arith.addi %678, %c2_i32_449 : i32
    %c2_i32_450 = arith.constant 2 : i32
    %680 = arith.muli %679, %c2_i32_450 : i32
    %c1_i32_451 = arith.constant 1 : i32
    %681 = arith.addi %680, %c1_i32_451 : i32
    %682 = vector.shape_cast %646 : vector<2x1x16x16xf32> to vector<1x2x1x16x16xf32>
    %cst_452 = arith.constant dense<0.000000e+00> : vector<1xf32>
    %683 = vector.multi_reduction <add>, %682, %cst_452 [1, 2, 3, 4] : vector<1x2x1x16x16xf32> to vector<1xf32>
    %684 = vector.shape_cast %683 : vector<1xf32> to vector<1x1x1x1x1xf32>
    %685 = vector.extract %684[0, 0, 0, 0, 0] : f32 from vector<1x1x1x1x1xf32>
    %cst_453 = arith.constant 0.001953125 : f32
    %686 = arith.mulf %685, %cst_453 : f32
    %687 = arith.mulf %646, %646 : vector<2x1x16x16xf32>
    %688 = vector.shape_cast %687 : vector<2x1x16x16xf32> to vector<1x2x1x16x16xf32>
    %cst_454 = arith.constant dense<0.000000e+00> : vector<1xf32>
    %689 = vector.multi_reduction <add>, %688, %cst_454 [1, 2, 3, 4] : vector<1x2x1x16x16xf32> to vector<1xf32>
    %690 = vector.shape_cast %689 : vector<1xf32> to vector<1x1x1x1x1xf32>
    %691 = vector.extract %690[0, 0, 0, 0, 0] : f32 from vector<1x1x1x1x1xf32>
    %cst_455 = arith.constant 0.001953125 : f32
    %692 = arith.mulf %691, %cst_455 : f32
    %693 = arith.mulf %686, %686 : f32
    %694 = arith.subf %692, %693 : f32
    %cst_456 = arith.constant 9.99999974E-6 : f32
    %695 = arith.addf %694, %cst_456 : f32
    %696 = math.rsqrt %695 : f32
    %697 = arith.index_cast %681 : i32 to index
    %698 = memref.load %arg3[%697] : memref<8xf32, #tpu.memory_space<smem>>
    %699 = arith.mulf %696, %698 : f32
    %700 = arith.index_cast %681 : i32 to index
    %701 = memref.load %arg4[%700] : memref<8xf32, #tpu.memory_space<smem>>
    %702 = arith.mulf %686, %699 : f32
    %703 = arith.subf %701, %702 : f32
    %704 = vector.broadcast %699 : f32 to vector<2x1x16x16xf32>
    %705 = arith.mulf %646, %704 : vector<2x1x16x16xf32>
    %706 = vector.broadcast %703 : f32 to vector<2x1x16x16xf32>
    %707 = arith.addf %705, %706 : vector<2x1x16x16xf32>
    %c0_457 = arith.constant 0 : index
    %c5_458 = arith.constant 5 : index
    %c0_459 = arith.constant 0 : index
    %c0_460 = arith.constant 0 : index
    %708 = vector.load %arg5[%c0_457, %c5_458, %c0_459, %c0_460] : memref<2x8x16x16xf32, #tpu.memory_space<vmem>>, vector<2x1x16x16xf32>
    tpu.vector_store %arg5[%c0_457, %c5_458, %c0_459, %c0_460], %707 {strides = array<i32>} : memref<2x8x16x16xf32, #tpu.memory_space<vmem>>, vector<2x1x16x16xf32>,
    %cst_461 = arith.constant 0.000000e+00 : f32
    %709 = vector.broadcast %cst_461 : f32 to vector<2x1x16x16xf32>
    %cst_462 = arith.constant 0.000000e+00 : f32
    %710 = vector.broadcast %cst_462 : f32 to vector<2x1x16x16xf32>
    %c0_463 = arith.constant 0 : index
    %c3_464 = arith.constant 3 : index
    %c0_465 = arith.constant 0 : index
    %c0_466 = arith.constant 0 : index
    %711 = vector.load %arg6[%c0_463, %c3_464, %c0_465, %c0_466] : memref<2x4x18x18xf32, #tpu.memory_space<vmem>>, vector<2x1x16x16xf32>
    %c4_i32_467 = arith.constant 4 : i32
    %712 = arith.muli %arg0, %c4_i32_467 : i32
    %c3_i32 = arith.constant 3 : i32
    %713 = arith.addi %712, %c3_i32 : i32
    %c2_i32_468 = arith.constant 2 : i32
    %714 = arith.muli %713, %c2_i32_468 : i32
    %c0_i32_469 = arith.constant 0 : i32
    %715 = arith.addi %714, %c0_i32_469 : i32
    %716 = arith.index_cast %715 : i32 to index
    %c0_470 = arith.constant 0 : index
    %717 = memref.load %arg2[%716, %c0_470] : memref<8x9xf32, #tpu.memory_space<smem>>
    %718 = vector.broadcast %717 : f32 to vector<2x1x16x16xf32>
    %719 = arith.mulf %711, %718 : vector<2x1x16x16xf32>
    %720 = arith.addf %709, %719 : vector<2x1x16x16xf32>
    %c4_i32_471 = arith.constant 4 : i32
    %721 = arith.muli %arg0, %c4_i32_471 : i32
    %c3_i32_472 = arith.constant 3 : i32
    %722 = arith.addi %721, %c3_i32_472 : i32
    %c2_i32_473 = arith.constant 2 : i32
    %723 = arith.muli %722, %c2_i32_473 : i32
    %c1_i32_474 = arith.constant 1 : i32
    %724 = arith.addi %723, %c1_i32_474 : i32
    %725 = arith.index_cast %724 : i32 to index
    %c0_475 = arith.constant 0 : index
    %726 = memref.load %arg2[%725, %c0_475] : memref<8x9xf32, #tpu.memory_space<smem>>
    %727 = vector.broadcast %726 : f32 to vector<2x1x16x16xf32>
    %728 = arith.mulf %711, %727 : vector<2x1x16x16xf32>
    %729 = arith.addf %710, %728 : vector<2x1x16x16xf32>
    %c0_476 = arith.constant 0 : index
    %c3_477 = arith.constant 3 : index
    %c0_478 = arith.constant 0 : index
    %c1_479 = arith.constant 1 : index
    %730 = vector.load %arg6[%c0_476, %c3_477, %c0_478, %c1_479] : memref<2x4x18x18xf32, #tpu.memory_space<vmem>>, vector<2x1x16x16xf32>
    %c4_i32_480 = arith.constant 4 : i32
    %731 = arith.muli %arg0, %c4_i32_480 : i32
    %c3_i32_481 = arith.constant 3 : i32
    %732 = arith.addi %731, %c3_i32_481 : i32
    %c2_i32_482 = arith.constant 2 : i32
    %733 = arith.muli %732, %c2_i32_482 : i32
    %c0_i32_483 = arith.constant 0 : i32
    %734 = arith.addi %733, %c0_i32_483 : i32
    %735 = arith.index_cast %734 : i32 to index
    %c1_484 = arith.constant 1 : index
    %736 = memref.load %arg2[%735, %c1_484] : memref<8x9xf32, #tpu.memory_space<smem>>
    %737 = vector.broadcast %736 : f32 to vector<2x1x16x16xf32>
    %738 = arith.mulf %730, %737 : vector<2x1x16x16xf32>
    %739 = arith.addf %720, %738 : vector<2x1x16x16xf32>
    %c4_i32_485 = arith.constant 4 : i32
    %740 = arith.muli %arg0, %c4_i32_485 : i32
    %c3_i32_486 = arith.constant 3 : i32
    %741 = arith.addi %740, %c3_i32_486 : i32
    %c2_i32_487 = arith.constant 2 : i32
    %742 = arith.muli %741, %c2_i32_487 : i32
    %c1_i32_488 = arith.constant 1 : i32
    %743 = arith.addi %742, %c1_i32_488 : i32
    %744 = arith.index_cast %743 : i32 to index
    %c1_489 = arith.constant 1 : index
    %745 = memref.load %arg2[%744, %c1_489] : memref<8x9xf32, #tpu.memory_space<smem>>
    %746 = vector.broadcast %745 : f32 to vector<2x1x16x16xf32>
    %747 = arith.mulf %730, %746 : vector<2x1x16x16xf32>
    %748 = arith.addf %729, %747 : vector<2x1x16x16xf32>
    %c0_490 = arith.constant 0 : index
    %c3_491 = arith.constant 3 : index
    %c0_492 = arith.constant 0 : index
    %c2_493 = arith.constant 2 : index
    %749 = vector.load %arg6[%c0_490, %c3_491, %c0_492, %c2_493] : memref<2x4x18x18xf32, #tpu.memory_space<vmem>>, vector<2x1x16x16xf32>
    %c4_i32_494 = arith.constant 4 : i32
    %750 = arith.muli %arg0, %c4_i32_494 : i32
    %c3_i32_495 = arith.constant 3 : i32
    %751 = arith.addi %750, %c3_i32_495 : i32
    %c2_i32_496 = arith.constant 2 : i32
    %752 = arith.muli %751, %c2_i32_496 : i32
    %c0_i32_497 = arith.constant 0 : i32
    %753 = arith.addi %752, %c0_i32_497 : i32
    %754 = arith.index_cast %753 : i32 to index
    %c2_498 = arith.constant 2 : index
    %755 = memref.load %arg2[%754, %c2_498] : memref<8x9xf32, #tpu.memory_space<smem>>
    %756 = vector.broadcast %755 : f32 to vector<2x1x16x16xf32>
    %757 = arith.mulf %749, %756 : vector<2x1x16x16xf32>
    %758 = arith.addf %739, %757 : vector<2x1x16x16xf32>
    %c4_i32_499 = arith.constant 4 : i32
    %759 = arith.muli %arg0, %c4_i32_499 : i32
    %c3_i32_500 = arith.constant 3 : i32
    %760 = arith.addi %759, %c3_i32_500 : i32
    %c2_i32_501 = arith.constant 2 : i32
    %761 = arith.muli %760, %c2_i32_501 : i32
    %c1_i32_502 = arith.constant 1 : i32
    %762 = arith.addi %761, %c1_i32_502 : i32
    %763 = arith.index_cast %762 : i32 to index
    %c2_503 = arith.constant 2 : index
    %764 = memref.load %arg2[%763, %c2_503] : memref<8x9xf32, #tpu.memory_space<smem>>
    %765 = vector.broadcast %764 : f32 to vector<2x1x16x16xf32>
    %766 = arith.mulf %749, %765 : vector<2x1x16x16xf32>
    %767 = arith.addf %748, %766 : vector<2x1x16x16xf32>
    %c0_504 = arith.constant 0 : index
    %c3_505 = arith.constant 3 : index
    %c1_506 = arith.constant 1 : index
    %c0_507 = arith.constant 0 : index
    %768 = vector.load %arg6[%c0_504, %c3_505, %c1_506, %c0_507] : memref<2x4x18x18xf32, #tpu.memory_space<vmem>>, vector<2x1x16x16xf32>
    %c4_i32_508 = arith.constant 4 : i32
    %769 = arith.muli %arg0, %c4_i32_508 : i32
    %c3_i32_509 = arith.constant 3 : i32
    %770 = arith.addi %769, %c3_i32_509 : i32
    %c2_i32_510 = arith.constant 2 : i32
    %771 = arith.muli %770, %c2_i32_510 : i32
    %c0_i32_511 = arith.constant 0 : i32
    %772 = arith.addi %771, %c0_i32_511 : i32
    %773 = arith.index_cast %772 : i32 to index
    %c3_512 = arith.constant 3 : index
    %774 = memref.load %arg2[%773, %c3_512] : memref<8x9xf32, #tpu.memory_space<smem>>
    %775 = vector.broadcast %774 : f32 to vector<2x1x16x16xf32>
    %776 = arith.mulf %768, %775 : vector<2x1x16x16xf32>
    %777 = arith.addf %758, %776 : vector<2x1x16x16xf32>
    %c4_i32_513 = arith.constant 4 : i32
    %778 = arith.muli %arg0, %c4_i32_513 : i32
    %c3_i32_514 = arith.constant 3 : i32
    %779 = arith.addi %778, %c3_i32_514 : i32
    %c2_i32_515 = arith.constant 2 : i32
    %780 = arith.muli %779, %c2_i32_515 : i32
    %c1_i32_516 = arith.constant 1 : i32
    %781 = arith.addi %780, %c1_i32_516 : i32
    %782 = arith.index_cast %781 : i32 to index
    %c3_517 = arith.constant 3 : index
    %783 = memref.load %arg2[%782, %c3_517] : memref<8x9xf32, #tpu.memory_space<smem>>
    %784 = vector.broadcast %783 : f32 to vector<2x1x16x16xf32>
    %785 = arith.mulf %768, %784 : vector<2x1x16x16xf32>
    %786 = arith.addf %767, %785 : vector<2x1x16x16xf32>
    %c0_518 = arith.constant 0 : index
    %c3_519 = arith.constant 3 : index
    %c1_520 = arith.constant 1 : index
    %c1_521 = arith.constant 1 : index
    %787 = vector.load %arg6[%c0_518, %c3_519, %c1_520, %c1_521] : memref<2x4x18x18xf32, #tpu.memory_space<vmem>>, vector<2x1x16x16xf32>
    %c4_i32_522 = arith.constant 4 : i32
    %788 = arith.muli %arg0, %c4_i32_522 : i32
    %c3_i32_523 = arith.constant 3 : i32
    %789 = arith.addi %788, %c3_i32_523 : i32
    %c2_i32_524 = arith.constant 2 : i32
    %790 = arith.muli %789, %c2_i32_524 : i32
    %c0_i32_525 = arith.constant 0 : i32
    %791 = arith.addi %790, %c0_i32_525 : i32
    %792 = arith.index_cast %791 : i32 to index
    %c4_526 = arith.constant 4 : index
    %793 = memref.load %arg2[%792, %c4_526] : memref<8x9xf32, #tpu.memory_space<smem>>
    %794 = vector.broadcast %793 : f32 to vector<2x1x16x16xf32>
    %795 = arith.mulf %787, %794 : vector<2x1x16x16xf32>
    %796 = arith.addf %777, %795 : vector<2x1x16x16xf32>
    %c4_i32_527 = arith.constant 4 : i32
    %797 = arith.muli %arg0, %c4_i32_527 : i32
    %c3_i32_528 = arith.constant 3 : i32
    %798 = arith.addi %797, %c3_i32_528 : i32
    %c2_i32_529 = arith.constant 2 : i32
    %799 = arith.muli %798, %c2_i32_529 : i32
    %c1_i32_530 = arith.constant 1 : i32
    %800 = arith.addi %799, %c1_i32_530 : i32
    %801 = arith.index_cast %800 : i32 to index
    %c4_531 = arith.constant 4 : index
    %802 = memref.load %arg2[%801, %c4_531] : memref<8x9xf32, #tpu.memory_space<smem>>
    %803 = vector.broadcast %802 : f32 to vector<2x1x16x16xf32>
    %804 = arith.mulf %787, %803 : vector<2x1x16x16xf32>
    %805 = arith.addf %786, %804 : vector<2x1x16x16xf32>
    %c0_532 = arith.constant 0 : index
    %c3_533 = arith.constant 3 : index
    %c1_534 = arith.constant 1 : index
    %c2_535 = arith.constant 2 : index
    %806 = vector.load %arg6[%c0_532, %c3_533, %c1_534, %c2_535] : memref<2x4x18x18xf32, #tpu.memory_space<vmem>>, vector<2x1x16x16xf32>
    %c4_i32_536 = arith.constant 4 : i32
    %807 = arith.muli %arg0, %c4_i32_536 : i32
    %c3_i32_537 = arith.constant 3 : i32
    %808 = arith.addi %807, %c3_i32_537 : i32
    %c2_i32_538 = arith.constant 2 : i32
    %809 = arith.muli %808, %c2_i32_538 : i32
    %c0_i32_539 = arith.constant 0 : i32
    %810 = arith.addi %809, %c0_i32_539 : i32
    %811 = arith.index_cast %810 : i32 to index
    %c5_540 = arith.constant 5 : index
    %812 = memref.load %arg2[%811, %c5_540] : memref<8x9xf32, #tpu.memory_space<smem>>
    %813 = vector.broadcast %812 : f32 to vector<2x1x16x16xf32>
    %814 = arith.mulf %806, %813 : vector<2x1x16x16xf32>
    %815 = arith.addf %796, %814 : vector<2x1x16x16xf32>
    %c4_i32_541 = arith.constant 4 : i32
    %816 = arith.muli %arg0, %c4_i32_541 : i32
    %c3_i32_542 = arith.constant 3 : i32
    %817 = arith.addi %816, %c3_i32_542 : i32
    %c2_i32_543 = arith.constant 2 : i32
    %818 = arith.muli %817, %c2_i32_543 : i32
    %c1_i32_544 = arith.constant 1 : i32
    %819 = arith.addi %818, %c1_i32_544 : i32
    %820 = arith.index_cast %819 : i32 to index
    %c5_545 = arith.constant 5 : index
    %821 = memref.load %arg2[%820, %c5_545] : memref<8x9xf32, #tpu.memory_space<smem>>
    %822 = vector.broadcast %821 : f32 to vector<2x1x16x16xf32>
    %823 = arith.mulf %806, %822 : vector<2x1x16x16xf32>
    %824 = arith.addf %805, %823 : vector<2x1x16x16xf32>
    %c0_546 = arith.constant 0 : index
    %c3_547 = arith.constant 3 : index
    %c2_548 = arith.constant 2 : index
    %c0_549 = arith.constant 0 : index
    %825 = vector.load %arg6[%c0_546, %c3_547, %c2_548, %c0_549] : memref<2x4x18x18xf32, #tpu.memory_space<vmem>>, vector<2x1x16x16xf32>
    %c4_i32_550 = arith.constant 4 : i32
    %826 = arith.muli %arg0, %c4_i32_550 : i32
    %c3_i32_551 = arith.constant 3 : i32
    %827 = arith.addi %826, %c3_i32_551 : i32
    %c2_i32_552 = arith.constant 2 : i32
    %828 = arith.muli %827, %c2_i32_552 : i32
    %c0_i32_553 = arith.constant 0 : i32
    %829 = arith.addi %828, %c0_i32_553 : i32
    %830 = arith.index_cast %829 : i32 to index
    %c6_554 = arith.constant 6 : index
    %831 = memref.load %arg2[%830, %c6_554] : memref<8x9xf32, #tpu.memory_space<smem>>
    %832 = vector.broadcast %831 : f32 to vector<2x1x16x16xf32>
    %833 = arith.mulf %825, %832 : vector<2x1x16x16xf32>
    %834 = arith.addf %815, %833 : vector<2x1x16x16xf32>
    %c4_i32_555 = arith.constant 4 : i32
    %835 = arith.muli %arg0, %c4_i32_555 : i32
    %c3_i32_556 = arith.constant 3 : i32
    %836 = arith.addi %835, %c3_i32_556 : i32
    %c2_i32_557 = arith.constant 2 : i32
    %837 = arith.muli %836, %c2_i32_557 : i32
    %c1_i32_558 = arith.constant 1 : i32
    %838 = arith.addi %837, %c1_i32_558 : i32
    %839 = arith.index_cast %838 : i32 to index
    %c6_559 = arith.constant 6 : index
    %840 = memref.load %arg2[%839, %c6_559] : memref<8x9xf32, #tpu.memory_space<smem>>
    %841 = vector.broadcast %840 : f32 to vector<2x1x16x16xf32>
    %842 = arith.mulf %825, %841 : vector<2x1x16x16xf32>
    %843 = arith.addf %824, %842 : vector<2x1x16x16xf32>
    %c0_560 = arith.constant 0 : index
    %c3_561 = arith.constant 3 : index
    %c2_562 = arith.constant 2 : index
    %c1_563 = arith.constant 1 : index
    %844 = vector.load %arg6[%c0_560, %c3_561, %c2_562, %c1_563] : memref<2x4x18x18xf32, #tpu.memory_space<vmem>>, vector<2x1x16x16xf32>
    %c4_i32_564 = arith.constant 4 : i32
    %845 = arith.muli %arg0, %c4_i32_564 : i32
    %c3_i32_565 = arith.constant 3 : i32
    %846 = arith.addi %845, %c3_i32_565 : i32
    %c2_i32_566 = arith.constant 2 : i32
    %847 = arith.muli %846, %c2_i32_566 : i32
    %c0_i32_567 = arith.constant 0 : i32
    %848 = arith.addi %847, %c0_i32_567 : i32
    %849 = arith.index_cast %848 : i32 to index
    %c7_568 = arith.constant 7 : index
    %850 = memref.load %arg2[%849, %c7_568] : memref<8x9xf32, #tpu.memory_space<smem>>
    %851 = vector.broadcast %850 : f32 to vector<2x1x16x16xf32>
    %852 = arith.mulf %844, %851 : vector<2x1x16x16xf32>
    %853 = arith.addf %834, %852 : vector<2x1x16x16xf32>
    %c4_i32_569 = arith.constant 4 : i32
    %854 = arith.muli %arg0, %c4_i32_569 : i32
    %c3_i32_570 = arith.constant 3 : i32
    %855 = arith.addi %854, %c3_i32_570 : i32
    %c2_i32_571 = arith.constant 2 : i32
    %856 = arith.muli %855, %c2_i32_571 : i32
    %c1_i32_572 = arith.constant 1 : i32
    %857 = arith.addi %856, %c1_i32_572 : i32
    %858 = arith.index_cast %857 : i32 to index
    %c7_573 = arith.constant 7 : index
    %859 = memref.load %arg2[%858, %c7_573] : memref<8x9xf32, #tpu.memory_space<smem>>
    %860 = vector.broadcast %859 : f32 to vector<2x1x16x16xf32>
    %861 = arith.mulf %844, %860 : vector<2x1x16x16xf32>
    %862 = arith.addf %843, %861 : vector<2x1x16x16xf32>
    %c0_574 = arith.constant 0 : index
    %c3_575 = arith.constant 3 : index
    %c2_576 = arith.constant 2 : index
    %c2_577 = arith.constant 2 : index
    %863 = vector.load %arg6[%c0_574, %c3_575, %c2_576, %c2_577] : memref<2x4x18x18xf32, #tpu.memory_space<vmem>>, vector<2x1x16x16xf32>
    %c4_i32_578 = arith.constant 4 : i32
    %864 = arith.muli %arg0, %c4_i32_578 : i32
    %c3_i32_579 = arith.constant 3 : i32
    %865 = arith.addi %864, %c3_i32_579 : i32
    %c2_i32_580 = arith.constant 2 : i32
    %866 = arith.muli %865, %c2_i32_580 : i32
    %c0_i32_581 = arith.constant 0 : i32
    %867 = arith.addi %866, %c0_i32_581 : i32
    %868 = arith.index_cast %867 : i32 to index
    %c8_582 = arith.constant 8 : index
    %869 = memref.load %arg2[%868, %c8_582] : memref<8x9xf32, #tpu.memory_space<smem>>
    %870 = vector.broadcast %869 : f32 to vector<2x1x16x16xf32>
    %871 = arith.mulf %863, %870 : vector<2x1x16x16xf32>
    %872 = arith.addf %853, %871 : vector<2x1x16x16xf32>
    %c4_i32_583 = arith.constant 4 : i32
    %873 = arith.muli %arg0, %c4_i32_583 : i32
    %c3_i32_584 = arith.constant 3 : i32
    %874 = arith.addi %873, %c3_i32_584 : i32
    %c2_i32_585 = arith.constant 2 : i32
    %875 = arith.muli %874, %c2_i32_585 : i32
    %c1_i32_586 = arith.constant 1 : i32
    %876 = arith.addi %875, %c1_i32_586 : i32
    %877 = arith.index_cast %876 : i32 to index
    %c8_587 = arith.constant 8 : index
    %878 = memref.load %arg2[%877, %c8_587] : memref<8x9xf32, #tpu.memory_space<smem>>
    %879 = vector.broadcast %878 : f32 to vector<2x1x16x16xf32>
    %880 = arith.mulf %863, %879 : vector<2x1x16x16xf32>
    %881 = arith.addf %862, %880 : vector<2x1x16x16xf32>
    %c4_i32_588 = arith.constant 4 : i32
    %882 = arith.muli %arg0, %c4_i32_588 : i32
    %c3_i32_589 = arith.constant 3 : i32
    %883 = arith.addi %882, %c3_i32_589 : i32
    %c2_i32_590 = arith.constant 2 : i32
    %884 = arith.muli %883, %c2_i32_590 : i32
    %c0_i32_591 = arith.constant 0 : i32
    %885 = arith.addi %884, %c0_i32_591 : i32
    %886 = vector.shape_cast %872 : vector<2x1x16x16xf32> to vector<1x2x1x16x16xf32>
    %cst_592 = arith.constant dense<0.000000e+00> : vector<1xf32>
    %887 = vector.multi_reduction <add>, %886, %cst_592 [1, 2, 3, 4] : vector<1x2x1x16x16xf32> to vector<1xf32>
    %888 = vector.shape_cast %887 : vector<1xf32> to vector<1x1x1x1x1xf32>
    %889 = vector.extract %888[0, 0, 0, 0, 0] : f32 from vector<1x1x1x1x1xf32>
    %cst_593 = arith.constant 0.001953125 : f32
    %890 = arith.mulf %889, %cst_593 : f32
    %891 = arith.mulf %872, %872 : vector<2x1x16x16xf32>
    %892 = vector.shape_cast %891 : vector<2x1x16x16xf32> to vector<1x2x1x16x16xf32>
    %cst_594 = arith.constant dense<0.000000e+00> : vector<1xf32>
    %893 = vector.multi_reduction <add>, %892, %cst_594 [1, 2, 3, 4] : vector<1x2x1x16x16xf32> to vector<1xf32>
    %894 = vector.shape_cast %893 : vector<1xf32> to vector<1x1x1x1x1xf32>
    %895 = vector.extract %894[0, 0, 0, 0, 0] : f32 from vector<1x1x1x1x1xf32>
    %cst_595 = arith.constant 0.001953125 : f32
    %896 = arith.mulf %895, %cst_595 : f32
    %897 = arith.mulf %890, %890 : f32
    %898 = arith.subf %896, %897 : f32
    %cst_596 = arith.constant 9.99999974E-6 : f32
    %899 = arith.addf %898, %cst_596 : f32
    %900 = math.rsqrt %899 : f32
    %901 = arith.index_cast %885 : i32 to index
    %902 = memref.load %arg3[%901] : memref<8xf32, #tpu.memory_space<smem>>
    %903 = arith.mulf %900, %902 : f32
    %904 = arith.index_cast %885 : i32 to index
    %905 = memref.load %arg4[%904] : memref<8xf32, #tpu.memory_space<smem>>
    %906 = arith.mulf %890, %903 : f32
    %907 = arith.subf %905, %906 : f32
    %908 = vector.broadcast %903 : f32 to vector<2x1x16x16xf32>
    %909 = arith.mulf %872, %908 : vector<2x1x16x16xf32>
    %910 = vector.broadcast %907 : f32 to vector<2x1x16x16xf32>
    %911 = arith.addf %909, %910 : vector<2x1x16x16xf32>
    %c0_597 = arith.constant 0 : index
    %c6_598 = arith.constant 6 : index
    %c0_599 = arith.constant 0 : index
    %c0_600 = arith.constant 0 : index
    %912 = vector.load %arg5[%c0_597, %c6_598, %c0_599, %c0_600] : memref<2x8x16x16xf32, #tpu.memory_space<vmem>>, vector<2x1x16x16xf32>
    tpu.vector_store %arg5[%c0_597, %c6_598, %c0_599, %c0_600], %911 {strides = array<i32>} : memref<2x8x16x16xf32, #tpu.memory_space<vmem>>, vector<2x1x16x16xf32>,
    %c4_i32_601 = arith.constant 4 : i32
    %913 = arith.muli %arg0, %c4_i32_601 : i32
    %c3_i32_602 = arith.constant 3 : i32
    %914 = arith.addi %913, %c3_i32_602 : i32
    %c2_i32_603 = arith.constant 2 : i32
    %915 = arith.muli %914, %c2_i32_603 : i32
    %c1_i32_604 = arith.constant 1 : i32
    %916 = arith.addi %915, %c1_i32_604 : i32
    %917 = vector.shape_cast %881 : vector<2x1x16x16xf32> to vector<1x2x1x16x16xf32>
    %cst_605 = arith.constant dense<0.000000e+00> : vector<1xf32>
    %918 = vector.multi_reduction <add>, %917, %cst_605 [1, 2, 3, 4] : vector<1x2x1x16x16xf32> to vector<1xf32>
    %919 = vector.shape_cast %918 : vector<1xf32> to vector<1x1x1x1x1xf32>
    %920 = vector.extract %919[0, 0, 0, 0, 0] : f32 from vector<1x1x1x1x1xf32>
    %cst_606 = arith.constant 0.001953125 : f32
    %921 = arith.mulf %920, %cst_606 : f32
    %922 = arith.mulf %881, %881 : vector<2x1x16x16xf32>
    %923 = vector.shape_cast %922 : vector<2x1x16x16xf32> to vector<1x2x1x16x16xf32>
    %cst_607 = arith.constant dense<0.000000e+00> : vector<1xf32>
    %924 = vector.multi_reduction <add>, %923, %cst_607 [1, 2, 3, 4] : vector<1x2x1x16x16xf32> to vector<1xf32>
    %925 = vector.shape_cast %924 : vector<1xf32> to vector<1x1x1x1x1xf32>
    %926 = vector.extract %925[0, 0, 0, 0, 0] : f32 from vector<1x1x1x1x1xf32>
    %cst_608 = arith.constant 0.001953125 : f32
    %927 = arith.mulf %926, %cst_608 : f32
    %928 = arith.mulf %921, %921 : f32
    %929 = arith.subf %927, %928 : f32
    %cst_609 = arith.constant 9.99999974E-6 : f32
    %930 = arith.addf %929, %cst_609 : f32
    %931 = math.rsqrt %930 : f32
    %932 = arith.index_cast %916 : i32 to index
    %933 = memref.load %arg3[%932] : memref<8xf32, #tpu.memory_space<smem>>
    %934 = arith.mulf %931, %933 : f32
    %935 = arith.index_cast %916 : i32 to index
    %936 = memref.load %arg4[%935] : memref<8xf32, #tpu.memory_space<smem>>
    %937 = arith.mulf %921, %934 : f32
    %938 = arith.subf %936, %937 : f32
    %939 = vector.broadcast %934 : f32 to vector<2x1x16x16xf32>
    %940 = arith.mulf %881, %939 : vector<2x1x16x16xf32>
    %941 = vector.broadcast %938 : f32 to vector<2x1x16x16xf32>
    %942 = arith.addf %940, %941 : vector<2x1x16x16xf32>
    %c0_610 = arith.constant 0 : index
    %c7_611 = arith.constant 7 : index
    %c0_612 = arith.constant 0 : index
    %c0_613 = arith.constant 0 : index
    %943 = vector.load %arg5[%c0_610, %c7_611, %c0_612, %c0_613] : memref<2x8x16x16xf32, #tpu.memory_space<vmem>>, vector<2x1x16x16xf32>
    tpu.vector_store %arg5[%c0_610, %c7_611, %c0_612, %c0_613], %942 {strides = array<i32>} : memref<2x8x16x16xf32, #tpu.memory_space<vmem>>, vector<2x1x16x16xf32>,
    return
  }
  func.func @transform_0(%arg0: i32) -> (i32, i32, i32, i32) {
    %c0_i32 = arith.constant 0 : i32
    %c0_i32_0 = arith.constant 0 : i32
    %c0_i32_1 = arith.constant 0 : i32
    %c0_i32_2 = arith.constant 0 : i32
    return %c0_i32, %arg0, %c0_i32_0, %c0_i32_1 : i32, i32, i32, i32
  }
  func.func @transform_1(%arg0: i32) -> (i32, i32) {
    %c0_i32 = arith.constant 0 : i32
    %c0_i32_0 = arith.constant 0 : i32
    %c0_i32_1 = arith.constant 0 : i32
    return %c0_i32, %c0_i32_0 : i32, i32
  }
  func.func @transform_2(%arg0: i32) -> i32 {
    %c0_i32 = arith.constant 0 : i32
    %c0_i32_0 = arith.constant 0 : i32
    return %c0_i32 : i32
  }
  func.func @transform_3(%arg0: i32) -> i32 {
    %c0_i32 = arith.constant 0 : i32
    %c0_i32_0 = arith.constant 0 : i32
    return %c0_i32 : i32
  }
  func.func @transform_4(%arg0: i32) -> (i32, i32, i32, i32) {
    %c0_i32 = arith.constant 0 : i32
    %c0_i32_0 = arith.constant 0 : i32
    %c0_i32_1 = arith.constant 0 : i32
    %c0_i32_2 = arith.constant 0 : i32
    return %c0_i32, %arg0, %c0_i32_0, %c0_i32_1 : i32, i32, i32, i32
  }
}

</mosaic_0001>

<bundles_post_ra>
// kernel: tpu_custom_call.1
= control target key start
LH: loop header
LB: loop body
LE: loop exit
PB: predicated region body
PF: predicated region fallthrough
CT: control target
= control target key end

     0   :  { %9 = vsyncpa [#allocation4], 0  ;;  %s4070_s0 = inlined_call_operand.hbm [shape: f32[2,4,16,16], index: 0, kind: input, shape index: {}]   ;;  %s4071_s1 = inlined_call_operand.hbm [shape: f32[8,9], index: 1, kind: input, shape index: {}]   ;;  %s4072_s2 = inlined_call_operand.vmem [shape: f32[8], index: 2, kind: input, shape index: {}]   ;;  %s4073_s3 = inlined_call_operand.vmem [shape: f32[8], index: 3, kind: input, shape index: {}]   ;;  %s4074_s4 = inlined_call_operand.hbm [shape: f32[2,8,16,16], index: 4, kind: output, shape index: {}]  }
   0x1   :  { %10 = vsyncpa [#allocation6], 0 }
   0x2   :  { %11 = vsyncpa [#allocation7], 0 }
   0x3   :  { %12 = vsyncpa [#allocation11], 0 }
   0x4   :  { %13 = vsyncpa [#allocation5], 0  ;;  %s18_s17 = sshll.u32 %s4070_s0, 4  ;;  %s2677_s18 = smov [#allocation3]   ;;  %s19_s17 = int_to_ptr.hbm [resolvable:$true] %s18_s17 }
   0x5   :  { %s20_s19 = sshll.u32 %s2677_s18, 4  ;;  %s32_s22 = sshll.u32 %s4071_s1, 4  ;;  %s21_s19 = int_to_ptr.vmem [resolvable:$true] %s20_s19  ;;  %s33_s22 = int_to_ptr.hbm [resolvable:$true] %s32_s22 }
   0x6   :  { %s2678_s23 = smov 128   ;;  %s2679_s24 = smov 8  }
   0x7   :  { %26 = dma.hbm_to_vmem [thread:$0]  %s19_s17, 2048, %s21_s19, [#allocation4], %s2678_s23, %s2678_s23, %s2679_s24  }
   0x8   :  { %s2680_s25 = smov [#allocation8]   ;;  %s41_s0 = sshll.u32 %s4072_s2, 4  ;;  %s42_s0 = int_to_ptr.vmem [resolvable:$true] %s41_s0 }
   0x9   :  { %35 = dma.hbm_to_smem %s33_s22, 128, %s2680_s25, [#allocation6]  }
   0xa   :  { %s50_s30 = sshll.u32 %s4073_s3, 4  ;;  %s2681_s5 = smov [#allocation9]   ;;  %s51_s30 = int_to_ptr.vmem [resolvable:$true] %s50_s30 }
   0xb   :  { %44 = dma.vmem_to_smem %s42_s0, 16, %s2681_s5, [#allocation7]  }
   0xc   :  { %s2682_s1 = smov [#allocation10]  }
   0xd   :  { %53 = dma.vmem_to_smem %s51_s30, 16, %s2682_s1, [#allocation11]  }
   0xe   :  { %2667 = dma.done.wait [#allocation4], 2048  }
   0xf   :  { %2668 = vsyncadd [#allocation4], 4294965248 }
  0x10   :  { %2669 = dma.done.wait [#allocation6], 128  }
  0x11   :  { %2670 = vsyncadd [#allocation6], 4294967168 }
  0x12   :  { %2671 = dma.done.wait [#allocation7], 16  }
  0x13   :  { %2672 = vsyncadd [#allocation7], 4294967280 }
  0x14   :  { %2673 = dma.done.wait [#allocation11], 16  }
  0x15   :  { %2674 = vsyncadd [#allocation11], 4294967280 }
  0x16   :  { %70 = sfence }
  0x17   :  { %v105_v0 = vld [vmem:[#allocation3 + $0x40] sm:$0xff]  ;;  %s2683_s2 = smov 1   ;;  %v106_v2 = vld [vmem:[#allocation3 + $0x48] sm:$0xff]  ;;  %vm71_vm0 = vcmask 146432   ;;  %v2684_v4 = vmov 0.0   ;;  %vm74_vm1 = vcmask 140288  }
  0x18   :  { %v97_v1 = vld [vmem:[#allocation3] sm:$0xff]  ;;  %145 = vrot.lane.b32.xlu1 %v105_v0, %s2683_s2  ;;  %v98_v3 = vld [vmem:[#allocation3 + $0x8] sm:$0xff]  ;;  %85 = vst.msk [vmem:[#allocation2 + $0x60] sm:$0xff] %vm71_vm0, %v2684_v4  ;;  %vm177_vm2 = vcmask 138248   ;;  %s2424_s3 = sld [smem:[#allocation8 + $0x1]]  ;;  %s2685_s7 = smov 127  }
  0x19   :  { %129 = vrot.lane.b32.xlu0 %v97_v1, %s2683_s2  ;;  %86 = vst.msk [vmem:[#allocation2 + $0x68] sm:$0xff] %vm71_vm0, %v2684_v4  ;;  %s2426_s6 = sld [smem:[#allocation8 + $0x2]]  ;;  %s2686_s8 = smov 126   ;;  %vm598_vm3 = vcmask 130048  }
  0x1a   :  { %72 = vst.msk [vmem:[#allocation2] sm:$0xff] %vm71_vm0, %v2684_v4  ;;  %s2430_s9 = sld [smem:[#allocation8 + $0x4]] }
  0x1b   :  { %73 = vst.msk [vmem:[#allocation2 + $0x8] sm:$0xff] %vm71_vm0, %v2684_v4  ;;  %s2437_s10 = sld [smem:[#allocation8 + $0x87]] }
  0x1c   :  { %76 = vst.msk [vmem:[#allocation2 + $0x18] sm:$0xff] %vm71_vm0, %v2684_v4  ;;  %s2433_s11 = sld [smem:[#allocation8 + $0x85]] }
  0x1d   :  { %77 = vst.msk [vmem:[#allocation2 + $0x20] sm:$0xff] %vm71_vm0, %v2684_v4  ;;  %s2432_s12 = sld [smem:[#allocation8 + $0x5]] }
  0x1e   :  { %79 = vst.msk [vmem:[#allocation2 + $0x30] sm:$0xff] %vm71_vm0, %v2684_v4  ;;  %v224_v7 = vstv %s2424_s3  ;;  %s2436_s13 = sld [smem:[#allocation8 + $0x7]] }
  0x1f   :  { %80 = vst.msk [vmem:[#allocation2 + $0x38] sm:$0xff] %vm71_vm0, %v2684_v4  ;;  %v278_v8 = vstv %s2426_s6  ;;  %s2438_s14 = sld [smem:[#allocation8 + $0x8]] }
  0x20   :  { %147 = vrot.lane.b32.xlu1 %v106_v2, %s2683_s2  ;;  %82 = vst.msk [vmem:[#allocation2 + $0x48] sm:$0xff] %vm71_vm0, %v2684_v4  ;;  %v358_v23 = vstv %s2430_s9  ;;  %s2427_s15 = sld [smem:[#allocation8 + $0x82]] }
  0x21   :  { %131 = vrot.lane.b32.xlu0 %v98_v3, %s2683_s2  ;;  %83 = vst.msk [vmem:[#allocation2 + $0x50] sm:$0xff] %vm71_vm0, %v2684_v4  ;;  %v2781_v27 = vstv %s2437_s10  ;;  %s2425_s16 = sld [smem:[#allocation8 + $0x81]] }
  0x22   :  { %88 = vst.msk [vmem:[#allocation2 + $0x78] sm:$0xff] %vm71_vm0, %v2684_v4  ;;  %v2785_v30 = vstv %s2433_s11  ;;  %s2431_s17 = sld [smem:[#allocation8 + $0x84]] }
  0x23   :  { %89 = vst.msk [vmem:[#allocation2 + $0x80] sm:$0xff] %vm71_vm0, %v2684_v4  ;;  %v412_v33 = vstv %s2432_s12  ;;  %s2439_s18 = sld [smem:[#allocation8 + $0x88]] }
  0x24   :  { %91 = vst.msk [vmem:[#allocation2 + $0x90] sm:$0xff] %vm71_vm0, %v2684_v4  ;;  %v492_v42 = vstv %s2436_s13  ;;  %s200_s19 = sld [smem:[#allocation8]] }
  0x25   :  { %92 = vst.msk [vmem:[#allocation2 + $0x98] sm:$0xff] %vm71_vm0, %v2684_v4  ;;  %v546_v48 = vstv %s2438_s14  ;;  %s2428_s20 = sld [smem:[#allocation8 + $0x3]] }
  0x26   :  { %94 = vst.msk [vmem:[#allocation2 + $0xa8] sm:$0xff] %vm71_vm0, %v2684_v4  ;;  %v305_v52 = vstv %s2427_s15  ;;  %s2434_s21 = sld [smem:[#allocation8 + $0x6]] }
  0x27   :  { %95 = vst.msk [vmem:[#allocation2 + $0xb0] sm:$0xff] %vm71_vm0, %v2684_v4  ;;  %v251_v56 = vstv %s2425_s16  ;;  %s2423_s22 = sld [smem:[#allocation8 + $0x80]] }
  0x28   :  { %87 = vst.msk [vmem:[#allocation2 + $0x70] sm:$0x3] %vm74_vm1, %v2684_v4  ;;  %v385_v63 = vstv %s2431_s17  ;;  %s2429_s25 = sld [smem:[#allocation8 + $0x83]] }
  0x29   :  { %75 = vst.msk [vmem:[#allocation2 + $0x10] sm:$0x3] %vm74_vm1, %v2684_v4  ;;  %v573_v3 = vstv %s2439_s18  ;;  %s2435_s26 = sld [smem:[#allocation8 + $0x86]] }
  0x2a   :  { %78 = vst.msk [vmem:[#allocation2 + $0x28] sm:$0x3] %vm74_vm1, %v2684_v4  ;;  %s2446_s27 = sld [smem:[#allocation8 + $0x102]] }
  0x2b   :  { %81 = vst.msk [vmem:[#allocation2 + $0x40] sm:$0x3] %vm74_vm1, %v2684_v4  ;;  %s2447_s0 = sld [smem:[#allocation8 + $0x182]] }
  0x2c   :  { %84 = vst.msk [vmem:[#allocation2 + $0x58] sm:$0x3] %vm74_vm1, %v2684_v4  ;;  %s2452_s28 = sld [smem:[#allocation8 + $0x105]] }
  0x2d   :  { %90 = vst.msk [vmem:[#allocation2 + $0x88] sm:$0x3] %vm74_vm1, %v2684_v4  ;;  %s2451_s29 = sld [smem:[#allocation8 + $0x184]] }
  0x2e   :  { %93 = vst.msk [vmem:[#allocation2 + $0xa0] sm:$0x3] %vm74_vm1, %v2684_v4  ;;  %s2444_s30 = sld [smem:[#allocation8 + $0x101]] }
  0x2f   :  { %96 = vst.msk [vmem:[#allocation2 + $0xb8] sm:$0x3] %vm74_vm1, %v2684_v4  ;;  %s2457_s5 = sld [smem:[#allocation8 + $0x187]] }
  0x30   :  { %s2459_s1 = sld [smem:[#allocation8 + $0x188]] }
  0x31   :  { %s2445_s3 = sld [smem:[#allocation8 + $0x181]] }
  0x32   :  { %s2450_s6 = sld [smem:[#allocation8 + $0x104]] }
  0x33   :  { %s2456_s9 = sld [smem:[#allocation8 + $0x107]] }
  0x34   :  { %s2458_s10 = sld [smem:[#allocation8 + $0x108]] }
  0x35   :  { %s2442_s11 = sld [smem:[#allocation8 + $0x100]] }
  0x36   :  { %s2448_s12 = sld [smem:[#allocation8 + $0x103]] }
  0x37   :  { %s2454_s13 = sld [smem:[#allocation8 + $0x106]] }
  0x38   :  { %s2443_s14 = sld [smem:[#allocation8 + $0x180]] }
  0x39   :  { %s2449_s15 = sld [smem:[#allocation8 + $0x183]] }
  0x3a   :  { %s2453_s16 = sld [smem:[#allocation8 + $0x185]] }
  0x8a   :  { %v146_v5 = vpop.permute.xlu1 %145 }
  0x8b   :  { %v130_v6 = vpop.permute.xlu0 %129  ;;  %186 = vst.msk [vmem:[#allocation2 + $0x61] sm:$0xff] %vm177_vm2, %v146_v5 }
  0x8c   :  { %178 = vst.msk [vmem:[#allocation2 + $0x1] sm:$0xff] %vm177_vm2, %v130_v6 }
  0x92   :  { %v148_v9 = vpop.permute.xlu1 %147  ;;  %v2750_v11 = vld [vmem:[#allocation2 + $0x60] sm:$0xff] }
  0x93   :  { %v132_v10 = vpop.permute.xlu0 %131  ;;  %187 = vst.msk [vmem:[#allocation2 + $0x69] sm:$0xff] %vm177_vm2, %v148_v9  ;;  %v227_v12 = vmul.f32 %v224_v7, %v2750_v11  ;;  %v2754_v13 = vld [vmem:[#allocation2] sm:$0xff]  ;;  %v281_v19 = vmul.f32 %v278_v8, %v2750_v11  ;;  %v308_v54 = vmul.f32 %v305_v52, %v2750_v11  ;;  %v254_v0 = vmul.f32 %v251_v56, %v2750_v11 }
  0x94   :  { %179 = vst.msk [vmem:[#allocation2 + $0x9] sm:$0xff] %vm177_vm2, %v132_v10  ;;  %v279_v14 = vmul.f32 %v278_v8, %v2754_v13  ;;  %v225_v15 = vmul.f32 %v224_v7, %v2754_v13  ;;  %v2772_v21 = vld [vmem:[#allocation2 + $0x1] sm:$0xff]  ;;  %v252_v57 = vmul.f32 %v251_v56, %v2754_v13  ;;  %v306_v4 = vmul.f32 %v305_v52, %v2754_v13 }
  0x95   :  { %237 = vrot.lane.b32.xlu0 %v227_v12, %s2685_s7  ;;  %v359_v25 = vmul.f32 %v358_v23, %v2772_v21  ;;  %v413_v35 = vmul.f32 %v412_v33, %v2772_v21  ;;  %v2804_v37 = vld [vmem:[#allocation2 + $0x61] sm:$0xff]  ;;  %v440_v58 = vmul.f32 %v2785_v30, %v2772_v21 }
  0x96   :  { %287 = vrot.lane.b32.xlu1 %v279_v14, %s2686_s8  ;;  %233 = vrot.lane.b32.xlu2 %v225_v15, %s2685_s7  ;;  %v415_v38 = vmul.f32 %v412_v33, %v2804_v37  ;;  %v361_v40 = vmul.f32 %v358_v23, %v2804_v37  ;;  %v442_v61 = vmul.f32 %v2785_v30, %v2804_v37  ;;  %v201_v15 = vstv %s200_s19 }
  0x97   :  { %v388_v2 = vmul.f32 %v385_v63, %v2804_v37 }
  0x9a   :  { %v2762_v16 = vld [vmem:[#allocation2 + $0x68] sm:$0xff] }
  0x9b   :  { %v228_v17 = vmul.f32 %v224_v7, %v2762_v16  ;;  %v2765_v18 = vld [vmem:[#allocation2 + $0x8] sm:$0xff]  ;;  %v282_v36 = vmul.f32 %v278_v8, %v2762_v16  ;;  %v255_v62 = vmul.f32 %v251_v56, %v2762_v16  ;;  %v309_v14 = vmul.f32 %v305_v52, %v2762_v16 }
  0x9c   :  { %v226_v20 = vmul.f32 %v224_v7, %v2765_v18  ;;  %v2774_v22 = vld [vmem:[#allocation2 + $0x9] sm:$0xff]  ;;  %v280_v29 = vmul.f32 %v278_v8, %v2765_v18  ;;  %v253_v60 = vmul.f32 %v251_v56, %v2765_v18  ;;  %v307_v8 = vmul.f32 %v305_v52, %v2765_v18 }
  0x9d   :  { %239 = vrot.lane.b32.xlu0 %v228_v17, %s2685_s7  ;;  %v2776_v24 = vld [vmem:[#allocation2 + $0x69] sm:$0xff]  ;;  %v360_v28 = vmul.f32 %v358_v23, %v2774_v22  ;;  %v414_v34 = vmul.f32 %v412_v33, %v2774_v22 }
  0x9e   :  { %291 = vrot.lane.b32.xlu1 %v281_v19, %s2686_s8  ;;  %235 = vrot.lane.b32.xlu2 %v226_v20, %s2685_s7  ;;  %v2779_v26 = vld [vmem:[#allocation2 + $0x6a] sm:$0xff]  ;;  %v2789_v31 = vmul.f32 %v2785_v30, %v2776_v24  ;;  %v416_v39 = vmul.f32 %v412_v33, %v2776_v24  ;;  %v2815_v44 = vld [vmem:[#allocation2 + $0x62] sm:$0xff]  ;;  %v362_v46 = vmul.f32 %v358_v23, %v2776_v24 }
  0x9f   :  { %v2793_v32 = vmul.f32 %v2781_v27, %v2779_v26  ;;  %v2812_v41 = vld [vmem:[#allocation2 + $0xa] sm:$0xff]  ;;  %v495_v45 = vmul.f32 %v492_v42, %v2815_v44  ;;  %v2822_v47 = vld [vmem:[#allocation2 + $0x2] sm:$0xff]  ;;  %v496_v50 = vmul.f32 %v492_v42, %v2779_v26  ;;  %v550_v53 = vmul.f32 %v546_v48, %v2779_v26 }
  0xa0   :  { %v494_v43 = vmul.f32 %v492_v42, %v2812_v41  ;;  %v548_v49 = vmul.f32 %v546_v48, %v2812_v41  ;;  %v493_v51 = vmul.f32 %v492_v42, %v2822_v47  ;;  %v547_v55 = vmul.f32 %v546_v48, %v2822_v47 }
  0xa1   :  { %v549_v59 = vmul.f32 %v546_v48, %v2815_v44  ;;  %v521_v1 = vmul.f32 %v2781_v27, %v2812_v41  ;;  %v575_v5 = vmul.f32 %v573_v3, %v2812_v41  ;;  %v389_v6 = vmul.f32 %v385_v63, %v2776_v24  ;;  %v107_v48 = vld [vmem:[#allocation3 + $0x50] sm:$0xff] }
  0xa2   :  { %v577_v9 = vmul.f32 %v573_v3, %v2779_v26  ;;  %v520_v10 = vmul.f32 %v2781_v27, %v2822_v47  ;;  %v574_v17 = vmul.f32 %v573_v3, %v2822_v47  ;;  %v203_v19 = vmul.f32 %v201_v15, %v2765_v18 }
  0xa3   :  { %v386_v33 = vmul.f32 %v385_v63, %v2772_v21 }
  0xa5   :  { %367 = vrot.lane.b32.xlu0 %v359_v25, %s2685_s7  ;;  %v336_v25 = vstv %s2428_s20 }
  0xa6   :  { %369 = vrot.lane.b32.xlu1 %v360_v28, %s2685_s7  ;;  %289 = vrot.lane.b32.xlu2 %v280_v29, %s2686_s8  ;;  %v338_v29 = vmul.f32 %v336_v25, %v2774_v22 }
  0xad   :  { %421 = vrot.lane.b32.xlu0 %v413_v35, %s2686_s8  ;;  %v576_v35 = vmul.f32 %v573_v3, %v2815_v44 }
  0xae   :  { %423 = vrot.lane.b32.xlu1 %v414_v34, %s2686_s8  ;;  %293 = vrot.lane.b32.xlu2 %v282_v36, %s2686_s8  ;;  %v202_v36 = vmul.f32 %v201_v15, %v2754_v13 }
  0xb5   :  { %425 = vrot.lane.b32.xlu0 %v415_v38, %s2686_s8 }
  0xb6   :  { %427 = vrot.lane.b32.xlu1 %v416_v39, %s2686_s8  ;;  %371 = vrot.lane.b32.xlu2 %v361_v40, %s2685_s7 }
  0xbd   :  { %503 = vrot.lane.b32.xlu0 %v494_v43, %s2685_s7  ;;  %v337_v43 = vmul.f32 %v336_v25, %v2772_v21 }
  0xbe   :  { %505 = vrot.lane.b32.xlu1 %v495_v45, %s2685_s7  ;;  %373 = vrot.lane.b32.xlu2 %v362_v46, %s2685_s7  ;;  %v387_v45 = vmul.f32 %v385_v63, %v2774_v22 }
  0xc5   :  { %557 = vrot.lane.b32.xlu0 %v548_v49, %s2686_s8  ;;  %v204_v49 = vmul.f32 %v201_v15, %v2750_v11 }
  0xc6   :  { %507 = vrot.lane.b32.xlu1 %v496_v50, %s2685_s7  ;;  %501 = vrot.lane.b32.xlu2 %v493_v51, %s2685_s7  ;;  %v205_v50 = vmul.f32 %v201_v15, %v2762_v16 }
  0xcd   :  { %561 = vrot.lane.b32.xlu0 %v550_v53, %s2686_s8 }
  0xce   :  { %318 = vrot.lane.b32.xlu1 %v308_v54, %s2686_s8  ;;  %555 = vrot.lane.b32.xlu2 %v547_v55, %s2686_s8 }
  0xd5   :  { %260 = vrot.lane.b32.xlu0 %v252_v57, %s2685_s7  ;;  %v339_v57 = vmul.f32 %v336_v25, %v2804_v37 }
  0xd6   :  { %448 = vrot.lane.b32.xlu1 %v440_v58, %s2686_s8  ;;  %559 = vrot.lane.b32.xlu2 %v549_v59, %s2686_s8  ;;  %v340_v59 = vmul.f32 %v336_v25, %v2776_v24 }
  0xdd   :  { %262 = vrot.lane.b32.xlu0 %v253_v60, %s2685_s7 }
  0xde   :  { %452 = vrot.lane.b32.xlu1 %v442_v61, %s2686_s8  ;;  %266 = vrot.lane.b32.xlu2 %v255_v62, %s2685_s7  ;;  %v441_v61 = vmul.f32 %v2785_v30, %v2774_v22 }
  0xe5   :  { %264 = vrot.lane.b32.xlu0 %v254_v0, %s2685_s7 }
  0xe6   :  { %530 = vrot.lane.b32.xlu1 %v521_v1, %s2685_s7  ;;  %398 = vrot.lane.b32.xlu2 %v388_v2, %s2685_s7 }
  0xed   :  { %314 = vrot.lane.b32.xlu0 %v306_v4, %s2686_s8 }
  0xee   :  { %584 = vrot.lane.b32.xlu1 %v575_v5, %s2686_s8  ;;  %400 = vrot.lane.b32.xlu2 %v389_v6, %s2685_s7  ;;  %v470_v5 = vstv %s2434_s21 }
  0xef   :  { %v472_v30 = vmul.f32 %v470_v5, %v2812_v41  ;;  %v473_v25 = vmul.f32 %v470_v5, %v2815_v44 }
  0xf0   :  { %v234_v7 = vpop.permute.xlu2 %233 }
  0xf1   :  { %v245_v38 = vadd.f32 %v234_v7, %v202_v36 }
  0xf5   :  { %316 = vrot.lane.b32.xlu0 %v307_v8, %s2686_s8  ;;  %v471_v8 = vmul.f32 %v470_v5, %v2822_v47 }
  0xf6   :  { %588 = vrot.lane.b32.xlu1 %v577_v9, %s2686_s8  ;;  %528 = vrot.lane.b32.xlu2 %v520_v10, %s2685_s7 }
  0xf8   :  { %v236_v12 = vpop.permute.xlu2 %235 }
  0xf9   :  { %v246_v20 = vadd.f32 %v236_v12, %v203_v19  ;;  %v522_v12 = vmul.f32 %v2781_v27, %v2815_v44 }
  0xfd   :  { %320 = vrot.lane.b32.xlu0 %v309_v14, %s2686_s8 }
  0xfe   :  { %582 = vrot.lane.b32.xlu2 %v574_v17, %s2686_s8  ;;  %149 = vrot.lane.b32.xlu1 %v107_v48, %s2683_s2 }
 0x100   :  { %v290_v23 = vpop.permute.xlu2 %289 }
 0x101   :  { %v300_v28 = vadd.f32 %v290_v23, %v246_v20 }
 0x103   :  { %v342_v34 = vadd.f32 %v338_v29, %v300_v28  ;;  %v100_v28 = vld [vmem:[#allocation3 + $0x18] sm:$0xff] }
 0x105   :  { %394 = vrot.lane.b32.xlu0 %v386_v33, %s2685_s7  ;;  %v474_v33 = vmul.f32 %v470_v5, %v2779_v26 }
 0x106   :  { %586 = vrot.lane.b32.xlu2 %v576_v35, %s2686_s8 }
 0x107   :  { %v238_v39 = vpop.permute.xlu0 %237 }
 0x108   :  { %v288_v40 = vpop.permute.xlu1 %287  ;;  %v247_v51 = vadd.f32 %v238_v39, %v204_v49  ;;  %v294_v53 = vpop.permute.xlu2 %293  ;;  %v99_v39 = vld [vmem:[#allocation3 + $0x10] sm:$0xff] }
 0x109   :  { %v299_v42 = vadd.f32 %v288_v40, %v245_v38 }
 0x10b   :  { %v341_v46 = vadd.f32 %v337_v43, %v299_v42 }
 0x10d   :  { %396 = vrot.lane.b32.xlu0 %v387_v45, %s2685_s7  ;;  %v108_v45 = vld [vmem:[#allocation3 + $0x58] sm:$0xff] }
 0x10e   :  { %135 = vrot.lane.b32.xlu2 %v100_v28, %s2683_s2 }
 0x10f   :  { %v240_v52 = vpop.permute.xlu0 %239 }
 0x110   :  { %v248_v54 = vadd.f32 %v240_v52, %v205_v50  ;;  %v292_v55 = vpop.permute.xlu1 %291  ;;  %v372_v1 = vpop.permute.xlu2 %371 }
 0x111   :  { %v301_v56 = vadd.f32 %v292_v55, %v247_v51  ;;  %v347_v55 = vstv %s2429_s25 }
 0x112   :  { %v302_v58 = vadd.f32 %v294_v53, %v248_v54  ;;  %v213_v53 = vstv %s2423_s22  ;;  %v348_v5 = vmul.f32 %v347_v55, %v2772_v21 }
 0x113   :  { %v343_v60 = vadd.f32 %v339_v57, %v301_v56  ;;  %v216_v54 = vmul.f32 %v213_v53, %v2750_v11 }
 0x114   :  { %v344_v62 = vadd.f32 %v340_v59, %v302_v58 }
 0x115   :  { %450 = vrot.lane.b32.xlu0 %v441_v61, %s2686_s8 }
 0x117   :  { %v368_v63 = vpop.permute.xlu0 %367 }
 0x118   :  { %v370_v0 = vpop.permute.xlu1 %369  ;;  %v379_v2 = vadd.f32 %v368_v63, %v341_v46  ;;  %v374_v15 = vpop.permute.xlu2 %373 }
 0x119   :  { %v380_v3 = vadd.f32 %v370_v0, %v342_v34  ;;  %v382_v17 = vadd.f32 %v374_v15, %v344_v62  ;;  %v214_v62 = vmul.f32 %v213_v53, %v2754_v13  ;;  %v481_v0 = vstv %s2435_s26  ;;  %s652_s26 = sld [smem:[#allocation9]] }
 0x11a   :  { %v484_v11 = vmul.f32 %v481_v0, %v2815_v44 }
 0x11d   :  { %454 = vrot.lane.b32.xlu0 %v2789_v31, %s2686_s8  ;;  %v381_v31 = vadd.f32 %v372_v1, %v343_v60  ;;  %v350_v60 = vmul.f32 %v347_v55, %v2804_v37  ;;  %v215_v37 = vmul.f32 %v213_v53, %v2765_v18 }
 0x11f   :  { %v422_v4 = vpop.permute.xlu0 %421 }
 0x120   :  { %v433_v6 = vadd.f32 %v422_v4, %v379_v2  ;;  %v424_v7 = vpop.permute.xlu1 %423  ;;  %v2914_v36 = vpop.permute.xlu2 %501 }
 0x121   :  { %v434_v9 = vadd.f32 %v424_v7, %v380_v3 }
 0x122   :  { %v2896_v10 = vadd.f32 %v471_v8, %v433_v6 }
 0x123   :  { %v2900_v14 = vadd.f32 %v472_v30, %v434_v9 }
 0x125   :  { %532 = vrot.lane.b32.xlu0 %v522_v12, %s2685_s7 }
 0x127   :  { %v426_v19 = vpop.permute.xlu0 %425 }
 0x128   :  { %v435_v20 = vadd.f32 %v426_v19, %v381_v31  ;;  %v428_v23 = vpop.permute.xlu1 %427  ;;  %v2921_v42 = vpop.permute.xlu2 %555  ;;  %v349_v31 = vmul.f32 %v347_v55, %v2774_v22  ;;  %v217_v19 = vmul.f32 %v213_v53, %v2762_v16  ;;  %v482_v22 = vmul.f32 %v481_v0, %v2822_v47 }
 0x129   :  { %v436_v29 = vadd.f32 %v428_v23, %v382_v17 }
 0x12a   :  { %v2906_v34 = vadd.f32 %v473_v25, %v435_v20  ;;  %v351_v25 = vmul.f32 %v347_v55, %v2776_v24 }
 0x12b   :  { %v2908_v27 = vadd.f32 %v474_v33, %v436_v29 }
 0x12d   :  { %534 = vrot.lane.b32.xlu0 %v2793_v32, %s2685_s7 }
 0x12f   :  { %v2912_v35 = vpop.permute.xlu0 %503 }
 0x130   :  { %v2916_v38 = vpop.permute.xlu1 %505  ;;  %v2928_v32 = vpop.permute.xlu2 %559 }
 0x135   :  { %133 = vrot.lane.b32.xlu0 %v99_v39, %s2683_s2 }
 0x137   :  { %v2919_v40 = vpop.permute.xlu0 %557 }
 0x138   :  { %v2923_v43 = vpop.permute.xlu1 %507  ;;  %v267_v50 = vpop.permute.xlu2 %266 }
 0x139   :  { %v275_v20 = vadd.f32 %v267_v50, %v217_v19  ;;  %v3008_v19 = vstv %s2459_s1 }
 0x13d   :  { %151 = vrot.lane.b32.xlu0 %v108_v45, %s2683_s2 }
 0x13f   :  { %v2926_v46 = vpop.permute.xlu0 %561 }
 0x140   :  { %v319_v48 = vpop.permute.xlu1 %318  ;;  %v399_v57 = vpop.permute.xlu2 %398 }
 0x147   :  { %v261_v49 = vpop.permute.xlu0 %260 }
 0x148   :  { %v449_v51 = vpop.permute.xlu1 %448  ;;  %v272_v1 = vadd.f32 %v261_v49, %v214_v62  ;;  %v401_v7 = vpop.permute.xlu2 %400 }
 0x14f   :  { %v263_v52 = vpop.permute.xlu0 %262 }
 0x150   :  { %v453_v58 = vpop.permute.xlu1 %452  ;;  %v273_v13 = vadd.f32 %v263_v52, %v215_v37  ;;  %v2942_v21 = vpop.permute.xlu2 %528 }
 0x157   :  { %v265_v56 = vpop.permute.xlu0 %264 }
 0x158   :  { %v274_v59 = vadd.f32 %v265_v56, %v216_v54  ;;  %v2935_v8 = vpop.permute.xlu1 %530  ;;  %v2947_v33 = vpop.permute.xlu2 %582  ;;  %v483_v54 = vmul.f32 %v481_v0, %v2812_v41  ;;  %v485_v41 = vmul.f32 %v481_v0, %v2779_v26  ;;  %v2984_v0 = vstv %s2451_s29 }
 0x15a   :  { %v328_v61 = vadd.f32 %v319_v48, %v274_v59 }
 0x15c   :  { %v354_v63 = vadd.f32 %v350_v60, %v328_v61 }
 0x15e   :  { %v408_v2 = vadd.f32 %v399_v57, %v354_v63  ;;  %v2971_v63 = vstv %s2447_s0 }
 0x15f   :  { %v315_v3 = vpop.permute.xlu0 %314 }
 0x160   :  { %v326_v4 = vadd.f32 %v315_v3, %v272_v1  ;;  %v462_v6 = vadd.f32 %v453_v58, %v408_v2  ;;  %v2944_v44 = vpop.permute.xlu1 %584  ;;  %v2955_v50 = vpop.permute.xlu2 %586  ;;  %v2960_v58 = vstv %s2446_s27  ;;  %s654_s27 = sld [smem:[#allocation10]] }
 0x162   :  { %v352_v9 = vadd.f32 %v348_v5, %v326_v4  ;;  %v2937_v30 = vadd.f32 %v484_v11, %v462_v6  ;;  %v2988_v6 = vstv %s2452_s28 }
 0x167   :  { %v317_v12 = vpop.permute.xlu0 %316 }
 0x168   :  { %v327_v15 = vadd.f32 %v317_v12, %v273_v13  ;;  %v2949_v18 = vpop.permute.xlu1 %588  ;;  %v136_v56 = vpop.permute.xlu2 %135 }
 0x169   :  { %181 = vst.msk [vmem:[#allocation2 + $0x21] sm:$0xff] %vm177_vm2, %v136_v56 }
 0x16a   :  { %v353_v17 = vadd.f32 %v349_v31, %v327_v15 }
 0x16f   :  { %v321_v23 = vpop.permute.xlu0 %320 }
 0x170   :  { %v329_v28 = vadd.f32 %v321_v23, %v275_v20  ;;  %v150_v49 = vpop.permute.xlu1 %149  ;;  %v2982_v26 = vld [vmem:[#allocation2 + $0x21] sm:$0xff] }
 0x171   :  { %188 = vst.msk [vmem:[#allocation2 + $0x79] sm:$0xff] %vm177_vm2, %v150_v49  ;;  %v2994_v37 = vmul.f32 %v2984_v0, %v2982_v26  ;;  %v3002_v15 = vld [vmem:[#allocation2 + $0x22] sm:$0xff]  ;;  %v3033_v49 = vstv %s2445_s3 }
 0x172   :  { %v355_v29 = vadd.f32 %v351_v25, %v329_v28  ;;  %v3018_v25 = vmul.f32 %v3008_v19, %v3002_v15 }
 0x174   :  { %v409_v59 = vadd.f32 %v401_v7, %v355_v29 }
 0x177   :  { %v395_v39 = vpop.permute.xlu0 %394 }
 0x178   :  { %v406_v45 = vadd.f32 %v395_v39, %v352_v9  ;;  %v2958_v57 = vld [vmem:[#allocation2 + $0x78] sm:$0xff]  ;;  %v777_v9 = vstv %s2444_s30 }
 0x179   :  { %v834_v47 = vmul.f32 %v2960_v58, %v2958_v57  ;;  %v2977_v2 = vmul.f32 %v2971_v63, %v2958_v57  ;;  %v3004_v31 = vld [vmem:[#allocation2 + $0x79] sm:$0xff] }
 0x17a   :  { %v460_v48 = vadd.f32 %v449_v51, %v406_v45  ;;  %v968_v29 = vmul.f32 %v2988_v6, %v3004_v31 }
 0x17b   :  { %844 = vrot.lane.b32.xlu1 %v834_v47, %s2686_s8  ;;  %v780_v47 = vmul.f32 %v777_v9, %v2958_v57 }
 0x17c   :  { %v2952_v16 = vadd.f32 %v482_v22, %v460_v48 }
 0x17f   :  { %v397_v52 = vpop.permute.xlu0 %396 }
 0x180   :  { %v407_v24 = vadd.f32 %v397_v52, %v353_v17  ;;  %v3006_v17 = vstv %s2457_s5 }
 0x181   :  { %v3014_v23 = vmul.f32 %v3006_v17, %v3002_v15 }
 0x187   :  { %v451_v53 = vpop.permute.xlu0 %450 }
 0x188   :  { %v461_v55 = vadd.f32 %v451_v53, %v407_v24 }
 0x18a   :  { %v2965_v51 = vadd.f32 %v483_v54, %v461_v55  ;;  %v911_v54 = vstv %s2450_s6 }
 0x18b   :  { %v914_v56 = vmul.f32 %v911_v54, %v3004_v31 }
 0x18f   :  { %v455_v60 = vpop.permute.xlu0 %454 }
 0x190   :  { %v463_v61 = vadd.f32 %v455_v60, %v409_v59 }
 0x192   :  { %v2969_v62 = vadd.f32 %v485_v41, %v463_v61 }
 0x197   :  { %v2973_v1 = vpop.permute.xlu0 %532 }
 0x19f   :  { %v2979_v3 = vpop.permute.xlu0 %534 }
 0x1a7   :  { %v134_v4 = vpop.permute.xlu0 %133 }
 0x1a8   :  { %180 = vst.msk [vmem:[#allocation2 + $0x19] sm:$0xff] %vm177_vm2, %v134_v4  ;;  %v3064_v4 = vstv %s2456_s9 }
 0x1af   :  { %v152_v5 = vpop.permute.xlu0 %151  ;;  %v2986_v11 = vld [vmem:[#allocation2 + $0x19] sm:$0xff] }
 0x1b0   :  { %v2990_v7 = vld [vmem:[#allocation2 + $0x18] sm:$0xff]  ;;  %189 = vst.msk [vmem:[#allocation2 + $0x81] sm:$0xff] %vm177_vm2, %v152_v5  ;;  %v966_v13 = vmul.f32 %v2988_v6, %v2986_v11  ;;  %v3010_v20 = vld [vmem:[#allocation2 + $0x20] sm:$0xff] }
 0x1b1   :  { %v778_v12 = vmul.f32 %v777_v9, %v2990_v7  ;;  %v779_v45 = vmul.f32 %v777_v9, %v3010_v20  ;;  %v832_v61 = vmul.f32 %v2960_v58, %v2990_v7  ;;  %v3062_v41 = vld [vmem:[#allocation2 + $0x1a] sm:$0xff] }
 0x1b2   :  { %974 = vrot.lane.b32.xlu1 %v966_v13, %s2686_s8  ;;  %v1046_v5 = vmul.f32 %v3064_v4, %v3062_v41  ;;  %v514_v13 = vadd.f32 %v2912_v35, %v2900_v14  ;;  %v516_v14 = vadd.f32 %v2923_v43, %v2908_v27  ;;  %v543_v43 = vadd.f32 %v2979_v3, %v2969_v62 }
 0x1b3   :  { %786 = vrot.lane.b32.xlu0 %v778_v12, %s2685_s7  ;;  %v513_v12 = vadd.f32 %v2914_v36, %v2896_v10  ;;  %v540_v10 = vadd.f32 %v2942_v21, %v2952_v16  ;;  %v542_v36 = vadd.f32 %v2973_v1, %v2937_v30 }
 0x1b4   :  { %v3102_v27 = vadd.f32 %v2926_v46, %v516_v14 }
 0x1b5   :  { %v3111_v30 = vadd.f32 %v2947_v33, %v540_v10  ;;  %v3114_v21 = vadd.f32 %v2955_v50, %v542_v36 }
 0x1b7   :  { %v3020_v28 = vld [vmem:[#allocation2 + $0x80] sm:$0xff]  ;;  %v688_v33 = vmul.f32 %v3111_v30, %v3111_v30  ;;  %v690_v50 = vmul.f32 %v3114_v21, %v3114_v21  ;;  %v671_v14 = vsel %vm598_vm3, %v3111_v30, 0.0 }
 0x1b8   :  { %v781_v39 = vmul.f32 %v777_v9, %v3020_v28  ;;  %v3026_v22 = vld [vmem:[#allocation2 + $0x7a] sm:$0xff]  ;;  %v3028_v48 = vld [vmem:[#allocation2 + $0x82] sm:$0xff]  ;;  %v3037_v52 = vmul.f32 %v3033_v49, %v3020_v28  ;;  %v833_v9 = vmul.f32 %v2960_v58, %v3010_v20 }
 0x1b9   :  { %v3041_v24 = vmul.f32 %v3006_v17, %v3026_v22  ;;  %v3045_v53 = vmul.f32 %v3006_v17, %v3028_v48  ;;  %v3049_v55 = vmul.f32 %v3008_v19, %v3028_v48  ;;  %v3055_v59 = vld [vmem:[#allocation2 + $0x81] sm:$0xff]  ;;  %v692_v3 = vsel %vm598_vm3, %v688_v33, 0.0 }
 0x1ba   :  { %978 = vrot.lane.b32.xlu1 %v968_v29, %s2686_s8  ;;  %792 = vrot.lane.b32.xlu2 %v781_v39, %s2685_s7  ;;  %v915_v60 = vmul.f32 %v911_v54, %v3055_v59  ;;  %v3077_v29 = vadd.f32 %v2919_v40, %v514_v13  ;;  %v3080_v39 = vadd.f32 %v2921_v42, %v513_v12 }
 0x1bb   :  { %788 = vrot.lane.b32.xlu0 %v779_v45, %s2685_s7  ;;  %v515_v45 = vadd.f32 %v2916_v38, %v2906_v34  ;;  %v835_v40 = vmul.f32 %v2960_v58, %v3020_v28  ;;  %v967_v12 = vmul.f32 %v2988_v6, %v2982_v26 }
 0x1bc   :  { %v600_v35 = vsel %vm598_vm3, %v3077_v29, 0.0  ;;  %v599_v34 = vsel %vm598_vm3, %v3080_v39, 0.0  ;;  %v616_v10 = vmul.f32 %v3080_v39, %v3080_v39 }
 0x1bd   :  { %v3099_v38 = vadd.f32 %v2928_v32, %v515_v45  ;;  %v3117_v32 = vadd.f32 %v2949_v18, %v543_v43  ;;  %v969_v43 = vmul.f32 %v2988_v6, %v3055_v59  ;;  %v1048_v6 = vmul.f32 %v3064_v4, %v3026_v22 }
 0x1bf   :  { %v602_v46 = vsel %vm598_vm3, %v3099_v38, 0.0  ;;  %v691_v62 = vmul.f32 %v3117_v32, %v3117_v32  ;;  %v676_v36 = vsel %vm598_vm3, %v3117_v32, 0.0 }
 0x1c2   :  { %924 = vrot.lane.b32.xlu2 %v914_v56, %s2685_s7  ;;  %v541_v56 = vadd.f32 %v2935_v8, %v2965_v51  ;;  %v601_v8 = vadd.f32 %v600_v35, %v599_v34  ;;  %v912_v51 = vmul.f32 %v911_v54, %v2986_v11 }
 0x1c3   :  { %790 = vrot.lane.b32.xlu0 %v780_v47, %s2685_s7  ;;  %v695_v47 = vsel %vm598_vm3, %v690_v50, 0.0 }
 0x1c4   :  { %v3105_v42 = vadd.f32 %v2944_v44, %v541_v56  ;;  %v604_v44 = vsel %vm598_vm3, %v3102_v27, 0.0  ;;  %v603_v58 = vadd.f32 %v602_v46, %v601_v8  ;;  %v617_v56 = vmul.f32 %v3077_v29, %v3077_v29 }
 0x1c5   :  { %v618_v46 = vmul.f32 %v3099_v38, %v3099_v38 }
 0x1c6   :  { %v689_v16 = vmul.f32 %v3105_v42, %v3105_v42  ;;  %v605_v18 = vadd.f32 %v604_v44, %v603_v58  ;;  %v672_v45 = vsel %vm598_vm3, %v3105_v42, 0.0  ;;  %v621_v34 = vsel %vm598_vm3, %v617_v56, 0.0 }
 0x1c7   :  { %v673_v35 = vadd.f32 %v672_v45, %v671_v14  ;;  %v619_v44 = vmul.f32 %v3102_v27, %v3102_v27  ;;  %v807_v45 = vmul.f32 %v3033_v49, %v2958_v57  ;;  %v754_v14 = vstv %s2442_s11 }
 0x1c8   :  { %v693_v1 = vsel %vm598_vm3, %v689_v16, 0.0  ;;  %v620_v16 = vsel %vm598_vm3, %v616_v10, 0.0  ;;  %v859_v10 = vmul.f32 %v2971_v63, %v2990_v7 }
 0x1c9   :  { %v622_v58 = vadd.f32 %v621_v34, %v620_v16  ;;  %v625_v33 = vsel %vm598_vm3, %v619_v44, 0.0 }
 0x1ca   :  { %926 = vrot.lane.b32.xlu2 %v915_v60, %s2685_s7  ;;  %v694_v60 = vadd.f32 %v693_v1, %v692_v3  ;;  %v1049_v1 = vmul.f32 %v3064_v4, %v3028_v48  ;;  %v1099_v3 = vstv %s2458_s10 }
 0x1cb   :  { %840 = vrot.lane.b32.xlu0 %v832_v61, %s2686_s8  ;;  %v697_v61 = vsel %vm598_vm3, %v691_v62, 0.0  ;;  %v1047_v62 = vmul.f32 %v3064_v4, %v3002_v15  ;;  %v1102_v4 = vmul.f32 %v1099_v3, %v3026_v22 }
 0x1d2   :  { %1054 = vrot.lane.b32.xlu2 %v1046_v5, %s2685_s7  ;;  %v696_v5 = vadd.f32 %v695_v47, %v694_v60  ;;  %v1101_v47 = vmul.f32 %v1099_v3, %v3002_v15  ;;  %v1103_v60 = vmul.f32 %v1099_v3, %v3028_v48 }
 0x1d3   :  { %842 = vrot.lane.b32.xlu0 %v833_v9, %s2686_s8  ;;  %v913_v9 = vmul.f32 %v911_v54, %v2982_v26  ;;  %v674_v54 = vsel %vm598_vm3, %v3114_v21, 0.0 }
 0x1d4   :  { %v698_v13 = vadd.f32 %v697_v61, %v696_v5  ;;  %v1100_v61 = vmul.f32 %v1099_v3, %v3062_v41  ;;  %v805_v5 = vmul.f32 %v3033_v49, %v2990_v7 }
 0x1db   :  { %846 = vrot.lane.b32.xlu0 %v835_v40, %s2686_s8  ;;  %v675_v40 = vadd.f32 %v674_v54, %v673_v35 }
 0x1dd   :  { %v677_v8 = vadd.f32 %v676_v36, %v675_v40  ;;  %v757_v36 = vmul.f32 %v754_v14, %v2958_v57  ;;  %v889_v40 = vstv %s2448_s12  ;;  %s2455_s12 = sld [smem:[#allocation8 + $0x186]] }
 0x1e3   :  { %920 = vrot.lane.b32.xlu0 %v912_v51, %s2685_s7  ;;  %v623_v51 = vsel %vm598_vm3, %v618_v46, 0.0  ;;  %v755_v46 = vmul.f32 %v754_v14, %v2990_v7 }
 0x1e4   :  { %606 = vadd.xlane.f32.xlu1 %v605_v18  ;;  %v624_v50 = vadd.f32 %v623_v51, %v622_v58  ;;  %v860_v58 = vmul.f32 %v2971_v63, %v3010_v20 }
 0x1e6   :  { %v626_v18 = vadd.f32 %v625_v33, %v624_v50 }
 0x1eb   :  { %922 = vrot.lane.b32.xlu0 %v913_v9, %s2685_s7  ;;  %v806_v9 = vmul.f32 %v3033_v49, %v3010_v20  ;;  %v892_v49 = vmul.f32 %v889_v40, %v3004_v31 }
 0x1ec   :  { %699 = vadd.xlane.f32.xlu1 %v698_v13 }
 0x1f3   :  { %976 = vrot.lane.b32.xlu0 %v967_v12, %s2686_s8  ;;  %v845_v12 = vpop.permute.xlu1 %844 }
 0x1fb   :  { %980 = vrot.lane.b32.xlu0 %v969_v43, %s2686_s8  ;;  %678 = vadd.xlane.f32.xlu2 %v677_v8 }
 0x203   :  { %1058 = vrot.lane.b32.xlu0 %v1048_v6, %s2685_s7  ;;  %627 = vadd.xlane.f32.xlu2 %v626_v18  ;;  %v1023_v18 = vstv %s2454_s13  ;;  %s2473_s13 = sld [smem:[#allocation8 + $0x284]] }
 0x204   :  { %v1026_v3 = vmul.f32 %v1023_v18, %v3026_v22 }
 0x205   :  { %1056 = vrot.lane.b32.xlu1 %v1047_v62, %s2685_s7 }
 0x20b   :  { %1060 = vrot.lane.b32.xlu0 %v1049_v1, %s2685_s7  ;;  %v890_v1 = vmul.f32 %v889_v40, %v2986_v11 }
 0x20d   :  { %1110 = vrot.lane.b32.xlu1 %v1101_v47, %s2686_s8 }
 0x214   :  { %v793_v54 = vpop.permute.xlu2 %792 }
 0x215   :  { %1114 = vrot.lane.b32.xlu1 %v1103_v60, %s2686_s8 }
 0x21b   :  { %1108 = vrot.lane.b32.xlu2 %v1100_v61, %s2686_s8 }
 0x21c   :  { %v925_v16 = vpop.permute.xlu2 %924 }
 0x21d   :  { %813 = vrot.lane.b32.xlu1 %v805_v5, %s2685_s7  ;;  %v756_v5 = vmul.f32 %v754_v14, %v3010_v20 }
 0x223   :  { %1112 = vrot.lane.b32.xlu2 %v1102_v4, %s2686_s8  ;;  %v862_v4 = vmul.f32 %v2971_v63, %v3020_v28 }
 0x224   :  { %v975_v35 = vpop.permute.xlu1 %974 }
 0x225   :  { %v787_v13 = vpop.permute.xlu0 %786  ;;  %815 = vrot.lane.b32.xlu1 %v806_v9, %s2685_s7 }
 0x226   :  { %v798_v51 = vadd.f32 %v787_v13, %v755_v46  ;;  %v941_v46 = vmul.f32 %v2984_v0, %v3004_v31 }
 0x22c   :  { %v979_v50 = vpop.permute.xlu1 %978 }
 0x22d   :  { %v789_v56 = vpop.permute.xlu0 %788  ;;  %817 = vrot.lane.b32.xlu1 %v807_v45, %s2685_s7  ;;  %v891_v45 = vmul.f32 %v889_v40, %v2982_v26 }
 0x22e   :  { %v799_v9 = vadd.f32 %v789_v56, %v756_v5 }
 0x235   :  { %v791_v34 = vpop.permute.xlu0 %790  ;;  %867 = vrot.lane.b32.xlu1 %v859_v10, %s2686_s8 }
 0x236   :  { %v800_v43 = vadd.f32 %v791_v34, %v757_v36  ;;  %v758_v36 = vmul.f32 %v754_v14, %v3020_v28  ;;  %v939_v34 = vmul.f32 %v2984_v0, %v2986_v11 }
 0x238   :  { %v854_v8 = vadd.f32 %v845_v12, %v800_v43  ;;  %v801_v43 = vadd.f32 %v793_v54, %v758_v36 }
 0x23a   :  { %v896_v44 = vadd.f32 %v892_v49, %v854_v8  ;;  %v893_v8 = vmul.f32 %v889_v40, %v3055_v59  ;;  %v927_v40 = vpop.permute.xlu2 %926 }
 0x23c   :  { %v934_v33 = vadd.f32 %v925_v16, %v896_v44 }
 0x23d   :  { %v841_v6 = vpop.permute.xlu0 %840  ;;  %869 = vrot.lane.b32.xlu1 %v860_v58, %s2686_s8 }
 0x23e   :  { %v852_v62 = vadd.f32 %v841_v6, %v798_v51  ;;  %v988_v47 = vadd.f32 %v979_v50, %v934_v33  ;;  %v1024_v33 = vmul.f32 %v1023_v18, %v3062_v41  ;;  %v942_v6 = vmul.f32 %v2984_v0, %v3055_v59 }
 0x23f   :  { %v1025_v0 = vmul.f32 %v1023_v18, %v3002_v15 }
 0x240   :  { %v894_v60 = vadd.f32 %v890_v1, %v852_v62  ;;  %v3202_v61 = vadd.f32 %v1026_v3, %v988_v47 }
 0x245   :  { %v843_v13 = vpop.permute.xlu0 %842  ;;  %873 = vrot.lane.b32.xlu1 %v862_v4, %s2686_s8 }
 0x246   :  { %v853_v12 = vadd.f32 %v843_v13, %v799_v9  ;;  %v1055_v9 = vpop.permute.xlu2 %1054 }
 0x248   :  { %v895_v10 = vadd.f32 %v891_v45, %v853_v12  ;;  %v1127_v45 = vmul.f32 %v3008_v19, %v3062_v41 }
 0x24d   :  { %v847_v49 = vpop.permute.xlu0 %846  ;;  %947 = vrot.lane.b32.xlu1 %v939_v34, %s2685_s7 }
 0x24e   :  { %v855_v63 = vadd.f32 %v847_v49, %v801_v43 }
 0x250   :  { %v897_v56 = vadd.f32 %v893_v8, %v855_v63  ;;  %v1129_v63 = vmul.f32 %v3008_v19, %v3026_v22 }
 0x252   :  { %v935_v36 = vadd.f32 %v927_v40, %v897_v56 }
 0x255   :  { %v921_v44 = vpop.permute.xlu0 %920  ;;  %951 = vrot.lane.b32.xlu1 %v941_v46, %s2685_s7 }
 0x256   :  { %v932_v16 = vadd.f32 %v921_v44, %v894_v60  ;;  %v1073_v60 = vmul.f32 %v3006_v17, %v3062_v41  ;;  %v1027_v17 = vmul.f32 %v1023_v18, %v3028_v48 }
 0x257   :  { %v607_v58 = vpop.xlane.xlu1 %606 }
 0x258   :  { %v986_v14 = vadd.f32 %v975_v35, %v932_v16  ;;  %v608_v51 = vrot.slane %v607_v58, 4 }
 0x25a   :  { %v609_v54 = vadd.f32 %v608_v51, %v607_v58  ;;  %v1028_v50 = vadd.f32 %v1024_v33, %v986_v14 }
 0x25c   :  { %v610_v62 = vrot.slane %v609_v54, 2  ;;  %v1066_v51 = vadd.f32 %v1055_v9, %v1028_v50 }
 0x25d   :  { %v923_v1 = vpop.permute.xlu0 %922  ;;  %953 = vrot.lane.b32.xlu1 %v942_v6, %s2685_s7 }
 0x25e   :  { %v611_v3 = vadd.f32 %v610_v62, %v609_v54  ;;  %v933_v35 = vadd.f32 %v923_v1, %v895_v10 }
 0x25f   :  { %v3231_v10 = vpop.xlane.xlu1 %699 }
 0x260   :  { %v612_v47 = vrot.slane %v611_v3, 1 }
 0x262   :  { %v613_v5 = vadd.f32 %v612_v47, %v611_v3 }
 0x264   :  { %2508 = vpush %v613_v5 }
 0x265   :  { %v977_v4 = vpop.permute.xlu0 %976  ;;  %1081 = vrot.lane.b32.xlu1 %v1073_v60, %s2685_s7 }
 0x266   :  { %v987_v13 = vadd.f32 %v977_v4, %v933_v35 }
 0x268   :  { %v1029_v12 = vadd.f32 %v1025_v0, %v987_v13 }
 0x26d   :  { %v981_v34 = vpop.permute.xlu0 %980  ;;  %1135 = vrot.lane.b32.xlu1 %v1127_v45, %s2686_s8 }
 0x26e   :  { %v989_v43 = vadd.f32 %v981_v34, %v935_v36  ;;  %v3228_v49 = vpop.xlane.xlu2 %678 }
 0x270   :  { %v1031_v8 = vadd.f32 %v1027_v17, %v989_v43 }
 0x275   :  { %1139 = vrot.lane.b32.xlu1 %v1129_v63, %s2686_s8  ;;  %v1059_v56 = vpop.permute.xlu0 %1058 }
 0x276   :  { %v628_v46 = vpop.xlane.xlu2 %627  ;;  %v1068_v50 = vadd.f32 %v1059_v56, %v3202_v61 }
 0x277   :  { %v629_v44 = vrot.slane %v628_v46, 4  ;;  %v1057_v16 = vpop.permute.xlu1 %1056 }
 0x278   :  { %v1067_v54 = vadd.f32 %v1057_v16, %v1029_v12 }
 0x279   :  { %v630_v58 = vadd.f32 %v629_v44, %v628_v46 }
 0x27b   :  { %v631_v14 = vrot.slane %v630_v58, 2 }
 0x27d   :  { %v632_v33 = vadd.f32 %v631_v14, %v630_v58  ;;  %v1061_v19 = vpop.permute.xlu0 %1060  ;;  %v3265_v14 = vstv %s2443_s14  ;;  %s2479_s14 = sld [smem:[#allocation8 + $0x287]] }
 0x27e   :  { %v1109_v6 = vpop.permute.xlu2 %1108  ;;  %v1069_v4 = vadd.f32 %v1061_v19, %v1031_v8  ;;  %v769_v19 = vmul.f32 %v3265_v14, %v2958_v57 }
 0x27f   :  { %v3236_v40 = vadd.f32 %v1109_v6, %v1066_v51  ;;  %v1111_v18 = vpop.permute.xlu1 %1110  ;;  %v633_v62 = vrot.slane %v632_v33, 1  ;;  %v767_v51 = vmul.f32 %v3265_v14, %v2990_v7 }
 0x280   :  { %v3238_v1 = vadd.f32 %v1111_v18, %v1067_v54  ;;  %v768_v18 = vmul.f32 %v3265_v14, %v3010_v20 }
 0x281   :  { %v634_v3 = vadd.f32 %v633_v62, %v632_v33  ;;  %v1168_v47 = vmul.f32 %v3236_v40, %v3236_v40  ;;  %v1151_v60 = vsel %vm598_vm3, %v3236_v40, 0.0 }
 0x282   :  { %v1169_v5 = vmul.f32 %v3238_v1, %v3238_v1  ;;  %v1152_v35 = vsel %vm598_vm3, %v3238_v1, 0.0 }
 0x283   :  { %2510 = vpush %v634_v3  ;;  %v1172_v12 = vsel %vm598_vm3, %v1168_v47, 0.0  ;;  %v1153_v34 = vadd.f32 %v1152_v35, %v1151_v60  ;;  %v992_v35 = vstv %s2453_s16  ;;  %s2469_s16 = sld [smem:[#allocation8 + $0x282]] }
 0x284   :  { %v1173_v45 = vsel %vm598_vm3, %v1169_v5, 0.0 }
 0x285   :  { %v1174_v46 = vadd.f32 %v1173_v45, %v1172_v12  ;;  %v996_v45 = vmul.f32 %v992_v35, %v3055_v59 }
 0x286   :  { %v1113_v9 = vpop.permute.xlu2 %1112 }
 0x287   :  { %v3249_v13 = vadd.f32 %v1113_v9, %v1068_v50  ;;  %v1115_v0 = vpop.permute.xlu1 %1114  ;;  %v3277_v50 = vstv %s2449_s15  ;;  %s2481_s15 = sld [smem:[#allocation8 + $0x288]] }
 0x288   :  { %v3253_v36 = vadd.f32 %v1115_v0, %v1069_v4  ;;  %v901_v20 = vmul.f32 %v3277_v50, %v2986_v11  ;;  %v102_v0 = vld [vmem:[#allocation3 + $0x28] sm:$0xff]  ;;  %v902_v12 = vmul.f32 %v3277_v50, %v2982_v26 }
 0x289   :  { %v1170_v61 = vmul.f32 %v3249_v13, %v3249_v13  ;;  %v1154_v43 = vsel %vm598_vm3, %v3249_v13, 0.0  ;;  %139 = vrot.lane.b32.xlu1 %v102_v0, %s2683_s2 }
 0x28a   :  { %v1155_v17 = vadd.f32 %v1154_v43, %v1153_v34  ;;  %v1156_v8 = vsel %vm598_vm3, %v3253_v36, 0.0  ;;  %v1171_v63 = vmul.f32 %v3253_v36, %v3253_v36  ;;  %v680_v34 = vrot.slane %v3228_v49, 4 }
 0x28b   :  { %v1175_v44 = vsel %vm598_vm3, %v1170_v61, 0.0 }
 0x28c   :  { %v1157_v16 = vadd.f32 %v1156_v8, %v1155_v17  ;;  %v1176_v56 = vadd.f32 %v1175_v44, %v1174_v46  ;;  %v1177_v58 = vsel %vm598_vm3, %v1171_v63, 0.0  ;;  %v681_v43 = vadd.f32 %v680_v34, %v3228_v49 }
 0x28e   :  { %1158 = vadd.xlane.f32.xlu0 %v1157_v16  ;;  %v1178_v33 = vadd.f32 %v1177_v58, %v1176_v56  ;;  %v682_v8 = vrot.slane %v681_v43, 2 }
 0x28f   :  { %v814_v54 = vpop.permute.xlu1 %813 }
 0x290   :  { %v825_v6 = vadd.f32 %v814_v54, %v767_v51  ;;  %1179 = vadd.xlane.f32.xlu2 %v1178_v33  ;;  %v683_v56 = vadd.f32 %v682_v8, %v681_v43 }
 0x295   :  { %s2509_s17 = spop %2508 }
 0x296   :  { %s3288_s18 = smul.f32 0.001953125, %s2509_s17  ;;  %s2466_s17 = sld [smem:[#allocation8 + $0x201]] }
 0x297   :  { %v816_v62 = vpop.permute.xlu1 %815 }
 0x298   :  { %v826_v3 = vadd.f32 %v816_v62, %v768_v18  ;;  %s637_s19 = smul.f32 %s3288_s18, %s3288_s18  ;;  %v101_v18 = vld [vmem:[#allocation3 + $0x20] sm:$0xff]  ;;  %v110_v62 = vld [vmem:[#allocation3 + $0x68] sm:$0xff] }
 0x29f   :  { %v818_v47 = vpop.permute.xlu1 %817 }
 0x2a0   :  { %v3273_v5 = vadd.f32 %v818_v47, %v769_v19 }
 0x2a2   :  { %819 = vrot.lane.b32.xlu0 %v3037_v52, %s2685_s7  ;;  %v993_v52 = vmul.f32 %v992_v35, %v2986_v11  ;;  %v995_v11 = vmul.f32 %v992_v35, %v3004_v31 }
 0x2a7   :  { %v868_v7 = vpop.permute.xlu1 %867 }
 0x2a8   :  { %v879_v60 = vadd.f32 %v868_v7, %v825_v6  ;;  %871 = vrot.lane.b32.xlu2 %v2977_v2, %s2686_s8  ;;  %v994_v2 = vmul.f32 %v992_v35, %v2982_v26  ;;  %v701_v26 = vrot.slane %v3231_v10, 4 }
 0x2aa   :  { %949 = vrot.lane.b32.xlu0 %v2994_v37, %s2685_s7  ;;  %v3285_v57 = vadd.f32 %v901_v20, %v879_v60  ;;  %v702_v17 = vadd.f32 %v701_v26, %v3231_v10  ;;  %v684_v10 = vrot.slane %v683_v56, 1  ;;  %v903_v26 = vmul.f32 %v3277_v50, %v3004_v31 }
 0x2ac   :  { %v703_v46 = vrot.slane %v702_v17, 2  ;;  %v685_v54 = vadd.f32 %v684_v10, %v683_v56 }
 0x2ae   :  { %v704_v58 = vadd.f32 %v703_v46, %v702_v17 }
 0x2af   :  { %v870_v4 = vpop.permute.xlu1 %869 }
 0x2b0   :  { %v880_v9 = vadd.f32 %v870_v4, %v826_v3  ;;  %1001 = vrot.lane.b32.xlu2 %v993_v52, %s2686_s8 }
 0x2b2   :  { %1003 = vrot.lane.b32.xlu0 %v994_v2, %s2686_s8  ;;  %v3296_v37 = vadd.f32 %v902_v12, %v880_v9 }
 0x2b4   :  { %s2511_s20 = spop %2510 }
 0x2b5   :  { %s636_s21 = smul.f32 0.001953125, %s2511_s20 }
 0x2b7   :  { %s638_s22 = ssub.f32 %s636_s21, %s637_s19 }
 0x2b8   :  { %1005 = vrot.lane.b32.xlu2 %v995_v11, %s2686_s8  ;;  %s2441_s19 = sld [smem:[#allocation10 + $0x1]] }
 0x2b9   :  { %s639_s25 = sadd.f32 1e-05, %s638_s22 }
 0x2ba   :  { %1007 = vrot.lane.b32.xlu0 %v996_v45, %s2686_s8  ;;  %s2467_s21 = sld [smem:[#allocation8 + $0x281]] }
 0x2bb   :  { %v640_v61 = vstv %s639_s25 }
 0x2bc   :  { %2567 = vrsqrt.f32 %v640_v61  ;;  %vm647_vm5 = vweird.f32 %v640_v61 }
 0x2c0   :  { %1083 = vrot.lane.b32.xlu2 %v3014_v23, %s2685_s7  ;;  %v705_v23 = vrot.slane %v704_v58, 1 }
 0x2c2   :  { %v2568_v63 = vpop.eup %2567  ;;  %1085 = vrot.lane.b32.xlu0 %v3041_v24, %s2685_s7  ;;  %v706_v6 = vadd.f32 %v705_v23, %v704_v58 }
 0x2c3   :  { %v642_v44 = vmul.f32 %v2568_v63, %v640_v61  ;;  %vm648_vm4 = vweird.f32 %v2568_v63 }
 0x2c4   :  { %vm649_vm6 = vmor %vm647_vm5, %vm648_vm4 }
 0x2c5   :  { %v643_v16 = vmul.f32 %v2568_v63, %v642_v44  ;;  %v1034_v44 = vstv %s2455_s12  ;;  %s2460_s12 = sld [smem:[#allocation9 + $0x2]] }
 0x2c6   :  { %v1035_v23 = vmul.f32 %v1034_v44, %v3062_v41 }
 0x2c7   :  { %v644_v51 = vmul.f32 0.5, %v643_v16 }
 0x2c8   :  { %1137 = vrot.lane.b32.xlu2 %v3018_v25, %s2686_s8  ;;  %v109_v25 = vld [vmem:[#allocation3 + $0x60] sm:$0xff] }
 0x2c9   :  { %v645_v49 = vsub.f32 1.5, %v644_v51 }
 0x2ca   :  { %1087 = vrot.lane.b32.xlu0 %v3045_v53, %s2685_s7  ;;  %v3321_v53 = vpop.permute.xlu1 %873 }
 0x2cb   :  { %v646_v33 = vmul.f32 %v2568_v63, %v645_v49  ;;  %v770_v49 = vmul.f32 %v3265_v14, %v3020_v28 }
 0x2cd   :  { %v650_v24 = vsel %vm649_vm6, %v2568_v63, %v646_v33 }
 0x2ce   :  { %2512 = vpush %v650_v24 }
 0x2cf   :  { %2514 = vpush %v685_v54 }
 0x2d0   :  { %2516 = vpush %v706_v6  ;;  %1141 = vrot.lane.b32.xlu2 %v3049_v55, %s2686_s8 }
 0x2d2   :  { %137 = vrot.lane.b32.xlu0 %v101_v18, %s2683_s2  ;;  %v948_v3 = vpop.permute.xlu1 %947 }
 0x2d3   :  { %v959_v16 = vadd.f32 %v948_v3, %v3285_v57  ;;  %v904_v57 = vmul.f32 %v3277_v50, %v3055_v59 }
 0x2d8   :  { %153 = vrot.lane.b32.xlu2 %v109_v25, %s2683_s2 }
 0x2da   :  { %155 = vrot.lane.b32.xlu0 %v110_v62, %s2683_s2  ;;  %v3323_v19 = vpop.permute.xlu1 %951 }
 0x2e2   :  { %v3325_v47 = vpop.permute.xlu1 %953 }
 0x2ea   :  { %v3336_v34 = vpop.permute.xlu1 %1081 }
 0x2f2   :  { %v1136_v58 = vpop.permute.xlu1 %1135 }
 0x2ff   :  { %s2513_s0 = spop %2512 }
 0x300   :  { %s653_s28 = smul.f32 %s2513_s0, %s652_s26  ;;  %s2515_s29 = spop %2514 }
 0x301   :  { %s3327_s30 = smul.f32 0.001953125, %s2515_s29  ;;  %s2517_s5 = spop %2516  ;;  %v1159_v52 = vpop.xlane.xlu0 %1158 }
 0x302   :  { %s655_s1 = smul.f32 %s653_s28, %s3288_s18  ;;  %v657_v55 = vstv %s653_s28  ;;  %v1160_v45 = vrot.slane %v1159_v52, 4  ;;  %s2440_s18 = sld [smem:[#allocation9 + $0x1]] }
 0x303   :  { %s709_s3 = smul.f32 %s3327_s30, %s3327_s30  ;;  %v1180_v7 = vpop.xlane.xlu2 %1179  ;;  %v658_v60 = vmul.f32 %v657_v55, %v3080_v39  ;;  %v659_v20 = vmul.f32 %v657_v55, %v3077_v29  ;;  %v660_v35 = vmul.f32 %v657_v55, %v3099_v38  ;;  %v661_v4 = vmul.f32 %v657_v55, %v3102_v27  ;;  %s2468_s28 = sld [smem:[#allocation8 + $0x202]] }
 0x304   :  { %s656_s6 = ssub.f32 %s654_s27, %s655_s1  ;;  %s708_s9 = smul.f32 0.001953125, %s2517_s5  ;;  %v1181_v39 = vrot.slane %v1180_v7, 4  ;;  %v1161_v27 = vadd.f32 %v1160_v45, %v1159_v52 }
 0x306   :  { %v662_v9 = vstv %s656_s6  ;;  %s710_s10 = ssub.f32 %s708_s9, %s709_s3  ;;  %v1182_v43 = vadd.f32 %v1181_v39, %v1180_v7  ;;  %v1162_v8 = vrot.slane %v1161_v27, 2 }
 0x307   :  { %v663_v2 = vadd.f32 %v662_v9, %v658_v60  ;;  %v664_v0 = vadd.f32 %v662_v9, %v659_v20  ;;  %v665_v12 = vadd.f32 %v662_v9, %v660_v35  ;;  %v666_v11 = vadd.f32 %v662_v9, %v661_v4  ;;  %v1140_v4 = vpop.permute.xlu1 %1139  ;;  %s2474_s6 = sld [smem:[#allocation8 + $0x205]] }
 0x308   :  { %s711_s11 = sadd.f32 1e-05, %s710_s10  ;;  %v1183_v46 = vrot.slane %v1182_v43, 2 }
 0x309   :  { %667 = vst.msk [vmem:[#allocation12] sm:$0xff] %vm598_vm3, %v663_v2  ;;  %s2472_s9 = sld [smem:[#allocation8 + $0x204]] }
 0x30a   :  { %668 = vst.msk [vmem:[#allocation12 + $0x8] sm:$0xff] %vm598_vm3, %v664_v0  ;;  %v712_v29 = vstv %s711_s11  ;;  %v1184_v54 = vadd.f32 %v1183_v46, %v1182_v43  ;;  %s2478_s10 = sld [smem:[#allocation8 + $0x207]] }
 0x30b   :  { %669 = vst.msk [vmem:[#allocation12 + $0x80] sm:$0xff] %vm598_vm3, %v665_v12  ;;  %2569 = vrsqrt.f32 %v712_v29  ;;  %v872_v38 = vpop.permute.xlu2 %871  ;;  %vm719_vm8 = vweird.f32 %v712_v29  ;;  %s2480_s11 = sld [smem:[#allocation8 + $0x208]] }
 0x30c   :  { %670 = vst.msk [vmem:[#allocation12 + $0x88] sm:$0xff] %vm598_vm3, %v666_v11  ;;  %v881_v61 = vadd.f32 %v872_v38, %v3273_v5  ;;  %v1163_v5 = vadd.f32 %v1162_v8, %v1161_v27  ;;  %v1185_v55 = vrot.slane %v1184_v54, 1  ;;  %v1038_v27 = vmul.f32 %v1034_v44, %v3028_v48 }
 0x30e   :  { %v907_v17 = vadd.f32 %v903_v26, %v881_v61  ;;  %v1164_v3 = vrot.slane %v1163_v5, 1  ;;  %v1186_v59 = vadd.f32 %v1185_v55, %v1184_v54  ;;  %v3392_v55 = vstv %s2473_s13  ;;  %s2461_s13 = sld [smem:[#allocation10 + $0x2]] }
 0x30f   :  { %v140_v11 = vpop.permute.xlu1 %139 }
 0x310   :  { %v961_v41 = vadd.f32 %v3323_v19, %v907_v17  ;;  %v1165_v35 = vadd.f32 %v1164_v3, %v1163_v5  ;;  %v1036_v19 = vmul.f32 %v1034_v44, %v3002_v15  ;;  %183 = vst.msk [vmem:[#allocation2 + $0x39] sm:$0xff] %vm177_vm2, %v140_v11 }
 0x311   :  { %v2570_v63 = vpop.eup %2569 }
 0x312   :  { %v714_v56 = vmul.f32 %v2570_v63, %v712_v29  ;;  %vm720_vm7 = vweird.f32 %v2570_v63 }
 0x313   :  { %v1002_v51 = vpop.permute.xlu2 %1001  ;;  %vm721_vm9 = vmor %vm719_vm8, %vm720_vm7 }
 0x314   :  { %v715_v10 = vmul.f32 %v2570_v63, %v714_v56  ;;  %v1013_v31 = vadd.f32 %v1002_v51, %v959_v16  ;;  %v820_v33 = vpop.permute.xlu0 %819 }
 0x315   :  { %v828_v24 = vadd.f32 %v820_v33, %v770_v49 }
 0x316   :  { %v1039_v6 = vadd.f32 %v1035_v23, %v1013_v31  ;;  %v716_v18 = vmul.f32 0.5, %v715_v10 }
 0x317   :  { %v882_v25 = vadd.f32 %v3321_v53, %v828_v24  ;;  %v1037_v53 = vmul.f32 %v1034_v44, %v3026_v22 }
 0x318   :  { %v717_v62 = vsub.f32 1.5, %v716_v18 }
 0x319   :  { %v908_v28 = vadd.f32 %v904_v57, %v882_v25  ;;  %v3390_v57 = vld [vmem:[#allocation2 + $0x3a] sm:$0xff] }
 0x31a   :  { %v718_v14 = vmul.f32 %v2570_v63, %v717_v62 }
 0x31b   :  { %v1006_v7 = vpop.permute.xlu2 %1005  ;;  %v962_v39 = vadd.f32 %v3325_v47, %v908_v28 }
 0x31c   :  { %v722_v60 = vsel %vm721_vm9, %v2570_v63, %v718_v14  ;;  %v1015_v20 = vadd.f32 %v1006_v7, %v961_v41  ;;  %v950_v52 = vpop.permute.xlu0 %949  ;;  %v3395_v14 = vstv %s2479_s14  ;;  %v3397_v41 = vstv %s2481_s15 }
 0x31d   :  { %2518 = vpush %v722_v60  ;;  %v960_v9 = vadd.f32 %v950_v52, %v3296_v37  ;;  %v1093_v37 = vadd.f32 %v3336_v34, %v1039_v6  ;;  %v3384_v6 = vld [vmem:[#allocation2 + $0x39] sm:$0xff]  ;;  %v3409_v52 = vmul.f32 %v3397_v41, %v3390_v57 }
 0x31e   :  { %2520 = vpush %v1165_v35  ;;  %v1041_v50 = vadd.f32 %v1037_v53, %v1015_v20  ;;  %v3401_v7 = vmul.f32 %v3392_v55, %v3384_v6  ;;  %v3405_v35 = vmul.f32 %v3395_v14, %v3390_v57 }
 0x31f   :  { %2522 = vpush %v1186_v59  ;;  %v3362_v63 = vadd.f32 %v1136_v58, %v1093_v37  ;;  %v1329_v59 = vstv %s2466_s17 }
 0x321   :  { %v1241_v34 = vmul.f32 %v3362_v63, %v3362_v63  ;;  %v1224_v58 = vsel %vm598_vm3, %v3362_v63, 0.0 }
 0x323   :  { %v1084_v2 = vpop.permute.xlu2 %1083  ;;  %v1245_v33 = vsel %vm598_vm3, %v1241_v34, 0.0 }
 0x324   :  { %v1004_v0 = vpop.permute.xlu0 %1003 }
 0x325   :  { %v1014_v12 = vadd.f32 %v1004_v0, %v960_v9 }
 0x327   :  { %v1040_v45 = vadd.f32 %v1036_v19, %v1014_v12 }
 0x329   :  { %v1094_v61 = vadd.f32 %v1084_v2, %v1040_v45 }
 0x32b   :  { %v1138_v22 = vpop.permute.xlu2 %1137 }
 0x32c   :  { %v1008_v29 = vpop.permute.xlu0 %1007  ;;  %v3360_v17 = vadd.f32 %v1138_v22, %v1094_v61 }
 0x32d   :  { %v1016_v38 = vadd.f32 %v1008_v29, %v962_v39 }
 0x32e   :  { %v1242_v47 = vmul.f32 %v3360_v17, %v3360_v17  ;;  %v1225_v48 = vsel %vm598_vm3, %v3360_v17, 0.0 }
 0x32f   :  { %v1042_v26 = vadd.f32 %v1038_v27, %v1016_v38  ;;  %v1226_v10 = vadd.f32 %v1225_v48, %v1224_v58 }
 0x330   :  { %v1246_v49 = vsel %vm598_vm3, %v1242_v47, 0.0  ;;  %v1383_v47 = vstv %s2468_s28 }
 0x331   :  { %v1247_v54 = vadd.f32 %v1246_v49, %v1245_v33  ;;  %v1517_v49 = vstv %s2474_s6 }
 0x333   :  { %v1142_v8 = vpop.permute.xlu2 %1141 }
 0x334   :  { %v1086_v43 = vpop.permute.xlu0 %1085 }
 0x335   :  { %v1095_v15 = vadd.f32 %v1086_v43, %v1041_v50 }
 0x337   :  { %v3364_v46 = vadd.f32 %v1140_v4, %v1095_v15  ;;  %v3414_v4 = vstv %s2469_s16 }
 0x339   :  { %v1243_v44 = vmul.f32 %v3364_v46, %v3364_v46  ;;  %v1227_v51 = vsel %vm598_vm3, %v3364_v46, 0.0 }
 0x33a   :  { %v1228_v24 = vadd.f32 %v1227_v51, %v1226_v10  ;;  %v1463_v10 = vstv %s2472_s9 }
 0x33b   :  { %v154_v23 = vpop.permute.xlu2 %153  ;;  %v1248_v5 = vsel %vm598_vm3, %v1243_v44, 0.0 }
 0x33c   :  { %v1088_v16 = vpop.permute.xlu0 %1087  ;;  %190 = vst.msk [vmem:[#allocation2 + $0x91] sm:$0xff] %vm177_vm2, %v154_v23  ;;  %v1249_v3 = vadd.f32 %v1248_v5, %v1247_v54 }
 0x33d   :  { %v1096_v56 = vadd.f32 %v1088_v16, %v1042_v26 }
 0x33f   :  { %v3379_v31 = vadd.f32 %v1142_v8, %v1096_v56 }
 0x341   :  { %v1229_v18 = vsel %vm598_vm3, %v3379_v31, 0.0  ;;  %v1244_v25 = vmul.f32 %v3379_v31, %v3379_v31 }
 0x342   :  { %v1230_v62 = vadd.f32 %v1229_v18, %v1228_v24 }
 0x343   :  { %v1250_v28 = vsel %vm598_vm3, %v1244_v25, 0.0  ;;  %v3412_v53 = vld [vmem:[#allocation2 + $0x90] sm:$0xff] }
 0x344   :  { %v138_v60 = vpop.permute.xlu0 %137  ;;  %1231 = vadd.xlane.f32.xlu1 %v1230_v62  ;;  %v1251_v20 = vadd.f32 %v1250_v28, %v1249_v3  ;;  %v3418_v50 = vmul.f32 %v3414_v4, %v3412_v53  ;;  %v1386_v48 = vmul.f32 %v1383_v47, %v3412_v53  ;;  %v1332_v34 = vmul.f32 %v1329_v59, %v3412_v53  ;;  %v3462_v16 = vld [vmem:[#allocation2 + $0x91] sm:$0xff] }
 0x345   :  { %182 = vst.msk [vmem:[#allocation2 + $0x31] sm:$0xff] %vm177_vm2, %v138_v60  ;;  %v1466_v33 = vmul.f32 %v1463_v10, %v3462_v16 }
 0x346   :  { %1252 = vadd.xlane.f32.xlu2 %v1251_v20 }
 0x34c   :  { %v3420_v9 = vld [vmem:[#allocation2 + $0x30] sm:$0xff]  ;;  %v156_v2 = vpop.permute.xlu0 %155  ;;  %v3430_v12 = vld [vmem:[#allocation2 + $0x38] sm:$0xff] }
 0x34d   :  { %v1330_v0 = vmul.f32 %v1329_v59, %v3420_v9  ;;  %191 = vst.msk [vmem:[#allocation2 + $0x99] sm:$0xff] %vm177_vm2, %v156_v2  ;;  %v1331_v38 = vmul.f32 %v1329_v59, %v3430_v12  ;;  %v3466_v51 = vld [vmem:[#allocation2 + $0x31] sm:$0xff]  ;;  %v1384_v18 = vmul.f32 %v1383_v47, %v3420_v9  ;;  %v1385_v2 = vmul.f32 %v1383_v47, %v3430_v12 }
 0x34e   :  { %s2519_s20 = spop %2518  ;;  %v1518_v54 = vmul.f32 %v1517_v49, %v3466_v51 }
 0x34f   :  { %s725_s22 = smul.f32 %s2519_s20, %s2440_s18  ;;  %s2521_s25 = spop %2520  ;;  %1338 = vrot.lane.b32.xlu0 %v1330_v0, %s2685_s7  ;;  %v3490_v0 = vld [vmem:[#allocation2 + $0x32] sm:$0xff] }
 0x350   :  { %s3425_s26 = smul.f32 0.001953125, %s2521_s25  ;;  %s2523_s27 = spop %2522 }
 0x351   :  { %s727_s0 = smul.f32 %s725_s22, %s3327_s30  ;;  %v729_v19 = vstv %s725_s22  ;;  %s2464_s18 = sld [smem:[#allocation8 + $0x200]] }
 0x352   :  { %s1189_s29 = smul.f32 %s3425_s26, %s3425_s26  ;;  %v730_v11 = vmul.f32 %v729_v19, %v3111_v30  ;;  %v731_v45 = vmul.f32 %v729_v19, %v3105_v42  ;;  %v732_v39 = vmul.f32 %v729_v19, %v3114_v21  ;;  %v733_v22 = vmul.f32 %v729_v19, %v3117_v32  ;;  %s2476_s20 = sld [smem:[#allocation8 + $0x206]] }
 0x353   :  { %s728_s5 = ssub.f32 %s2441_s19, %s727_s0  ;;  %s1188_s1 = smul.f32 0.001953125, %s2523_s27  ;;  %v3442_v42 = vstv %s2467_s21  ;;  %v1597_v19 = vstv %s2478_s10 }
 0x354   :  { %v3437_v27 = vld [vmem:[#allocation2 + $0x92] sm:$0xff]  ;;  %v3464_v56 = vld [vmem:[#allocation2 + $0x9a] sm:$0xff]  ;;  %s2470_s19 = sld [smem:[#allocation8 + $0x203]] }
 0x355   :  { %v734_v29 = vstv %s728_s5  ;;  %s1190_s3 = ssub.f32 %s1188_s1, %s1189_s29  ;;  %v3439_v43 = vld [vmem:[#allocation2 + $0x98] sm:$0xff]  ;;  %v3451_v21 = vmul.f32 %v3395_v14, %v3437_v27  ;;  %v3471_v5 = vmul.f32 %v3395_v14, %v3464_v56  ;;  %v3475_v24 = vmul.f32 %v3397_v41, %v3464_v56 }
 0x356   :  { %v735_v26 = vadd.f32 %v734_v29, %v730_v11  ;;  %v736_v61 = vadd.f32 %v734_v29, %v731_v45  ;;  %v737_v37 = vadd.f32 %v734_v29, %v732_v39  ;;  %v738_v15 = vadd.f32 %v734_v29, %v733_v22  ;;  %v3481_v62 = vld [vmem:[#allocation2 + $0x99] sm:$0xff]  ;;  %s2465_s21 = sld [smem:[#allocation8 + $0x280]] }
 0x357   :  { %s1191_s30 = sadd.f32 1e-05, %s1190_s3  ;;  %1340 = vrot.lane.b32.xlu0 %v1331_v38, %s2685_s7  ;;  %v3447_v30 = vmul.f32 %v3442_v42, %v3439_v43  ;;  %v1333_v8 = vmul.f32 %v1329_v59, %v3439_v43  ;;  %v1467_v60 = vmul.f32 %v1463_v10, %v3481_v62  ;;  %v1520_v59 = vmul.f32 %v1517_v49, %v3462_v16 }
 0x358   :  { %740 = vst.msk [vmem:[#allocation12 + $0x10] sm:$0xff] %vm598_vm3, %v735_v26  ;;  %v1598_v11 = vmul.f32 %v1597_v19, %v3490_v0  ;;  %v1599_v45 = vmul.f32 %v1597_v19, %v3390_v57  ;;  %v1387_v39 = vmul.f32 %v1383_v47, %v3439_v43  ;;  %v1651_v22 = vstv %s2480_s11  ;;  %s2471_s5 = sld [smem:[#allocation8 + $0x283]] }
 0x359   :  { %741 = vst.msk [vmem:[#allocation12 + $0x18] sm:$0xff] %vm598_vm3, %v736_v61  ;;  %v1192_v32 = vstv %s1191_s30  ;;  %v1652_v29 = vmul.f32 %v1651_v22, %v3490_v0  ;;  %v1653_v38 = vmul.f32 %v1651_v22, %v3390_v57  ;;  %v1464_v26 = vmul.f32 %v1463_v10, %v3466_v51  ;;  %s2475_s1 = sld [smem:[#allocation8 + $0x285]] }
 0x35a   :  { %742 = vst.msk [vmem:[#allocation12 + $0x90] sm:$0xff] %vm598_vm3, %v737_v37  ;;  %2571 = vrsqrt.f32 %v1192_v32  ;;  %vm1199_vm11 = vweird.f32 %v1192_v32  ;;  %v1654_v61 = vmul.f32 %v1651_v22, %v3437_v27  ;;  %v1655_v37 = vmul.f32 %v1651_v22, %v3464_v56  ;;  %s2462_s3 = sld [smem:[#allocation9 + $0x3]] }
 0x35b   :  { %743 = vst.msk [vmem:[#allocation12 + $0x98] sm:$0xff] %vm598_vm3, %v738_v15  ;;  %v1465_v15 = vmul.f32 %v1463_v10, %v3384_v6  ;;  %v1358_v47 = vmul.f32 %v3442_v42, %v3430_v12  ;;  %s2463_s30 = sld [smem:[#allocation10 + $0x3]] }
 0x35d   :  { %1344 = vrot.lane.b32.xlu1 %v1333_v8, %s2685_s7  ;;  %v1519_v8 = vmul.f32 %v1517_v49, %v3384_v6 }
 0x35e   :  { %1396 = vrot.lane.b32.xlu2 %v1386_v48, %s2686_s8  ;;  %v1521_v48 = vmul.f32 %v1517_v49, %v3481_v62 }
 0x35f   :  { %1342 = vrot.lane.b32.xlu0 %v1332_v34, %s2685_s7  ;;  %v1359_v34 = vmul.f32 %v3442_v42, %v3412_v53 }
 0x360   :  { %v2572_v44 = vpop.eup %2571 }
 0x361   :  { %v1194_v58 = vmul.f32 %v2572_v44, %v1192_v32  ;;  %vm1200_vm10 = vweird.f32 %v2572_v44  ;;  %v1357_v32 = vmul.f32 %v3442_v42, %v3420_v9 }
 0x362   :  { %vm1201_vm12 = vmor %vm1199_vm11, %vm1200_vm10 }
 0x363   :  { %v1195_v23 = vmul.f32 %v2572_v44, %v1194_v58 }
 0x365   :  { %1476 = vrot.lane.b32.xlu1 %v1466_v33, %s2685_s7  ;;  %v1196_v25 = vmul.f32 0.5, %v1195_v23 }
 0x366   :  { %1526 = vrot.lane.b32.xlu2 %v1518_v54, %s2686_s8  ;;  %v1411_v54 = vmul.f32 %v3414_v4, %v3420_v9 }
 0x367   :  { %1392 = vrot.lane.b32.xlu0 %v1384_v18, %s2686_s8  ;;  %v1197_v3 = vsub.f32 1.5, %v1196_v25 }
 0x369   :  { %v1198_v28 = vmul.f32 %v2572_v44, %v1197_v3 }
 0x36b   :  { %v1202_v20 = vsel %vm1201_vm12, %v2572_v44, %v1198_v28  ;;  %v1600_v44 = vmul.f32 %v1597_v19, %v3437_v27  ;;  %v1601_v28 = vmul.f32 %v1597_v19, %v3464_v56 }
 0x36c   :  { %2524 = vpush %v1202_v20 }
 0x36d   :  { %1478 = vrot.lane.b32.xlu1 %v1467_v60, %s2685_s7 }
 0x36e   :  { %1530 = vrot.lane.b32.xlu2 %v1520_v59, %s2686_s8 }
 0x36f   :  { %1394 = vrot.lane.b32.xlu0 %v1385_v2, %s2686_s8 }
 0x375   :  { %1606 = vrot.lane.b32.xlu1 %v1598_v11, %s2685_s7 }
 0x376   :  { %1608 = vrot.lane.b32.xlu2 %v1599_v45, %s2685_s7  ;;  %v1491_v45 = vmul.f32 %v3392_v55, %v3466_v51 }
 0x377   :  { %1398 = vrot.lane.b32.xlu0 %v1387_v39, %s2686_s8  ;;  %v1306_v39 = vstv %s2464_s18 }
 0x37d   :  { %1660 = vrot.lane.b32.xlu1 %v1652_v29, %s2686_s8 }
 0x37e   :  { %1662 = vrot.lane.b32.xlu2 %v1653_v38, %s2686_s8 }
 0x37f   :  { %1472 = vrot.lane.b32.xlu0 %v1464_v26, %s2685_s7 }
 0x385   :  { %1664 = vrot.lane.b32.xlu1 %v1654_v61, %s2686_s8 }
 0x386   :  { %1666 = vrot.lane.b32.xlu2 %v1655_v37, %s2686_s8 }
 0x387   :  { %1474 = vrot.lane.b32.xlu0 %v1465_v15, %s2685_s7 }
 0x38e   :  { %1365 = vrot.lane.b32.xlu2 %v1357_v32, %s2685_s7 }
 0x38f   :  { %1528 = vrot.lane.b32.xlu0 %v1519_v8, %s2686_s8 }
 0x396   :  { %1367 = vrot.lane.b32.xlu2 %v1358_v47, %s2685_s7  ;;  %v1493_v47 = vmul.f32 %v3392_v55, %v3462_v16 }
 0x397   :  { %1532 = vrot.lane.b32.xlu0 %v1521_v48, %s2686_s8 }
 0x39d   :  { %s2525_s14 = spop %2524 }
 0x39e   :  { %s1205_s15 = smul.f32 %s2525_s14, %s2460_s12  ;;  %1369 = vrot.lane.b32.xlu2 %v1359_v34, %s2685_s7  ;;  %v1308_v34 = vmul.f32 %v1306_v39, %v3430_v12  ;;  %s2501_s12 = sld [smem:[#allocation8 + $0x387]] }
 0x39f   :  { %1610 = vrot.lane.b32.xlu0 %v1600_v44, %s2685_s7 }
 0x3a0   :  { %s1207_s16 = smul.f32 %s1205_s15, %s3425_s26  ;;  %v1209_v58 = vstv %s1205_s15 }
 0x3a1   :  { %v1210_v49 = vmul.f32 %v1209_v58, %v3236_v40  ;;  %v1211_v10 = vmul.f32 %v1209_v58, %v3238_v1  ;;  %v1212_v23 = vmul.f32 %v1209_v58, %v3249_v13  ;;  %v1213_v33 = vmul.f32 %v1209_v58, %v3253_v36 }
 0x3a2   :  { %s1208_s17 = ssub.f32 %s2461_s13, %s1207_s16  ;;  %v1412_v40 = vmul.f32 %v3414_v4, %v3430_v12  ;;  %v1414_v1 = vmul.f32 %v3414_v4, %v3439_v43  ;;  %v1307_v4 = vmul.f32 %v1306_v39, %v3420_v9 }
 0x3a3   :  { %s2488_s16 = sld [smem:[#allocation8 + $0x301]] }
 0x3a4   :  { %v1214_v42 = vstv %s1208_s17 }
 0x3a5   :  { %v1215_v18 = vadd.f32 %v1214_v42, %v1210_v49  ;;  %v1216_v25 = vadd.f32 %v1214_v42, %v1211_v10  ;;  %v1217_v3 = vadd.f32 %v1214_v42, %v1212_v23  ;;  %v1218_v60 = vadd.f32 %v1214_v42, %v1213_v33 }
 0x3a6   :  { %1419 = vrot.lane.b32.xlu2 %v1411_v54, %s2686_s8  ;;  %v1494_v10 = vmul.f32 %v3392_v55, %v3481_v62  ;;  %v1309_v33 = vmul.f32 %v1306_v39, %v3412_v53 }
 0x3a7   :  { %1220 = vst.msk [vmem:[#allocation12 + $0x20] sm:$0xff] %vm598_vm3, %v1215_v18  ;;  %1612 = vrot.lane.b32.xlu0 %v1601_v28, %s2685_s7  ;;  %v1625_v28 = vmul.f32 %v3395_v14, %v3490_v0  ;;  %v1679_v14 = vmul.f32 %v3397_v41, %v3490_v0 }
 0x3a8   :  { %1221 = vst.msk [vmem:[#allocation12 + $0x28] sm:$0xff] %vm598_vm3, %v1216_v25  ;;  %v1441_v25 = vstv %s2470_s19 }
 0x3a9   :  { %1222 = vst.msk [vmem:[#allocation12 + $0xa0] sm:$0xff] %vm598_vm3, %v1217_v3 }
 0x3aa   :  { %1223 = vst.msk [vmem:[#allocation12 + $0xa8] sm:$0xff] %vm598_vm3, %v1218_v60  ;;  %v1444_v60 = vmul.f32 %v1441_v25, %v3462_v16 }
 0x3ae   :  { %1421 = vrot.lane.b32.xlu2 %v1412_v40, %s2686_s8 }
 0x3b6   :  { %1425 = vrot.lane.b32.xlu2 %v1414_v1, %s2686_s8 }
 0x3b7   :  { %v1232_v13 = vpop.xlane.xlu1 %1231 }
 0x3b8   :  { %v1233_v36 = vrot.slane %v1232_v13, 4 }
 0x3b9   :  { %v1253_v20 = vpop.xlane.xlu2 %1252 }
 0x3ba   :  { %v1234_v59 = vadd.f32 %v1233_v36, %v1232_v13  ;;  %v1254_v2 = vrot.slane %v1253_v20, 4 }
 0x3bc   :  { %v1235_v19 = vrot.slane %v1234_v59, 2  ;;  %v1255_v11 = vadd.f32 %v1254_v2, %v1253_v20  ;;  %v3563_v20 = vstv %s2476_s20  ;;  %s2497_s20 = sld [smem:[#allocation8 + $0x385]] }
 0x3be   :  { %v1256_v22 = vrot.slane %v1255_v11, 2  ;;  %1499 = vrot.lane.b32.xlu2 %v1491_v45, %s2685_s7  ;;  %v1236_v29 = vadd.f32 %v1235_v19, %v1234_v59  ;;  %v1442_v19 = vmul.f32 %v1441_v25, %v3466_v51 }
 0x3c0   :  { %v1237_v38 = vrot.slane %v1236_v29, 1  ;;  %v1257_v26 = vadd.f32 %v1256_v22, %v1255_v11  ;;  %v1578_v11 = vmul.f32 %v3563_v20, %v3437_v27 }
 0x3c1   :  { %v1339_v61 = vpop.permute.xlu0 %1338  ;;  %v1397_v37 = vpop.permute.xlu2 %1396 }
 0x3c2   :  { %v1350_v15 = vadd.f32 %v1339_v61, %v1307_v4  ;;  %v1238_v32 = vadd.f32 %v1237_v38, %v1236_v29  ;;  %v1258_v8 = vrot.slane %v1257_v26, 1  ;;  %v1681_v61 = vmul.f32 %v3397_v41, %v3437_v27 }
 0x3c4   :  { %2526 = vpush %v1238_v32  ;;  %v1259_v48 = vadd.f32 %v1258_v8, %v1257_v26  ;;  %v1443_v26 = vmul.f32 %v1441_v25, %v3384_v6 }
 0x3c6   :  { %1503 = vrot.lane.b32.xlu2 %v1493_v47, %s2685_s7  ;;  %2528 = vpush %v1259_v48  ;;  %v1445_v48 = vmul.f32 %v1441_v25, %v3481_v62 }
 0x3c9   :  { %v1527_v44 = vpop.permute.xlu2 %1526  ;;  %v1341_v58 = vpop.permute.xlu0 %1340 }
 0x3ca   :  { %v1351_v49 = vadd.f32 %v1341_v58, %v1308_v34 }
 0x3ce   :  { %1505 = vrot.lane.b32.xlu2 %v1494_v10, %s2685_s7 }
 0x3cf   :  { %v1345_v23 = vpop.permute.xlu1 %1344 }
 0x3d1   :  { %v1531_v42 = vpop.permute.xlu2 %1530  ;;  %v1343_v54 = vpop.permute.xlu0 %1342 }
 0x3d2   :  { %v1352_v18 = vadd.f32 %v1343_v54, %v1309_v33 }
 0x3d4   :  { %v1406_v3 = vadd.f32 %v1397_v37, %v1352_v18 }
 0x3d6   :  { %1633 = vrot.lane.b32.xlu2 %v1625_v28, %s2685_s7  ;;  %v1448_v40 = vadd.f32 %v1444_v60, %v1406_v3 }
 0x3d7   :  { %v1477_v55 = vpop.permute.xlu1 %1476 }
 0x3d8   :  { %v1486_v1 = vadd.f32 %v1477_v55, %v1448_v40 }
 0x3d9   :  { %v3561_v13 = vpop.permute.xlu2 %1608  ;;  %v1393_v36 = vpop.permute.xlu0 %1392 }
 0x3da   :  { %v1540_v59 = vadd.f32 %v1531_v42, %v1486_v1  ;;  %v1404_v2 = vadd.f32 %v1393_v36, %v1350_v15  ;;  %v1310_v15 = vmul.f32 %v1306_v39, %v3439_v43 }
 0x3dc   :  { %v1446_v45 = vadd.f32 %v1442_v19, %v1404_v2  ;;  %v3570_v22 = vadd.f32 %v1578_v11, %v1540_v59  ;;  %v1353_v32 = vadd.f32 %v1345_v23, %v1310_v15  ;;  %v1576_v23 = vmul.f32 %v3563_v20, %v3490_v0 }
 0x3de   :  { %1687 = vrot.lane.b32.xlu2 %v1679_v14, %s2686_s8 }
 0x3df   :  { %v1479_v39 = vpop.permute.xlu1 %1478 }
 0x3e1   :  { %v3573_v29 = vpop.permute.xlu2 %1662  ;;  %v1395_v4 = vpop.permute.xlu0 %1394 }
 0x3e2   :  { %v1405_v38 = vadd.f32 %v1395_v4, %v1351_v49  ;;  %v3583_v49 = vstv %s2465_s21  ;;  %v3601_v4 = vstv %s2471_s5  ;;  %s2502_s5 = sld [smem:[#allocation8 + $0x308]] }
 0x3e3   :  { %v1319_v10 = vmul.f32 %v3583_v49, %v3420_v9  ;;  %v1320_v9 = vmul.f32 %v3583_v49, %v3430_v12  ;;  %v1321_v1 = vmul.f32 %v3583_v49, %v3412_v53  ;;  %v1577_v12 = vmul.f32 %v3563_v20, %v3390_v57 }
 0x3e4   :  { %v1447_v37 = vadd.f32 %v1443_v26, %v1405_v38 }
 0x3e6   :  { %1691 = vrot.lane.b32.xlu2 %v1681_v61, %s2686_s8 }
 0x3e7   :  { %v1607_v40 = vpop.permute.xlu1 %1606 }
 0x3e9   :  { %v3580_v8 = vpop.permute.xlu2 %1666  ;;  %v1399_v47 = vpop.permute.xlu0 %1398 }
 0x3ea   :  { %v1407_v34 = vadd.f32 %v1399_v47, %v1353_v32  ;;  %v1579_v47 = vmul.f32 %v3563_v20, %v3464_v56 }
 0x3ec   :  { %v1449_v58 = vadd.f32 %v1445_v48, %v1407_v34  ;;  %v1453_v48 = vmul.f32 %v3601_v4, %v3466_v51 }
 0x3ee   :  { %v1487_v26 = vadd.f32 %v1479_v39, %v1449_v58 }
 0x3ef   :  { %v1661_v38 = vpop.permute.xlu1 %1660 }
 0x3f1   :  { %v1366_v41 = vpop.permute.xlu2 %1365  ;;  %v1473_v33 = vpop.permute.xlu0 %1472 }
 0x3f2   :  { %v1377_v42 = vadd.f32 %v1366_v41, %v1319_v10  ;;  %v1484_v54 = vadd.f32 %v1473_v33, %v1446_v45 }
 0x3f4   :  { %v1538_v18 = vadd.f32 %v1527_v44, %v1484_v54 }
 0x3f5   :  { %s2527_s22 = spop %2526 }
 0x3f6   :  { %v1580_v3 = vadd.f32 %v1576_v23, %v1538_v18  ;;  %s3589_s25 = smul.f32 0.001953125, %s2527_s22  ;;  %s2489_s22 = sld [smem:[#allocation8 + $0x381]] }
 0x3f7   :  { %s2529_s26 = spop %2528 }
 0x3f8   :  { %s1262_s27 = smul.f32 %s3589_s25, %s3589_s25  ;;  %v1618_v39 = vadd.f32 %v1607_v40, %v1580_v3 }
 0x3f9   :  { %s1261_s0 = smul.f32 0.001953125, %s2529_s26  ;;  %v1368_v25 = vpop.permute.xlu2 %1367  ;;  %v1475_v28 = vpop.permute.xlu0 %1474  ;;  %s2495_s26 = sld [smem:[#allocation8 + $0x384]] }
 0x3fa   :  { %v1378_v60 = vadd.f32 %v1368_v25, %v1320_v9  ;;  %v1485_v44 = vadd.f32 %v1475_v28, %v1447_v37  ;;  %v1454_v28 = vmul.f32 %v3601_v4, %v3384_v6 }
 0x3fb   :  { %s1263_s28 = ssub.f32 %s1261_s0, %s1262_s27 }
 0x3fc   :  { %s2490_s27 = sld [smem:[#allocation8 + $0x302]] }
 0x3fd   :  { %s1264_s29 = sadd.f32 1e-05, %s1263_s28 }
 0x3fe   :  { %s2496_s0 = sld [smem:[#allocation8 + $0x305]] }
 0x3ff   :  { %v1265_v55 = vstv %s1264_s29  ;;  %s2494_s28 = sld [smem:[#allocation8 + $0x304]] }
 0x400   :  { %2573 = vrsqrt.f32 %v1265_v55  ;;  %vm1272_vm14 = vweird.f32 %v1265_v55  ;;  %s2500_s29 = sld [smem:[#allocation8 + $0x307]] }
 0x401   :  { %v1370_v36 = vpop.permute.xlu2 %1369  ;;  %v1529_v59 = vpop.permute.xlu0 %1528 }
 0x402   :  { %v3597_v2 = vadd.f32 %v1370_v36, %v1321_v1  ;;  %v1539_v19 = vadd.f32 %v1529_v59, %v1485_v44  ;;  %v1665_v44 = vpop.permute.xlu1 %1664  ;;  %v3616_v1 = vadd.f32 %v1661_v38, %v1618_v39 }
 0x404   :  { %v1581_v11 = vadd.f32 %v1577_v12, %v1539_v19  ;;  %v1703_v59 = vsel %vm598_vm3, %v3616_v1, 0.0 }
 0x406   :  { %v2574_v14 = vpop.eup %2573  ;;  %v1619_v54 = vadd.f32 %v3561_v13, %v1581_v11 }
 0x407   :  { %v1267_v45 = vmul.f32 %v2574_v14, %v1265_v55  ;;  %vm1273_vm13 = vweird.f32 %v2574_v14 }
 0x408   :  { %vm1274_vm15 = vmor %vm1272_vm14, %vm1273_vm13  ;;  %v3611_v20 = vadd.f32 %v3573_v29, %v1619_v54 }
 0x409   :  { %v1268_v61 = vmul.f32 %v2574_v14, %v1267_v45  ;;  %v1420_v37 = vpop.permute.xlu2 %1419  ;;  %v1533_v15 = vpop.permute.xlu0 %1532 }
 0x40a   :  { %v1431_v32 = vadd.f32 %v1420_v37, %v1377_v42  ;;  %v1541_v53 = vadd.f32 %v1533_v15, %v1487_v26  ;;  %v1721_v40 = vmul.f32 %v3611_v20, %v3611_v20  ;;  %v1704_v29 = vsel %vm598_vm3, %v3611_v20, 0.0 }
 0x40b   :  { %v1269_v34 = vmul.f32 0.5, %v1268_v61  ;;  %v1705_v11 = vadd.f32 %v1704_v29, %v1703_v59 }
 0x40c   :  { %v1583_v10 = vadd.f32 %v1579_v47, %v1541_v53  ;;  %v3607_v41 = vadd.f32 %v1453_v48, %v1431_v32  ;;  %v1725_v19 = vsel %vm598_vm3, %v1721_v40, 0.0  ;;  %v1544_v48 = vstv %s2475_s1  ;;  %s2482_s1 = sld [smem:[#allocation9 + $0x4]] }
 0x40d   :  { %v1270_v33 = vsub.f32 1.5, %v1269_v34  ;;  %v1546_v34 = vmul.f32 %v1544_v48, %v3384_v6 }
 0x40f   :  { %v1271_v58 = vmul.f32 %v2574_v14, %v1270_v33 }
 0x411   :  { %v1422_v42 = vpop.permute.xlu2 %1421  ;;  %v1611_v23 = vpop.permute.xlu0 %1610  ;;  %v1275_v18 = vsel %vm1274_vm15, %v2574_v14, %v1271_v58  ;;  %v1548_v58 = vmul.f32 %v1544_v48, %v3481_v62 }
 0x412   :  { %v1432_v9 = vadd.f32 %v1422_v42, %v1378_v60  ;;  %v1620_v25 = vadd.f32 %v1611_v23, %v3570_v22  ;;  %2530 = vpush %v1275_v18  ;;  %v1720_v22 = vmul.f32 %v3616_v1, %v3616_v1  ;;  %v1547_v23 = vmul.f32 %v1544_v48, %v3462_v16 }
 0x414   :  { %v3618_v13 = vadd.f32 %v1665_v44, %v1620_v25  ;;  %v3620_v3 = vadd.f32 %v1454_v28, %v1432_v9  ;;  %v1724_v45 = vsel %vm598_vm3, %v1720_v22, 0.0 }
 0x415   :  { %v1726_v61 = vadd.f32 %v1725_v19, %v1724_v45  ;;  %v1322_v45 = vmul.f32 %v3583_v49, %v3439_v43 }
 0x416   :  { %v1722_v60 = vmul.f32 %v3618_v13, %v3618_v13  ;;  %v1706_v12 = vsel %vm598_vm3, %v3618_v13, 0.0 }
 0x417   :  { %v1707_v26 = vadd.f32 %v1706_v12, %v1705_v11 }
 0x418   :  { %v1727_v38 = vsel %vm598_vm3, %v1722_v60, 0.0 }
 0x419   :  { %v1613_v55 = vpop.permute.xlu0 %1612  ;;  %v1728_v53 = vadd.f32 %v1727_v38, %v1726_v61 }
 0x41a   :  { %v1621_v36 = vadd.f32 %v1613_v55, %v1583_v10  ;;  %v1545_v10 = vmul.f32 %v1544_v48, %v3466_v51 }
 0x41c   :  { %v3636_v14 = vadd.f32 %v3580_v8, %v1621_v36 }
 0x41e   :  { %v1708_v37 = vsel %vm598_vm3, %v3636_v14, 0.0  ;;  %v1723_v15 = vmul.f32 %v3636_v14, %v3636_v14 }
 0x41f   :  { %v1709_v32 = vadd.f32 %v1708_v37, %v1707_v26  ;;  %v1456_v37 = vmul.f32 %v3601_v4, %v3481_v62 }
 0x420   :  { %v1729_v47 = vsel %vm598_vm3, %v1723_v15, 0.0 }
 0x421   :  { %1710 = vadd.xlane.f32.xlu0 %v1709_v32  ;;  %v1730_v8 = vadd.f32 %v1729_v47, %v1728_v53  ;;  %v1455_v53 = vmul.f32 %v3601_v4, %v3462_v16 }
 0x423   :  { %1731 = vadd.xlane.f32.xlu1 %v1730_v8 }
 0x435   :  { %1371 = vrot.lane.b32.xlu0 %v3447_v30, %s2685_s7 }
 0x43c   :  { %1423 = vrot.lane.b32.xlu1 %v3418_v50, %s2686_s8 }
 0x43d   :  { %1501 = vrot.lane.b32.xlu0 %v3401_v7, %s2685_s7 }
 0x443   :  { %s2531_s6 = spop %2530 }
 0x444   :  { %s1278_s9 = smul.f32 %s2531_s6, %s2462_s3  ;;  %1555 = vrot.lane.b32.xlu1 %v1546_v34, %s2686_s8  ;;  %s2483_s3 = sld [smem:[#allocation10 + $0x4]] }
 0x445   :  { %1553 = vrot.lane.b32.xlu0 %v1545_v10, %s2686_s8 }
 0x446   :  { %s1280_s10 = smul.f32 %s1278_s9, %s3589_s25  ;;  %v1282_v30 = vstv %s1278_s9  ;;  %s2491_s25 = sld [smem:[#allocation8 + $0x382]] }
 0x447   :  { %v1283_v50 = vmul.f32 %v1282_v30, %v3362_v63  ;;  %v1284_v33 = vmul.f32 %v1282_v30, %v3360_v17  ;;  %v1285_v7 = vmul.f32 %v1282_v30, %v3364_v46  ;;  %v1286_v54 = vmul.f32 %v1282_v30, %v3379_v31  ;;  %v104_v17 = vld [vmem:[#allocation3 + $0x38] sm:$0xff]  ;;  %v103_v63 = vld [vmem:[#allocation3 + $0x30] sm:$0xff] }
 0x448   :  { %s1281_s11 = ssub.f32 %s2463_s30, %s1280_s10  ;;  %143 = vrot.lane.b32.xlu2 %v104_v17, %s2683_s2  ;;  %v112_v46 = vld [vmem:[#allocation3 + $0x78] sm:$0xff]  ;;  %v111_v31 = vld [vmem:[#allocation3 + $0x70] sm:$0xff] }
 0x44a   :  { %v1287_v6 = vstv %s1281_s11  ;;  %s2486_s11 = sld [smem:[#allocation8 + $0x300]] }
 0x44b   :  { %v1288_v51 = vadd.f32 %v1287_v6, %v1283_v50  ;;  %v1289_v39 = vadd.f32 %v1287_v6, %v1284_v33  ;;  %v1290_v42 = vadd.f32 %v1287_v6, %v1285_v7  ;;  %v1291_v18 = vadd.f32 %v1287_v6, %v1286_v54 }
 0x44c   :  { %1559 = vrot.lane.b32.xlu1 %v1548_v58, %s2686_s8 }
 0x44d   :  { %1293 = vst.msk [vmem:[#allocation12 + $0x30] sm:$0xff] %vm598_vm3, %v1288_v51  ;;  %1557 = vrot.lane.b32.xlu0 %v1547_v23, %s2686_s8 }
 0x44e   :  { %1294 = vst.msk [vmem:[#allocation12 + $0x38] sm:$0xff] %vm598_vm3, %v1289_v39 }
 0x44f   :  { %1295 = vst.msk [vmem:[#allocation12 + $0xb0] sm:$0xff] %vm598_vm3, %v1290_v42 }
 0x450   :  { %1296 = vst.msk [vmem:[#allocation12 + $0xb8] sm:$0xff] %vm598_vm3, %v1291_v18 }
 0x454   :  { %1637 = vrot.lane.b32.xlu1 %v3451_v21, %s2685_s7  ;;  %v1426_v21 = vpop.permute.xlu2 %1425 }
 0x455   :  { %1635 = vrot.lane.b32.xlu0 %v3405_v35, %s2685_s7 }
 0x45c   :  { %1639 = vrot.lane.b32.xlu1 %v3471_v5, %s2685_s7  ;;  %v1500_v35 = vpop.permute.xlu2 %1499 }
 0x45d   :  { %1689 = vrot.lane.b32.xlu0 %v3409_v52, %s2686_s8  ;;  %v1511_v49 = vadd.f32 %v1500_v35, %v3607_v41 }
 0x464   :  { %141 = vrot.lane.b32.xlu1 %v103_v63, %s2683_s2  ;;  %v1504_v9 = vpop.permute.xlu2 %1503 }
 0x465   :  { %1693 = vrot.lane.b32.xlu0 %v3475_v24, %s2686_s8 }
 0x46c   :  { %159 = vrot.lane.b32.xlu1 %v112_v46, %s2683_s2  ;;  %v1506_v55 = vpop.permute.xlu2 %1505 }
 0x46d   :  { %157 = vrot.lane.b32.xlu0 %v111_v31, %s2683_s2  ;;  %s2477_s2 = sld [smem:[#allocation8 + $0x286]] }
 0x473   :  { %v1586_v43 = vstv %s2477_s2  ;;  %s2492_s2 = sld [smem:[#allocation8 + $0x303]] }
 0x474   :  { %v1634_v11 = vpop.permute.xlu2 %1633  ;;  %v1588_v62 = vmul.f32 %v1586_v43, %v3390_v57  ;;  %v1587_v7 = vmul.f32 %v1586_v43, %v3490_v0  ;;  %v1589_v41 = vmul.f32 %v1586_v43, %v3437_v27 }
 0x47c   :  { %v1688_v48 = vpop.permute.xlu2 %1687 }
 0x484   :  { %v1692_v16 = vpop.permute.xlu2 %1691 }
 0x494   :  { %v1711_v25 = vpop.xlane.xlu0 %1710 }
 0x495   :  { %v1712_v5 = vrot.slane %v1711_v25, 4 }
 0x496   :  { %v1732_v28 = vpop.xlane.xlu1 %1731 }
 0x497   :  { %v1713_v44 = vadd.f32 %v1712_v5, %v1711_v25  ;;  %v1733_v52 = vrot.slane %v1732_v28, 4 }
 0x499   :  { %v1714_v40 = vrot.slane %v1713_v44, 2  ;;  %v1734_v29 = vadd.f32 %v1733_v52, %v1732_v28 }
 0x49b   :  { %v1735_v22 = vrot.slane %v1734_v29, 2  ;;  %v1715_v60 = vadd.f32 %v1714_v40, %v1713_v44 }
 0x49d   :  { %v1716_v24 = vrot.slane %v1715_v60, 1  ;;  %v1736_v36 = vadd.f32 %v1735_v22, %v1734_v29 }
 0x49f   :  { %v1717_v59 = vadd.f32 %v1716_v24, %v1715_v60  ;;  %v1737_v12 = vrot.slane %v1736_v36, 1  ;;  %v3717_v60 = vstv %s2501_s12  ;;  %s2498_s12 = sld [smem:[#allocation8 + $0x306]] }
 0x4a1   :  { %2532 = vpush %v1717_v59  ;;  %v1738_v19 = vadd.f32 %v1737_v12, %v1736_v36 }
 0x4a2   :  { %v144_v63 = vpop.permute.xlu2 %143 }
 0x4a3   :  { %2534 = vpush %v1738_v19 }
 0x4a4   :  { %185 = vst.msk [vmem:[#allocation2 + $0x51] sm:$0xff] %vm177_vm2, %v144_v63  ;;  %v3771_v63 = vstv %s2495_s26  ;;  %s2485_s26 = sld [smem:[#allocation10 + $0x5]] }
 0x4a7   :  { %v1372_v38 = vpop.permute.xlu0 %1371 }
 0x4a8   :  { %v1380_v26 = vadd.f32 %v1372_v38, %v1322_v45 }
 0x4aa   :  { %v1434_v61 = vadd.f32 %v1426_v21, %v1380_v26 }
 0x4ab   :  { %v3710_v52 = vld [vmem:[#allocation2 + $0x52] sm:$0xff] }
 0x4ac   :  { %v1460_v15 = vadd.f32 %v1456_v37, %v1434_v61  ;;  %v3724_v12 = vmul.f32 %v3717_v60, %v3710_v52 }
 0x4ae   :  { %v1424_v32 = vpop.permute.xlu1 %1423 }
 0x4af   :  { %v1433_v47 = vadd.f32 %v1424_v32, %v3597_v2  ;;  %v1502_v8 = vpop.permute.xlu0 %1501  ;;  %v1514_v2 = vadd.f32 %v1506_v55, %v1460_v15 }
 0x4b0   :  { %v1512_v10 = vadd.f32 %v1502_v8, %v3620_v3  ;;  %v1590_v3 = vmul.f32 %v1586_v43, %v3464_v56 }
 0x4b1   :  { %v1459_v34 = vadd.f32 %v1455_v53, %v1433_v47 }
 0x4b3   :  { %v1513_v51 = vadd.f32 %v1504_v9, %v1459_v34 }
 0x4b6   :  { %v1556_v30 = vpop.permute.xlu1 %1555 }
 0x4b7   :  { %v1566_v50 = vadd.f32 %v1556_v30, %v1512_v10  ;;  %v1554_v33 = vpop.permute.xlu0 %1553 }
 0x4b8   :  { %v1565_v54 = vadd.f32 %v1554_v33, %v1511_v49  ;;  %v3745_v33 = vstv %s2497_s20 }
 0x4b9   :  { %v1592_v6 = vadd.f32 %v1588_v62, %v1566_v50 }
 0x4ba   :  { %v1591_v4 = vadd.f32 %v1587_v7, %v1565_v54 }
 0x4bc   :  { %v1645_v46 = vadd.f32 %v1634_v11, %v1591_v4 }
 0x4be   :  { %v1560_v58 = vpop.permute.xlu1 %1559  ;;  %v3696_v31 = vadd.f32 %v1688_v48, %v1645_v46  ;;  %v1881_v48 = vstv %s2488_s16 }
 0x4bf   :  { %v1568_v39 = vadd.f32 %v1560_v58, %v1514_v2  ;;  %v1558_v42 = vpop.permute.xlu0 %1557 }
 0x4c0   :  { %v1567_v23 = vadd.f32 %v1558_v42, %v1513_v51  ;;  %v1793_v44 = vmul.f32 %v3696_v31, %v3696_v31  ;;  %v1776_v40 = vsel %vm598_vm3, %v3696_v31, 0.0 }
 0x4c1   :  { %v1594_v18 = vadd.f32 %v1590_v3, %v1568_v39 }
 0x4c2   :  { %v1593_v17 = vadd.f32 %v1589_v41, %v1567_v23  ;;  %v1797_v59 = vsel %vm598_vm3, %v1793_v44, 0.0  ;;  %v3767_v41 = vstv %s2489_s22  ;;  %v2069_v44 = vstv %s2496_s0  ;;  %s2499_s22 = sld [smem:[#allocation8 + $0x386]] }
 0x4c6   :  { %v1638_v57 = vpop.permute.xlu1 %1637 }
 0x4c7   :  { %v1636_v0 = vpop.permute.xlu0 %1635  ;;  %v1647_v21 = vadd.f32 %v1638_v57, %v1593_v17 }
 0x4c8   :  { %v1646_v35 = vadd.f32 %v1636_v0, %v1592_v6 }
 0x4c9   :  { %v3700_v56 = vadd.f32 %v1692_v16, %v1647_v21 }
 0x4cb   :  { %v1795_v55 = vmul.f32 %v3700_v56, %v3700_v56  ;;  %v1779_v38 = vsel %vm598_vm3, %v3700_v56, 0.0 }
 0x4cd   :  { %v1800_v15 = vsel %vm598_vm3, %v1795_v55, 0.0 }
 0x4ce   :  { %v1640_v9 = vpop.permute.xlu1 %1639 }
 0x4cf   :  { %v1690_v25 = vpop.permute.xlu0 %1689  ;;  %v1648_v24 = vadd.f32 %v1640_v9, %v1594_v18  ;;  %v3769_v18 = vstv %s2491_s25  ;;  %s2484_s25 = sld [smem:[#allocation9 + $0x5]] }
 0x4d0   :  { %v3698_v5 = vadd.f32 %v1690_v25, %v1646_v35  ;;  %v1935_v25 = vstv %s2490_s27 }
 0x4d2   :  { %v1777_v27 = vsel %vm598_vm3, %v3698_v5, 0.0  ;;  %v1794_v28 = vmul.f32 %v3698_v5, %v3698_v5  ;;  %s2533_s13 = spop %2532 }
 0x4d3   :  { %s3708_s14 = smul.f32 0.001953125, %s2533_s13  ;;  %v1778_v22 = vadd.f32 %v1777_v27, %v1776_v40  ;;  %s2487_s13 = sld [smem:[#allocation8 + $0x380]] }
 0x4d4   :  { %v1798_v29 = vsel %vm598_vm3, %v1794_v28, 0.0  ;;  %s2535_s15 = spop %2534 }
 0x4d5   :  { %s1741_s17 = smul.f32 %s3708_s14, %s3708_s14  ;;  %v1799_v11 = vadd.f32 %v1798_v29, %v1797_v59  ;;  %v1780_v26 = vadd.f32 %v1779_v38, %v1778_v22  ;;  %v2015_v22 = vstv %s2494_s28 }
 0x4d6   :  { %s1740_s18 = smul.f32 0.001953125, %s2535_s15  ;;  %v142_v36 = vpop.permute.xlu1 %141 }
 0x4d7   :  { %184 = vst.msk [vmem:[#allocation2 + $0x49] sm:$0xff] %vm177_vm2, %v142_v36  ;;  %v1694_v19 = vpop.permute.xlu0 %1693  ;;  %v1801_v53 = vadd.f32 %v1800_v15, %v1799_v11 }
 0x4d8   :  { %s1742_s19 = ssub.f32 %s1740_s18, %s1741_s17  ;;  %v3727_v45 = vadd.f32 %v1694_v19, %v1648_v24 }
 0x4da   :  { %s1743_s21 = sadd.f32 1e-05, %s1742_s19  ;;  %v1796_v61 = vmul.f32 %v3727_v45, %v3727_v45  ;;  %v1781_v37 = vsel %vm598_vm3, %v3727_v45, 0.0 }
 0x4db   :  { %v1782_v32 = vadd.f32 %v1781_v37, %v1780_v26  ;;  %v2149_v26 = vstv %s2500_s29  ;;  %s2503_s29 = sld [smem:[#allocation8 + $0x388]] }
 0x4dc   :  { %v1744_v47 = vstv %s1743_s21  ;;  %v1802_v8 = vsel %vm598_vm3, %v1796_v61, 0.0  ;;  %v2151_v61 = vmul.f32 %v2149_v26, %v3710_v52  ;;  %s2493_s21 = sld [smem:[#allocation8 + $0x383]] }
 0x4dd   :  { %2575 = vrsqrt.f32 %v1744_v47  ;;  %1783 = vadd.xlane.f32.xlu2 %v1782_v32  ;;  %v1803_v34 = vadd.f32 %v1802_v8, %v1801_v53  ;;  %vm1751_vm1 = vweird.f32 %v1744_v47  ;;  %v2203_v32 = vstv %s2502_s5  ;;  %v3824_v8 = vld [vmem:[#allocation2 + $0x51] sm:$0xff] }
 0x4de   :  { %v3737_v10 = vld [vmem:[#allocation2 + $0x48] sm:$0xff]  ;;  %v160_v43 = vpop.permute.xlu1 %159  ;;  %v3749_v6 = vld [vmem:[#allocation2 + $0x50] sm:$0xff]  ;;  %v2205_v53 = vmul.f32 %v2203_v32, %v3710_v52 }
 0x4df   :  { %1804 = vadd.xlane.f32.xlu0 %v1803_v34  ;;  %v1882_v49 = vmul.f32 %v1881_v48, %v3737_v10  ;;  %193 = vst.msk [vmem:[#allocation2 + $0xb1] sm:$0xff] %vm177_vm2, %v160_v43  ;;  %v158_v30 = vpop.permute.xlu0 %157  ;;  %v3743_v50 = vld [vmem:[#allocation2 + $0x49] sm:$0xff]  ;;  %v1883_v58 = vmul.f32 %v1881_v48, %v3749_v6  ;;  %v1936_v40 = vmul.f32 %v1935_v25, %v3737_v10 }
 0x4e0   :  { %192 = vst.msk [vmem:[#allocation2 + $0xa9] sm:$0xff] %vm177_vm2, %v158_v30  ;;  %v3747_v62 = vld [vmem:[#allocation2 + $0x4a] sm:$0xff]  ;;  %v3753_v16 = vmul.f32 %v3745_v33, %v3743_v50  ;;  %v2070_v29 = vmul.f32 %v2069_v44, %v3743_v50  ;;  %v1937_v59 = vmul.f32 %v1935_v25, %v3749_v6  ;;  %v2016_v15 = vmul.f32 %v2015_v22, %v3743_v50 }
 0x4e1   :  { %1890 = vrot.lane.b32.xlu1 %v1882_v49, %s2685_s7  ;;  %v3757_v4 = vmul.f32 %v3717_v60, %v3747_v62  ;;  %v2150_v37 = vmul.f32 %v2149_v26, %v3747_v62  ;;  %v2017_v34 = vmul.f32 %v2015_v22, %v3824_v8 }
 0x4e3   :  { %v2576_v7 = vpop.eup %2575 }
 0x4e4   :  { %v1746_v54 = vmul.f32 %v2576_v7, %v1744_v47  ;;  %vm1752_vm0 = vweird.f32 %v2576_v7  ;;  %v2204_v47 = vmul.f32 %v2203_v32, %v3747_v62 }
 0x4e5   :  { %vm1753_vm2 = vmor %vm1751_vm1, %vm1752_vm0 }
 0x4e6   :  { %v1747_v2 = vmul.f32 %v2576_v7, %v1746_v54  ;;  %v3801_v24 = vld [vmem:[#allocation2 + $0xb1] sm:$0xff]  ;;  %v1909_v54 = vmul.f32 %v3767_v41, %v3737_v10 }
 0x4e7   :  { %v3761_v39 = vld [vmem:[#allocation2 + $0xb0] sm:$0xff]  ;;  %v3763_v3 = vld [vmem:[#allocation2 + $0xa8] sm:$0xff]  ;;  %v3805_v36 = vmul.f32 %v3771_v63, %v3801_v24  ;;  %v2019_v11 = vmul.f32 %v2015_v22, %v3801_v24 }
 0x4e8   :  { %v1748_v51 = vmul.f32 0.5, %v1747_v2  ;;  %v3765_v23 = vld [vmem:[#allocation2 + $0xa9] sm:$0xff]  ;;  %v3775_v57 = vmul.f32 %v3767_v41, %v3761_v39  ;;  %v1884_v0 = vmul.f32 %v1881_v48, %v3763_v3  ;;  %v3780_v46 = vmul.f32 %v3769_v18, %v3763_v3 }
 0x4e9   :  { %1892 = vrot.lane.b32.xlu1 %v1883_v58, %s2685_s7  ;;  %v3784_v21 = vmul.f32 %v3771_v63, %v3765_v23  ;;  %v3788_v35 = vmul.f32 %v3745_v33, %v3765_v23  ;;  %v1939_v27 = vmul.f32 %v1935_v25, %v3761_v39  ;;  %v1885_v28 = vmul.f32 %v1881_v48, %v3761_v39  ;;  %v3827_v48 = vld [vmem:[#allocation2 + $0xb2] sm:$0xff]  ;;  %v3830_v43 = vld [vmem:[#allocation2 + $0xaa] sm:$0xff] }
 0x4ea   :  { %v1749_v42 = vsub.f32 1.5, %v1748_v51  ;;  %v2018_v55 = vmul.f32 %v2015_v22, %v3765_v23  ;;  %v2072_v19 = vmul.f32 %v2069_v44, %v3765_v23  ;;  %v1938_v38 = vmul.f32 %v1935_v25, %v3763_v3 }
 0x4eb   :  { %v2207_v49 = vmul.f32 %v2203_v32, %v3827_v48  ;;  %v2206_v30 = vmul.f32 %v2203_v32, %v3830_v43  ;;  %v1858_v22 = vstv %s2486_s11  ;;  %s2505_s11 = sld [smem:[#allocation10 + $0x6]] }
 0x4ec   :  { %v1750_v17 = vmul.f32 %v2576_v7, %v1749_v42 }
 0x4ee   :  { %v1754_v9 = vsel %vm1753_vm2, %v2576_v7, %v1750_v17  ;;  %v2071_v7 = vmul.f32 %v2069_v44, %v3824_v8 }
 0x4ef   :  { %2536 = vpush %v1754_v9  ;;  %v2073_v9 = vmul.f32 %v2069_v44, %v3801_v24  ;;  %v1964_v44 = vmul.f32 %v3769_v18, %v3749_v6 }
 0x4f1   :  { %1894 = vrot.lane.b32.xlu1 %v1884_v0, %s2685_s7 }
 0x4f3   :  { %1950 = vrot.lane.b32.xlu0 %v1939_v27, %s2686_s8 }
 0x4f5   :  { %1896 = vrot.lane.b32.xlu2 %v1885_v28, %s2685_s7 }
 0x4f9   :  { %1944 = vrot.lane.b32.xlu1 %v1936_v40, %s2686_s8 }
 0x4fb   :  { %2078 = vrot.lane.b32.xlu0 %v2070_v29, %s2686_s8  ;;  %v1910_v29 = vmul.f32 %v3767_v41, %v3749_v6 }
 0x4fd   :  { %2028 = vrot.lane.b32.xlu2 %v2018_v55, %s2685_s7 }
 0x501   :  { %1946 = vrot.lane.b32.xlu1 %v1937_v59, %s2686_s8 }
 0x503   :  { %2082 = vrot.lane.b32.xlu0 %v2072_v19, %s2686_s8  ;;  %v2043_v19 = vmul.f32 %v3771_v63, %v3743_v50 }
 0x505   :  { %2030 = vrot.lane.b32.xlu2 %v2019_v11, %s2685_s7 }
 0x509   :  { %1948 = vrot.lane.b32.xlu1 %v1938_v38, %s2686_s8  ;;  %v1859_v38 = vmul.f32 %v1858_v22, %v3737_v10 }
 0x50b   :  { %2160 = vrot.lane.b32.xlu0 %v2151_v61, %s2685_s7 }
 0x50d   :  { %2158 = vrot.lane.b32.xlu2 %v2150_v37, %s2685_s7 }
 0x511   :  { %2024 = vrot.lane.b32.xlu1 %v2016_v15, %s2685_s7 }
 0x513   :  { %2214 = vrot.lane.b32.xlu0 %v2205_v53, %s2686_s8 }
 0x515   :  { %2212 = vrot.lane.b32.xlu2 %v2204_v47, %s2686_s8 }
 0x519   :  { %2026 = vrot.lane.b32.xlu1 %v2017_v34, %s2685_s7  ;;  %v2044_v34 = vmul.f32 %v3771_v63, %v3824_v8  ;;  %v1862_v63 = vmul.f32 %v1858_v22, %v3761_v39 }
 0x51b   :  { %2218 = vrot.lane.b32.xlu0 %v2207_v49, %s2686_s8 }
 0x51d   :  { %2216 = vrot.lane.b32.xlu2 %v2206_v30, %s2686_s8 }
 0x520   :  { %s2537_s30 = spop %2536 }
 0x521   :  { %s1757_s6 = smul.f32 %s2537_s30, %s2482_s1  ;;  %2080 = vrot.lane.b32.xlu1 %v2071_v7, %s2686_s8  ;;  %v1860_v7 = vmul.f32 %v1858_v22, %v3749_v6 }
 0x523   :  { %s1759_s9 = smul.f32 %s1757_s6, %s3708_s14  ;;  %v1761_v2 = vstv %s1757_s6  ;;  %1917 = vrot.lane.b32.xlu0 %v1909_v54, %s2685_s7 }
 0x524   :  { %v1762_v58 = vmul.f32 %v1761_v2, %v3616_v1  ;;  %v1763_v51 = vmul.f32 %v1761_v2, %v3611_v20  ;;  %v1764_v42 = vmul.f32 %v1761_v2, %v3618_v13  ;;  %v1765_v17 = vmul.f32 %v1761_v2, %v3636_v14 }
 0x525   :  { %s1760_s10 = ssub.f32 %s2483_s3, %s1759_s9  ;;  %v2152_v20 = vmul.f32 %v2149_v26, %v3830_v43  ;;  %v1911_v1 = vmul.f32 %v3767_v41, %v3763_v3  ;;  %v2153_v13 = vmul.f32 %v2149_v26, %v3827_v48  ;;  %v1963_v14 = vmul.f32 %v3769_v18, %v3737_v10 }
 0x526   :  { %v1966_v41 = vmul.f32 %v3769_v18, %v3761_v39 }
 0x527   :  { %v1766_v0 = vstv %s1760_s10  ;;  %s2504_s10 = sld [smem:[#allocation9 + $0x6]] }
 0x528   :  { %v1767_v25 = vadd.f32 %v1766_v0, %v1762_v58  ;;  %v1768_v27 = vadd.f32 %v1766_v0, %v1763_v51  ;;  %v1769_v28 = vadd.f32 %v1766_v0, %v1764_v42  ;;  %v1770_v40 = vadd.f32 %v1766_v0, %v1765_v17 }
 0x529   :  { %2084 = vrot.lane.b32.xlu1 %v2073_v9, %s2686_s8  ;;  %v2098_v0 = vmul.f32 %v3745_v33, %v3824_v8 }
 0x52a   :  { %1772 = vst.msk [vmem:[#allocation12 + $0x40] sm:$0xff] %vm598_vm3, %v1767_v25 }
 0x52b   :  { %1773 = vst.msk [vmem:[#allocation12 + $0x48] sm:$0xff] %vm598_vm3, %v1768_v27  ;;  %1919 = vrot.lane.b32.xlu0 %v1910_v29, %s2685_s7 }
 0x52c   :  { %1774 = vst.msk [vmem:[#allocation12 + $0xc0] sm:$0xff] %vm598_vm3, %v1769_v28  ;;  %v1993_v28 = vstv %s2492_s2 }
 0x52d   :  { %1775 = vst.msk [vmem:[#allocation12 + $0xc8] sm:$0xff] %vm598_vm3, %v1770_v40  ;;  %v1997_v29 = vmul.f32 %v1993_v28, %v3801_v24 }
 0x531   :  { %2162 = vrot.lane.b32.xlu1 %v2152_v20, %s2685_s7 }
 0x533   :  { %1921 = vrot.lane.b32.xlu0 %v1911_v1, %s2685_s7  ;;  %v2100_v1 = vmul.f32 %v3745_v33, %v3801_v24  ;;  %v1861_v33 = vmul.f32 %v1858_v22, %v3763_v3 }
 0x539   :  { %2164 = vrot.lane.b32.xlu1 %v2153_v13, %s2685_s7 }
 0x53b   :  { %1971 = vrot.lane.b32.xlu0 %v1963_v14, %s2686_s8 }
 0x543   :  { %1973 = vrot.lane.b32.xlu0 %v1964_v44, %s2686_s8  ;;  %v1994_v44 = vmul.f32 %v1993_v28, %v3743_v50 }
 0x54b   :  { %1977 = vrot.lane.b32.xlu0 %v1966_v41, %s2686_s8 }
 0x550   :  { %v1784_v55 = vpop.xlane.xlu2 %1783 }
 0x551   :  { %v1785_v59 = vrot.slane %v1784_v55, 4 }
 0x552   :  { %v1805_v11 = vpop.xlane.xlu0 %1804 }
 0x553   :  { %v1786_v26 = vadd.f32 %v1785_v59, %v1784_v55  ;;  %v1806_v61 = vrot.slane %v1805_v11, 4  ;;  %v1891_v37 = vpop.permute.xlu1 %1890  ;;  %2051 = vrot.lane.b32.xlu0 %v2043_v19, %s2685_s7  ;;  %v2179_v59 = vmul.f32 %v3717_v60, %v3830_v43 }
 0x554   :  { %v1902_v15 = vadd.f32 %v1891_v37, %v1859_v38  ;;  %v1995_v38 = vmul.f32 %v1993_v28, %v3824_v8  ;;  %v2180_v37 = vmul.f32 %v3717_v60, %v3827_v48 }
 0x555   :  { %v1787_v32 = vrot.slane %v1786_v26, 2  ;;  %v1807_v53 = vadd.f32 %v1806_v61, %v1805_v11 }
 0x557   :  { %v1808_v18 = vrot.slane %v1807_v53, 2  ;;  %v1788_v47 = vadd.f32 %v1787_v32, %v1786_v26 }
 0x558   :  { %v1897_v17 = vpop.permute.xlu2 %1896 }
 0x559   :  { %v1789_v49 = vrot.slane %v1788_v47, 1  ;;  %v1809_v30 = vadd.f32 %v1808_v18, %v1807_v53  ;;  %v1905_v25 = vadd.f32 %v1897_v17, %v1862_v63  ;;  %v1996_v53 = vmul.f32 %v1993_v28, %v3765_v23 }
 0x55a   :  { %v3906_v28 = vstv %s2487_s13 }
 0x55b   :  { %v1893_v54 = vpop.permute.xlu1 %1892  ;;  %2053 = vrot.lane.b32.xlu0 %v2044_v34, %s2685_s7  ;;  %v1790_v2 = vadd.f32 %v1789_v49, %v1788_v47  ;;  %v1810_v58 = vrot.slane %v1809_v30, 1 }
 0x55c   :  { %v1903_v51 = vadd.f32 %v1893_v54, %v1860_v7  ;;  %v2127_v7 = vstv %s2498_s12 }
 0x55d   :  { %2538 = vpush %v1790_v2  ;;  %v1811_v42 = vadd.f32 %v1810_v58, %v1809_v30  ;;  %v2130_v54 = vmul.f32 %v2127_v7, %v3830_v43 }
 0x55f   :  { %2540 = vpush %v1811_v42  ;;  %v2128_v42 = vmul.f32 %v2127_v7, %v3747_v62 }
 0x560   :  { %v2029_v47 = vpop.permute.xlu2 %2028 }
 0x563   :  { %2107 = vrot.lane.b32.xlu0 %v2098_v0, %s2686_s8  ;;  %v1895_v9 = vpop.permute.xlu1 %1894 }
 0x565   :  { %v1951_v27 = vpop.permute.xlu0 %1950 }
 0x566   :  { %v1959_v40 = vadd.f32 %v1951_v27, %v1905_v25 }
 0x568   :  { %v2001_v20 = vadd.f32 %v1997_v29, %v1959_v40  ;;  %v2031_v0 = vpop.permute.xlu2 %2030 }
 0x56b   :  { %2111 = vrot.lane.b32.xlu0 %v2100_v1, %s2686_s8  ;;  %v1945_v13 = vpop.permute.xlu1 %1944  ;;  %v2129_v1 = vmul.f32 %v2127_v7, %v3710_v52 }
 0x56c   :  { %v1956_v14 = vadd.f32 %v1945_v13, %v1902_v15  ;;  %v1904_v15 = vadd.f32 %v1895_v9, %v1861_v33  ;;  %v2131_v33 = vmul.f32 %v2127_v7, %v3827_v48 }
 0x56d   :  { %v2079_v41 = vpop.permute.xlu0 %2078 }
 0x56e   :  { %v1998_v55 = vadd.f32 %v1994_v44, %v1956_v14  ;;  %v1871_v14 = vmul.f32 %v3906_v28, %v3737_v10 }
 0x570   :  { %v2159_v27 = vpop.permute.xlu2 %2158 }
 0x573   :  { %2189 = vrot.lane.b32.xlu0 %v2179_v59, %s2685_s7  ;;  %v1947_v19 = vpop.permute.xlu1 %1946 }
 0x574   :  { %v1957_v11 = vadd.f32 %v1947_v19, %v1903_v51  ;;  %v2039_v19 = vadd.f32 %v2031_v0, %v2001_v20  ;;  %v3924_v0 = vstv %s2493_s21 }
 0x575   :  { %v2083_v26 = vpop.permute.xlu0 %2082 }
 0x576   :  { %v1999_v61 = vadd.f32 %v1995_v38, %v1957_v11 }
 0x578   :  { %v2213_v11 = vpop.permute.xlu2 %2212 }
 0x57b   :  { %2191 = vrot.lane.b32.xlu0 %v2180_v37, %s2685_s7  ;;  %v1949_v32 = vpop.permute.xlu1 %1948 }
 0x57c   :  { %v1958_v18 = vadd.f32 %v1949_v32, %v1904_v15 }
 0x57d   :  { %v2161_v34 = vpop.permute.xlu0 %2160 }
 0x57e   :  { %v2000_v49 = vadd.f32 %v1996_v53, %v1958_v18 }
 0x580   :  { %v2038_v30 = vadd.f32 %v2029_v47, %v2000_v49 }
 0x582   :  { %v2092_v2 = vadd.f32 %v2083_v26, %v2038_v30 }
 0x583   :  { %v2025_v22 = vpop.permute.xlu1 %2024 }
 0x584   :  { %v2036_v58 = vadd.f32 %v2025_v22, %v1998_v55  ;;  %v2134_v51 = vadd.f32 %v2130_v54, %v2092_v2  ;;  %v2217_v22 = vpop.permute.xlu2 %2216 }
 0x585   :  { %v2215_v60 = vpop.permute.xlu0 %2214 }
 0x586   :  { %v2090_v17 = vadd.f32 %v2079_v41, %v2036_v58 }
 0x588   :  { %v2132_v63 = vadd.f32 %v2128_v42, %v2090_v17 }
 0x58a   :  { %v2170_v47 = vadd.f32 %v2159_v27, %v2132_v63 }
 0x58b   :  { %v2027_v9 = vpop.permute.xlu1 %2026 }
 0x58c   :  { %v2037_v40 = vadd.f32 %v2027_v9, %v1999_v61  ;;  %v1872_v61 = vmul.f32 %v3906_v28, %v3749_v6  ;;  %v3918_v6 = vadd.f32 %v2213_v11, %v2170_v47  ;;  %v2006_v47 = vmul.f32 %v3924_v0, %v3824_v8 }
 0x58d   :  { %v3900_v25 = vpop.permute.xlu0 %2218 }
 0x58e   :  { %s2539_s14 = spop %2538  ;;  %v2272_v9 = vmul.f32 %v3918_v6, %v3918_v6 }
 0x58f   :  { %s3902_s15 = smul.f32 0.001953125, %s2539_s14 }
 0x590   :  { %s2541_s16 = spop %2540  ;;  %v2276_v11 = vsel %vm598_vm3, %v2272_v9, 0.0 }
 0x591   :  { %s1814_s17 = smul.f32 %s3902_s15, %s3902_s15 }
 0x592   :  { %s1813_s18 = smul.f32 0.001953125, %s2541_s16 }
 0x593   :  { %v2081_v29 = vpop.permute.xlu1 %2080 }
 0x594   :  { %s1815_s19 = ssub.f32 %s1813_s18, %s1814_s17  ;;  %v2091_v13 = vadd.f32 %v2081_v29, %v2037_v40  ;;  %v2255_v29 = vsel %vm598_vm3, %v3918_v6, 0.0 }
 0x595   :  { %v1918_v44 = vpop.permute.xlu0 %1917 }
 0x596   :  { %s1816_s20 = sadd.f32 1e-05, %s1815_s19  ;;  %v2133_v41 = vadd.f32 %v2129_v1, %v2091_v13  ;;  %v1929_v55 = vadd.f32 %v1918_v44, %v1871_v14 }
 0x598   :  { %v1817_v59 = vstv %s1816_s20  ;;  %v2171_v18 = vadd.f32 %v2161_v34, %v2133_v41  ;;  %v2005_v41 = vmul.f32 %v3924_v0, %v3743_v50 }
 0x599   :  { %2577 = vrsqrt.f32 %v1817_v59  ;;  %vm1824_vm5 = vweird.f32 %v1817_v59 }
 0x59a   :  { %v3914_v54 = vadd.f32 %v2215_v60, %v2171_v18 }
 0x59b   :  { %v2085_v38 = vpop.permute.xlu1 %2084 }
 0x59c   :  { %v2093_v26 = vadd.f32 %v2085_v38, %v2039_v19  ;;  %v2273_v34 = vmul.f32 %v3914_v54, %v3914_v54  ;;  %v2256_v63 = vsel %vm598_vm3, %v3914_v54, 0.0 }
 0x59d   :  { %v1920_v37 = vpop.permute.xlu0 %1919  ;;  %v2257_v44 = vadd.f32 %v2256_v63, %v2255_v29 }
 0x59e   :  { %v1930_v15 = vadd.f32 %v1920_v37, %v1872_v61  ;;  %v2135_v32 = vadd.f32 %v2131_v33, %v2093_v26  ;;  %v2277_v13 = vsel %vm598_vm3, %v2273_v34, 0.0 }
 0x59f   :  { %v2578_v53 = vpop.eup %2577  ;;  %v2278_v61 = vadd.f32 %v2277_v13, %v2276_v11 }
 0x5a0   :  { %v1819_v10 = vmul.f32 %v2578_v53, %v1817_v59  ;;  %vm1825_vm4 = vweird.f32 %v2578_v53 }
 0x5a1   :  { %vm1826_vm6 = vmor %vm1824_vm5, %vm1825_vm4 }
 0x5a2   :  { %v1820_v49 = vmul.f32 %v2578_v53, %v1819_v10 }
 0x5a3   :  { %v2163_v30 = vpop.permute.xlu1 %2162 }
 0x5a4   :  { %v2172_v20 = vadd.f32 %v2163_v30, %v2134_v51  ;;  %v1821_v2 = vmul.f32 0.5, %v1820_v49 }
 0x5a5   :  { %v3916_v58 = vpop.permute.xlu0 %1921 }
 0x5a6   :  { %v3920_v7 = vadd.f32 %v2217_v22, %v2172_v20  ;;  %v1822_v42 = vsub.f32 1.5, %v1821_v2 }
 0x5a8   :  { %v1823_v17 = vmul.f32 %v2578_v53, %v1822_v42  ;;  %v2274_v51 = vmul.f32 %v3920_v7, %v3920_v7  ;;  %v2258_v1 = vsel %vm598_vm3, %v3920_v7, 0.0 }
 0x5a9   :  { %v2259_v26 = vadd.f32 %v2258_v1, %v2257_v44 }
 0x5aa   :  { %v1827_v60 = vsel %vm1826_vm6, %v2578_v53, %v1823_v17  ;;  %v2279_v38 = vsel %vm598_vm3, %v2274_v51, 0.0 }
 0x5ab   :  { %2542 = vpush %v1827_v60  ;;  %v2165_v27 = vpop.permute.xlu1 %2164  ;;  %v2280_v50 = vadd.f32 %v2279_v38, %v2278_v61 }
 0x5ac   :  { %v2173_v40 = vadd.f32 %v2165_v27, %v2135_v32 }
 0x5ad   :  { %v1972_v14 = vpop.permute.xlu0 %1971 }
 0x5ae   :  { %v3940_v59 = vadd.f32 %v3900_v25, %v2173_v40  ;;  %v1983_v19 = vadd.f32 %v1972_v14, %v1929_v55  ;;  %v1873_v14 = vmul.f32 %v3906_v28, %v3763_v3  ;;  %v1874_v3 = vmul.f32 %v3906_v28, %v3761_v39 }
 0x5b0   :  { %v2260_v33 = vsel %vm598_vm3, %v3940_v59, 0.0  ;;  %v2275_v37 = vmul.f32 %v3940_v59, %v3940_v59  ;;  %v3948_v32 = vadd.f32 %v2005_v41, %v1983_v19  ;;  %v1931_v19 = vadd.f32 %v3916_v58, %v1873_v14 }
 0x5b1   :  { %v2261_v53 = vadd.f32 %v2260_v33, %v2259_v26 }
 0x5b2   :  { %v2281_v25 = vsel %vm598_vm3, %v2275_v37, 0.0 }
 0x5b3   :  { %2262 = vadd.xlane.f32.xlu1 %v2261_v53  ;;  %v2282_v55 = vadd.f32 %v2281_v25, %v2280_v50  ;;  %v2007_v53 = vmul.f32 %v3924_v0, %v3765_v23 }
 0x5b5   :  { %2283 = vadd.xlane.f32.xlu2 %v2282_v55  ;;  %v1974_v10 = vpop.permute.xlu0 %1973 }
 0x5b6   :  { %v1984_v18 = vadd.f32 %v1974_v10, %v1930_v15  ;;  %v3965_v15 = vstv %s2499_s22  ;;  %s2506_s22 = sld [smem:[#allocation9 + $0x7]] }
 0x5b7   :  { %v2139_v39 = vmul.f32 %v3965_v15, %v3747_v62  ;;  %v2142_v28 = vmul.f32 %v3965_v15, %v3827_v48 }
 0x5b8   :  { %v2010_v49 = vadd.f32 %v2006_v47, %v1984_v18 }
 0x5bd   :  { %v3953_v30 = vpop.permute.xlu0 %1977 }
 0x5c5   :  { %v3955_v20 = vpop.permute.xlu0 %2051 }
 0x5c6   :  { %v2063_v23 = vadd.f32 %v3955_v20, %v3948_v32 }
 0x5cc   :  { %1923 = vrot.lane.b32.xlu1 %v3775_v57, %s2685_s7  ;;  %v2140_v57 = vmul.f32 %v3965_v15, %v3710_v52 }
 0x5cd   :  { %1975 = vrot.lane.b32.xlu2 %v3780_v46, %s2686_s8  ;;  %v2054_v2 = vpop.permute.xlu0 %2053 }
 0x5ce   :  { %v2064_v22 = vadd.f32 %v2054_v2, %v2010_v49  ;;  %v2008_v49 = vmul.f32 %v3924_v0, %v3801_v24  ;;  %v2141_v0 = vmul.f32 %v3965_v15, %v3830_v43 }
 0x5d4   :  { %2105 = vrot.lane.b32.xlu1 %v3753_v16, %s2686_s8 }
 0x5d5   :  { %2055 = vrot.lane.b32.xlu2 %v3784_v21, %s2685_s7  ;;  %v2108_v8 = vpop.permute.xlu0 %2107 }
 0x5d6   :  { %v2118_v42 = vadd.f32 %v2108_v8, %v2064_v22 }
 0x5d8   :  { %v3969_v17 = vadd.f32 %v2140_v57, %v2118_v42 }
 0x5dc   :  { %s2543_s27 = spop %2542  ;;  %2109 = vrot.lane.b32.xlu1 %v3788_v35, %s2686_s8 }
 0x5dd   :  { %s1830_s0 = smul.f32 %s2543_s27, %s2484_s25  ;;  %2057 = vrot.lane.b32.xlu2 %v3805_v36, %s2685_s7  ;;  %v2112_v8 = vpop.permute.xlu0 %2111  ;;  %s2507_s25 = sld [smem:[#allocation10 + $0x7]] }
 0x5df   :  { %s1832_s28 = smul.f32 %s1830_s0, %s3902_s15  ;;  %v1834_v16 = vstv %s1830_s0 }
 0x5e0   :  { %v1835_v46 = vmul.f32 %v1834_v16, %v3696_v31  ;;  %v1836_v21 = vmul.f32 %v1834_v16, %v3698_v5  ;;  %v1837_v34 = vmul.f32 %v1834_v16, %v3700_v56  ;;  %v1838_v51 = vmul.f32 %v1834_v16, %v3727_v45 }
 0x5e1   :  { %s1833_s5 = ssub.f32 %s2485_s26, %s1832_s28  ;;  %v2230_v31 = vstv %s2503_s29  ;;  %s2687_s29 = smov [#allocation12]  }
 0x5e2   :  { %v2232_v5 = vmul.f32 %v2230_v31, %v3710_v52  ;;  %v2231_v56 = vmul.f32 %v2230_v31, %v3747_v62  ;;  %v2233_v45 = vmul.f32 %v2230_v31, %v3830_v43 }
 0x5e3   :  { %v1839_v60 = vstv %s1833_s5  ;;  %s2405_s5 = sshll.u32 %s2687_s29, 4  ;;  %s2406_s5 = int_to_ptr.vmem [resolvable:$true] %s2405_s5 }
 0x5e4   :  { %v1840_v63 = vadd.f32 %v1839_v60, %v1835_v46  ;;  %v1841_v9 = vadd.f32 %v1839_v60, %v1836_v21  ;;  %v1842_v35 = vadd.f32 %v1839_v60, %v1837_v34  ;;  %2187 = vrot.lane.b32.xlu1 %v3724_v12, %s2685_s7  ;;  %v1843_v36 = vadd.f32 %v1839_v60, %v1838_v51 }
 0x5e5   :  { %2185 = vrot.lane.b32.xlu2 %v3757_v4, %s2685_s7  ;;  %v2234_v12 = vmul.f32 %v2230_v31, %v3827_v48 }
 0x5e6   :  { %1845 = vst.msk [vmem:[#allocation12 + $0x50] sm:$0xff] %vm598_vm3, %v1840_v63  ;;  %v2190_v63 = vpop.permute.xlu0 %2189 }
 0x5e7   :  { %1846 = vst.msk [vmem:[#allocation12 + $0x58] sm:$0xff] %vm598_vm3, %v1841_v9 }
 0x5e8   :  { %1847 = vst.msk [vmem:[#allocation12 + $0xd0] sm:$0xff] %vm598_vm3, %v1842_v35 }
 0x5e9   :  { %1848 = vst.msk [vmem:[#allocation12 + $0xd8] sm:$0xff] %vm598_vm3, %v1843_v36 }
 0x5ec   :  { %2241 = vrot.lane.b32.xlu1 %v2232_v5, %s2686_s8 }
 0x5ed   :  { %2239 = vrot.lane.b32.xlu2 %v2231_v56, %s2686_s8 }
 0x5f4   :  { %2245 = vrot.lane.b32.xlu1 %v2234_v12, %s2686_s8 }
 0x5f5   :  { %2243 = vrot.lane.b32.xlu2 %v2233_v45, %s2686_s8 }
 0x626   :  { %v2263_v4 = vpop.xlane.xlu1 %2262 }
 0x627   :  { %v2264_v27 = vrot.slane %v2263_v4, 4 }
 0x628   :  { %v2284_v40 = vpop.xlane.xlu2 %2283 }
 0x629   :  { %v2265_v29 = vadd.f32 %v2264_v27, %v2263_v4  ;;  %v2285_v1 = vrot.slane %v2284_v40, 4  ;;  %v2192_v4 = vpop.permute.xlu0 %2191 }
 0x62b   :  { %v2266_v52 = vrot.slane %v2265_v29, 2  ;;  %v2286_v13 = vadd.f32 %v2285_v1, %v2284_v40 }
 0x62d   :  { %v2287_v44 = vrot.slane %v2286_v13, 2  ;;  %v2267_v41 = vadd.f32 %v2266_v52, %v2265_v29 }
 0x62f   :  { %v2268_v11 = vrot.slane %v2267_v41, 1  ;;  %v2288_v38 = vadd.f32 %v2287_v44, %v2286_v13 }
 0x630   :  { %v1976_v26 = vpop.permute.xlu2 %1975 }
 0x631   :  { %v1985_v61 = vadd.f32 %v1976_v26, %v1931_v19  ;;  %v2269_v33 = vadd.f32 %v2268_v11, %v2267_v41  ;;  %v2289_v37 = vrot.slane %v2288_v38, 1 }
 0x633   :  { %2544 = vpush %v2269_v33  ;;  %v2290_v50 = vadd.f32 %v2289_v37, %v2288_v38  ;;  %v2011_v25 = vadd.f32 %v2007_v53, %v1985_v61 }
 0x635   :  { %2546 = vpush %v2290_v50 }
 0x638   :  { %v2056_v55 = vpop.permute.xlu2 %2055 }
 0x639   :  { %v2065_v34 = vadd.f32 %v2056_v55, %v2011_v25 }
 0x63e   :  { %v1924_v10 = vpop.permute.xlu1 %1923 }
 0x63f   :  { %v1932_v18 = vadd.f32 %v1924_v10, %v1874_v3 }
 0x640   :  { %v2058_v58 = vpop.permute.xlu2 %2057 }
 0x641   :  { %v1986_v47 = vadd.f32 %v3953_v30, %v1932_v18 }
 0x643   :  { %v2012_v2 = vadd.f32 %v2008_v49, %v1986_v47 }
 0x645   :  { %v2066_v22 = vadd.f32 %v2058_v58, %v2012_v2 }
 0x646   :  { %v2106_v42 = vpop.permute.xlu1 %2105 }
 0x647   :  { %v2120_v57 = vadd.f32 %v2112_v8, %v2066_v22  ;;  %v2117_v16 = vadd.f32 %v2106_v42, %v2063_v23 }
 0x648   :  { %v2186_v21 = vpop.permute.xlu2 %2185 }
 0x649   :  { %v2143_v46 = vadd.f32 %v2139_v39, %v2117_v16  ;;  %v2146_v30 = vadd.f32 %v2142_v28, %v2120_v57 }
 0x64b   :  { %v2197_v9 = vadd.f32 %v2186_v21, %v2143_v46  ;;  %v2200_v1 = vadd.f32 %v2192_v4, %v2146_v30 }
 0x64e   :  { %v2110_v24 = vpop.permute.xlu1 %2109 }
 0x64f   :  { %v2119_v32 = vadd.f32 %v2110_v24, %v2065_v34 }
 0x650   :  { %v2240_v51 = vpop.permute.xlu2 %2239 }
 0x651   :  { %v2145_v20 = vadd.f32 %v2141_v0, %v2119_v32  ;;  %v4014_v35 = vadd.f32 %v2240_v51, %v2197_v9 }
 0x653   :  { %v2199_v31 = vadd.f32 %v2190_v63, %v2145_v20  ;;  %v2345_v56 = vmul.f32 %v4014_v35, %v4014_v35  ;;  %v2328_v45 = vsel %vm598_vm3, %v4014_v35, 0.0 }
 0x655   :  { %v2349_v40 = vsel %vm598_vm3, %v2345_v56, 0.0 }
 0x656   :  { %v2188_v60 = vpop.permute.xlu1 %2187 }
 0x657   :  { %v2198_v62 = vadd.f32 %v2188_v60, %v3969_v17 }
 0x658   :  { %v2244_v36 = vpop.permute.xlu2 %2243 }
 0x659   :  { %v4021_v12 = vadd.f32 %v2244_v36, %v2199_v31 }
 0x65b   :  { %v2347_v29 = vmul.f32 %v4021_v12, %v4021_v12  ;;  %v2331_v14 = vsel %vm598_vm3, %v4021_v12, 0.0 }
 0x65d   :  { %v2352_v38 = vsel %vm598_vm3, %v2347_v29, 0.0 }
 0x65e   :  { %v2242_v48 = vpop.permute.xlu1 %2241 }
 0x65f   :  { %v4017_v5 = vadd.f32 %v2242_v48, %v2198_v62 }
 0x661   :  { %v2329_v43 = vsel %vm598_vm3, %v4017_v5, 0.0  ;;  %v2346_v15 = vmul.f32 %v4017_v5, %v4017_v5 }
 0x662   :  { %v2330_v27 = vadd.f32 %v2329_v43, %v2328_v45 }
 0x663   :  { %v2350_v17 = vsel %vm598_vm3, %v2346_v15, 0.0 }
 0x664   :  { %s2545_s7 = spop %2544  ;;  %v2351_v13 = vadd.f32 %v2350_v17, %v2349_v40  ;;  %v2332_v41 = vadd.f32 %v2331_v14, %v2330_v27 }
 0x665   :  { %s4033_s8 = smul.f32 0.001953125, %s2545_s7 }
 0x666   :  { %s2547_s1 = spop %2546  ;;  %v2246_v52 = vpop.permute.xlu1 %2245  ;;  %v2353_v61 = vadd.f32 %v2352_v38, %v2351_v13 }
 0x667   :  { %s2293_s3 = smul.f32 %s4033_s8, %s4033_s8  ;;  %v4039_v44 = vadd.f32 %v2246_v52, %v2200_v1 }
 0x668   :  { %s2292_s30 = smul.f32 0.001953125, %s2547_s1  ;;  %s2407_s1 = sshll.u32 %s4074_s4, 4  ;;  %s2408_s1 = int_to_ptr.hbm [resolvable:$true] %s2407_s1 }
 0x669   :  { %v2348_v19 = vmul.f32 %v4039_v44, %v4039_v44  ;;  %v2333_v11 = vsel %vm598_vm3, %v4039_v44, 0.0 }
 0x66a   :  { %s2294_s6 = ssub.f32 %s2292_s30, %s2293_s3  ;;  %v2334_v26 = vadd.f32 %v2333_v11, %v2332_v41 }
 0x66b   :  { %v2354_v33 = vsel %vm598_vm3, %v2348_v19, 0.0 }
 0x66c   :  { %s2295_s9 = sadd.f32 1e-05, %s2294_s6  ;;  %2335 = vadd.xlane.f32.xlu0 %v2334_v26  ;;  %v2355_v37 = vadd.f32 %v2354_v33, %v2353_v61 }
 0x66e   :  { %v2296_v53 = vstv %s2295_s9  ;;  %2356 = vadd.xlane.f32.xlu2 %v2355_v37 }
 0x66f   :  { %2579 = vrsqrt.f32 %v2296_v53  ;;  %vm2303_vm8 = vweird.f32 %v2296_v53 }
 0x675   :  { %v2580_v50 = vpop.eup %2579 }
 0x676   :  { %v2298_v25 = vmul.f32 %v2580_v50, %v2296_v53  ;;  %vm2304_vm7 = vweird.f32 %v2580_v50 }
 0x677   :  { %vm2305_vm9 = vmor %vm2303_vm8, %vm2304_vm7 }
 0x678   :  { %v2299_v55 = vmul.f32 %v2580_v50, %v2298_v25 }
 0x67a   :  { %v2300_v3 = vmul.f32 0.5, %v2299_v55 }
 0x67c   :  { %v2301_v10 = vsub.f32 1.5, %v2300_v3 }
 0x67e   :  { %v2302_v18 = vmul.f32 %v2580_v50, %v2301_v10 }
 0x680   :  { %v2306_v58 = vsel %vm2305_vm9, %v2580_v50, %v2302_v18 }
 0x681   :  { %2548 = vpush %v2306_v58 }
 0x6b2   :  { %s2549_s2 = spop %2548 }
 0x6b3   :  { %s2309_s12 = smul.f32 %s2549_s2, %s2504_s10 }
 0x6b5   :  { %s2311_s13 = smul.f32 %s2309_s12, %s4033_s8  ;;  %v2313_v47 = vstv %s2309_s12 }
 0x6b6   :  { %v2314_v49 = vmul.f32 %v2313_v47, %v3918_v6  ;;  %v2315_v2 = vmul.f32 %v2313_v47, %v3914_v54  ;;  %v2316_v23 = vmul.f32 %v2313_v47, %v3920_v7  ;;  %v2317_v22 = vmul.f32 %v2313_v47, %v3940_v59 }
 0x6b7   :  { %s2312_s14 = ssub.f32 %s2505_s11, %s2311_s13 }
 0x6b9   :  { %v2318_v8 = vstv %s2312_s14 }
 0x6ba   :  { %v2319_v42 = vadd.f32 %v2318_v8, %v2314_v49  ;;  %v2320_v57 = vadd.f32 %v2318_v8, %v2315_v2  ;;  %v2321_v16 = vadd.f32 %v2318_v8, %v2316_v23  ;;  %v2322_v39 = vadd.f32 %v2318_v8, %v2317_v22 }
 0x6bc   :  { %2324 = vst.msk [vmem:[#allocation12 + $0x60] sm:$0xff] %vm598_vm3, %v2319_v42 }
 0x6bd   :  { %2325 = vst.msk [vmem:[#allocation12 + $0x68] sm:$0xff] %vm598_vm3, %v2320_v57 }
 0x6be   :  { %2326 = vst.msk [vmem:[#allocation12 + $0xe0] sm:$0xff] %vm598_vm3, %v2321_v16 }
 0x6bf   :  { %2327 = vst.msk [vmem:[#allocation12 + $0xe8] sm:$0xff] %vm598_vm3, %v2322_v39 }
 0x6df   :  { %v2336_v6 = vpop.xlane.xlu0 %2335 }
 0x6e0   :  { %v2337_v28 = vrot.slane %v2336_v6, 4 }
 0x6e1   :  { %v2357_v54 = vpop.xlane.xlu2 %2356 }
 0x6e2   :  { %v2338_v46 = vadd.f32 %v2337_v28, %v2336_v6  ;;  %v2358_v7 = vrot.slane %v2357_v54, 4 }
 0x6e4   :  { %v2339_v30 = vrot.slane %v2338_v46, 2  ;;  %v2359_v59 = vadd.f32 %v2358_v7, %v2357_v54 }
 0x6e6   :  { %v2340_v21 = vadd.f32 %v2339_v30, %v2338_v46  ;;  %v2360_v34 = vrot.slane %v2359_v59, 2 }
 0x6e8   :  { %v2361_v24 = vadd.f32 %v2360_v34, %v2359_v59  ;;  %v2341_v0 = vrot.slane %v2340_v21, 1 }
 0x6ea   :  { %v2342_v32 = vadd.f32 %v2341_v0, %v2340_v21  ;;  %v2362_v20 = vrot.slane %v2361_v24, 1 }
 0x6ec   :  { %2550 = vpush %v2342_v32  ;;  %v2363_v51 = vadd.f32 %v2362_v20, %v2361_v24 }
 0x6ee   :  { %2552 = vpush %v2363_v51 }
 0x71d   :  { %s2551_s15 = spop %2550 }
 0x71e   :  { %s2344_s16 = smul.f32 0.001953125, %s2551_s15 }
 0x71f   :  { %s2553_s17 = spop %2552 }
 0x720   :  { %s2366_s18 = smul.f32 %s2344_s16, %s2344_s16 }
 0x721   :  { %s2365_s19 = smul.f32 0.001953125, %s2553_s17 }
 0x723   :  { %s2367_s20 = ssub.f32 %s2365_s19, %s2366_s18 }
 0x725   :  { %s2368_s21 = sadd.f32 1e-05, %s2367_s20 }
 0x727   :  { %v2369_v60 = vstv %s2368_s21 }
 0x728   :  { %2581 = vrsqrt.f32 %v2369_v60  ;;  %vm2376_vm11 = vweird.f32 %v2369_v60 }
 0x72e   :  { %v2582_v63 = vpop.eup %2581 }
 0x72f   :  { %v2371_v9 = vmul.f32 %v2582_v63, %v2369_v60  ;;  %vm2377_vm10 = vweird.f32 %v2582_v63 }
 0x730   :  { %vm2378_vm12 = vmor %vm2376_vm11, %vm2377_vm10 }
 0x731   :  { %v2372_v62 = vmul.f32 %v2582_v63, %v2371_v9 }
 0x733   :  { %v2373_v36 = vmul.f32 0.5, %v2372_v62 }
 0x735   :  { %v2374_v48 = vsub.f32 1.5, %v2373_v36 }
 0x737   :  { %v2375_v31 = vmul.f32 %v2582_v63, %v2374_v48 }
 0x739   :  { %v2379_v56 = vsel %vm2378_vm12, %v2582_v63, %v2375_v31 }
 0x73a   :  { %2554 = vpush %v2379_v56 }
 0x76b   :  { %s2555_s26 = spop %2554 }
 0x76c   :  { %s2382_s27 = smul.f32 %s2555_s26, %s2506_s22 }
 0x76e   :  { %s2384_s0 = smul.f32 %s2382_s27, %s2344_s16  ;;  %v2386_v43 = vstv %s2382_s27 }
 0x76f   :  { %v2387_v15 = vmul.f32 %v2386_v43, %v4014_v35  ;;  %v2388_v45 = vmul.f32 %v2386_v43, %v4017_v5  ;;  %v2389_v17 = vmul.f32 %v2386_v43, %v4021_v12  ;;  %v2390_v4 = vmul.f32 %v2386_v43, %v4039_v44 }
 0x770   :  { %s2385_s28 = ssub.f32 %s2507_s25, %s2384_s0 }
 0x772   :  { %v2391_v27 = vstv %s2385_s28 }
 0x773   :  { %v2392_v40 = vadd.f32 %v2391_v27, %v2387_v15  ;;  %v2393_v29 = vadd.f32 %v2391_v27, %v2388_v45  ;;  %v2394_v1 = vadd.f32 %v2391_v27, %v2389_v17  ;;  %v2395_v52 = vadd.f32 %v2391_v27, %v2390_v4 }
 0x775   :  { %2397 = vst.msk [vmem:[#allocation12 + $0x70] sm:$0xff] %vm598_vm3, %v2392_v40 }
 0x776   :  { %2398 = vst.msk [vmem:[#allocation12 + $0x78] sm:$0xff] %vm598_vm3, %v2393_v29 }
 0x777   :  { %2399 = vst.msk [vmem:[#allocation12 + $0xf0] sm:$0xff] %vm598_vm3, %v2394_v1 }
 0x778   :  { %2400 = vst.msk [vmem:[#allocation12 + $0xf8] sm:$0xff] %vm598_vm3, %v2395_v52 }
 0x779   :  { %2413 = dma.vmem_to_hbm [thread:$0]  %s2406_s5, 4096, %s2408_s1, [#allocation5], %s2678_s23, %s2678_s23, %s2679_s24  }
 0x77a   :  { %2675 = dma.done.wait [#allocation5], 4096  }
 0x77b   :  { %2676 = vsyncadd [#allocation5], 4294963200 }
 0x77c   :  { %2418 = vsyncpa [#allocation4], 1 }
 0x77d   :  { %2419 = vsyncpa [#allocation5], 1 }
 0x77e   :  { %2420 = vsyncpa [#allocation6], 1 }
 0x77f   :  { %2421 = vsyncpa [#allocation7], 1 }
 0x780   :  { %2422 = vsyncpa [#allocation11], 1 }

</bundles_post_ra>
